<compile_context>
chip_gen: v7x
topology: tpu7x:2x2x1
jax: 0.10.0
libtpu: 0.0.40
codegen_flags: <defaults>
</compile_context>

<pallas_src>
import math
import numpy as np

import jax
import jax.numpy as jnp
from jax import lax
from jax.experimental import pallas as pl
from jax.experimental.pallas import tpu as pltpu


# ----------------------------------------------------------------------------
# bilinear interpolation coefficients (PyTorch F.interpolate semantics)
# ----------------------------------------------------------------------------
def _interp_coeffs(out_size, in_size, align_corners):
    coeffs = []
    for o in range(out_size):
        if align_corners:
            src = 0.0 if out_size == 1 else o * (in_size - 1) / (out_size - 1)
        else:
            src = (o + 0.5) * in_size / out_size - 0.5
            src = max(src, 0.0)
        src = min(src, float(in_size - 1))
        i0 = min(int(math.floor(src)), in_size - 1)
        i1 = min(i0 + 1, in_size - 1)
        w = src - i0
        coeffs.append((i0, i1, float(w)))
    return coeffs


def _interp_matrix(out_size, in_size, align_corners):
    M = np.zeros((out_size, in_size), np.float32)
    for o, (i0, i1, w) in enumerate(_interp_coeffs(out_size, in_size, align_corners)):
        M[o, i0] += 1.0 - w
        M[o, i1] += w
    return jnp.asarray(M)


# ----------------------------------------------------------------------------
# BlockSpec helper for grid-invariant (weight-like) operands: constant index
# map + single buffering (double-buffering buys nothing when the block never
# changes, it only costs VMEM).
# ----------------------------------------------------------------------------
def _const_spec(shape):
    ndim = len(shape)
    index_map = lambda b: (0,) * ndim
    try:
        return pl.BlockSpec(shape, index_map, pipeline_mode=pl.Buffered(1))
    except (TypeError, AttributeError):  # older jax: fall back to default buffering
        return pl.BlockSpec(shape, index_map)


# ----------------------------------------------------------------------------
# fused FeatureFusionBlock kernel factory
# ----------------------------------------------------------------------------
def _make_ffb_kernel(N, H, W, C, Cout, align_corners, has_res, res_hw,
                     out_dtype=jnp.float32):
    Wp = ((W + 1) + 7) // 8 * 8          # padded row width: >= W+1, multiple of 8
    HWp = H * Wp
    Ho, Wo = 2 * H, 2 * W
    C3 = 3 * C
    needs_resize = bool(has_res and res_hw is not None and tuple(res_hw) != (H, W))
    Hr, Wr = (res_hw if (has_res and res_hw is not None) else (H, W))

    def kernel(*args):
        it = iter(args)
        x_ref = next(it)                                   # (HWp, C) f32
        res_ref = next(it) if has_res else None            # (HWp, C) or (Hr, Wr, C)
        wc11_ref = next(it)                                # (3, 3C, C) bf16
        wc12_ref = next(it)
        wc21_ref = next(it)
        wc22_ref = next(it)
        wp_ref = next(it)                                  # (C, Cout)  bf16
        bp_ref = next(it)                                  # (1, Cout)  f32
        mwup_ref = next(it)                                # (Wo, W)    f32
        mwrs_ref = next(it) if needs_resize else None      # (W, Wr)    f32
        out_ref = next(it)                                 # (Ho, Wo, Cout)
        p3_ref = next(it)                                  # ((H+2)*Wp, 3C) bf16 scratch
        p_ref = next(it)                                   # (HWp, Cout) f32 scratch
        q_ref = next(it)                                   # (H, Wo, Cout) f32 scratch
        resbuf_ref = next(it) if needs_resize else None    # (HWp, C) f32 scratch

        f32 = jnp.float32
        bf16 = jnp.bfloat16

        # Zero the conv halo rows (top / bottom Wp rows of the tap buffer).
        # Done every grid step: cheap, idempotent, and megacore-safe.
        zhalo = jnp.zeros((Wp, C3), bf16)
        p3_ref[pl.ds(0, Wp)] = zhalo
        p3_ref[pl.ds((H + 1) * Wp, Wp)] = zhalo

        # In-kernel keep-mask for the zero separator columns (w >= W).
        col = lax.broadcasted_iota(jnp.int32, (H, Wp, 1), 1).reshape(HWp, 1)
        keep = col < W

        def conv_in(v):
            # pre-activation ReLU + re-zero the padding columns (jnp.where also
            # kills any NaNs coming from never-written scratch rows).
            return jnp.where(keep, jnp.maximum(v, 0.0), 0.0)

        def conv3x3(a, wcat_ref):
            # a: (HWp, C) f32, relu'd, padding columns zeroed.
            # Stage [left | centre | right] column taps along the lane axis, then
            # one K=3C bf16 matmul per kernel row (3 matmuls total).  All window
            # starts are multiples of Wp (8-aligned); horizontal zero padding is
            # provided by the zero separator columns, vertical by the halo rows.
            mid = a.astype(bf16)
            left = pltpu.roll(a, 1, axis=0).astype(bf16)          # value at column w-1
            right = pltpu.roll(a, HWp - 1, axis=0).astype(bf16)   # value at column w+1
            p3_ref[pl.ds(Wp, HWp), pl.ds(0, C)] = left
            p3_ref[pl.ds(Wp, HWp), pl.ds(C, C)] = mid
            p3_ref[pl.ds(Wp, HWp), pl.ds(2 * C, C)] = right
            out = jnp.dot(p3_ref[pl.ds(0, HWp)], wcat_ref[0],
                          preferred_element_type=f32)
            out = out + jnp.dot(p3_ref[pl.ds(Wp, HWp)], wcat_ref[1],
                                preferred_element_type=f32)
            out = out + jnp.dot(p3_ref[pl.ds(2 * Wp, HWp)], wcat_ref[2],
                                preferred_element_type=f32)
            return out

        # PreActResidualConvUnit: conv2(relu(conv1(relu(x)))) + x   (bias-free)
        def rcu(inp, w1_ref, w2_ref):
            y = conv3x3(conv_in(inp), w1_ref)
            y = conv3x3(conv_in(y), w2_ref)
            return y + inp

        # ---- fusion input: optional in-kernel bilinear resize of the skip ----
        if has_res:
            if needs_resize:
                mwrs = mwrs_ref[...]                       # (W, Wr)
                h_rs = float(Hr) / float(H)

                def rs_row(h, carry):
                    src = (h.astype(f32) + 0.5) * h_rs - 0.5
                    src = jnp.minimum(jnp.maximum(src, 0.0), float(Hr - 1))
                    i0 = src.astype(jnp.int32)
                    i1 = jnp.minimum(i0 + 1, Hr - 1)
                    a = src - i0.astype(f32)
                    rowmix = (1.0 - a) * res_ref[i0] + a * res_ref[i1]   # (Wr, C)
                    start = pl.multiple_of(h * Wp, 8)
                    resbuf_ref[pl.ds(start, W)] = jnp.dot(
                        mwrs, rowmix, preferred_element_type=f32)        # (W, C)
                    return carry

                # TODO(synk): fold the height interp into one (H,Hr)@(Hr,Wr*C)
                #             matmul once the skip is fed in (Hr, Wr*C) layout.
                lax.fori_loop(0, H, rs_row, 0)
                res_flat = resbuf_ref[...]
            else:
                res_flat = res_ref[...]
            x1 = x_ref[...] + rcu(res_flat, wc11_ref, wc12_ref)
        else:
            x1 = x_ref[...]

        x2 = rcu(x1, wc21_ref, wc22_ref)                                  # (HWp, C)

        # ---- 1x1 projection (+bias) before the x2 upsample (exact: linear ops
        #      commute with convex interpolation whose weights sum to 1) ----
        p_ref[...] = (jnp.dot(x2.astype(bf16), wp_ref[...],
                              preferred_element_type=f32) + bp_ref[...])

        # ---- x2 bilinear upsample: width interp once per source row (matmul),
        #      then height blend as a pure VPU pass over the output rows ----
        mwup = mwup_ref[...]                                              # (Wo, W)

        def wrow(h, carry):
            start = pl.multiple_of(h * Wp, 8)
            q_ref[h] = jnp.dot(mwup, p_ref[pl.ds(start, W)],
                               preferred_element_type=f32)                # (Wo, Cout)
            return carry

        lax.fori_loop(0, H, wrow, 0)

        if align_corners:
            h_scale = 0.0 if Ho == 1 else float(H - 1) / float(Ho - 1)
        else:
            h_scale = float(H) / float(Ho)

        def orow(oh, carry):
            ohf = oh.astype(f32)
            if align_corners:
                src = ohf * h_scale
            else:
                src = jnp.maximum((ohf + 0.5) * h_scale - 0.5, 0.0)
            src = jnp.minimum(src, float(H - 1))
            i0 = src.astype(jnp.int32)
            i1 = jnp.minimum(i0 + 1, H - 1)
            a = src - i0.astype(f32)
            out_ref[oh] = ((1.0 - a) * q_ref[i0]
                           + a * q_ref[i1]).astype(out_ref.dtype)
            return carry

        lax.fori_loop(0, Ho, orow, 0)

    # ---- block specs ----
    in_specs = [pl.BlockSpec((None, HWp, C), lambda b: (b, 0, 0))]
    if has_res:
        if needs_resize:
            in_specs.append(pl.BlockSpec((None, Hr, Wr, C), lambda b: (b, 0, 0, 0)))
        else:
            in_specs.append(pl.BlockSpec((None, HWp, C), lambda b: (b, 0, 0)))
    in_specs += [_const_spec((3, C3, C)) for _ in range(4)]
    in_specs += [
        _const_spec((C, Cout)),
        _const_spec((1, Cout)),
        _const_spec((Wo, W)),
    ]
    if needs_resize:
        in_specs.append(_const_spec((W, Wr)))

    scratch_shapes = [
        pltpu.VMEM(((H + 2) * Wp, C3), jnp.bfloat16),   # [left|mid|right] conv taps
        pltpu.VMEM((HWp, Cout), jnp.float32),           # projected activations
        pltpu.VMEM((H, Wo, Cout), jnp.float32),         # width-upsampled rows
    ]
    if needs_resize:
        scratch_shapes.append(pltpu.VMEM((HWp, C), jnp.float32))

    # VMEM limit: ~85% of the attached part's capacity (v5e/v6e: ~109 MiB,
    # v7x: ~54 MiB of headroom), with a conservative fallback.
    try:
        cap = int(pltpu.get_tpu_info().vmem_capacity_bytes)
        vmem_limit = min(int(cap * 0.85), 112 * 1024 * 1024)
    except Exception:
        vmem_limit = 64 * 1024 * 1024

    return pl.pallas_call(
        kernel,
        out_shape=jax.ShapeDtypeStruct((N, Ho, Wo, Cout), out_dtype),
        grid_spec=pltpu.PrefetchScalarGridSpec(
            num_scalar_prefetch=0,
            grid=(N,),
            in_specs=in_specs,
            out_specs=pl.BlockSpec((None, Ho, Wo, Cout), lambda b: (b, 0, 0, 0)),
            scratch_shapes=scratch_shapes,
        ),
        compiler_params=pltpu.CompilerParams(
            dimension_semantics=("parallel",),           # batch elements independent
            vmem_limit_bytes=vmem_limit,
        ),
    )


# ----------------------------------------------------------------------------
# parameters (deterministic synthetic init; shapes follow the PyTorch module)
# NOTE: PreActResidualConvUnit uses bias-free 3x3 convs (bias=False in the spec);
#       the 1x1 projection conv has a bias.
# ----------------------------------------------------------------------------
def init_params(key, in_channels, expand=False):
    C = in_channels
    Cout = C // 2 if expand else C
    ks = jax.random.split(key, 6)
    std3 = 1.0 / math.sqrt(9 * C)
    std1 = 1.0 / math.sqrt(C)
    # 3x3 conv weights stored HWIO: w[kh, kw, cin, cout]
    return dict(
        w11=jax.random.normal(ks[0], (3, 3, C, C), jnp.float32) * std3,
        w12=jax.random.normal(ks[1], (3, 3, C, C), jnp.float32) * std3,
        w21=jax.random.normal(ks[2], (3, 3, C, C), jnp.float32) * std3,
        w22=jax.random.normal(ks[3], (3, 3, C, C), jnp.float32) * std3,
        wp=jax.random.normal(ks[4], (C, Cout), jnp.float32) * std1,
        bp=jax.random.normal(ks[5], (Cout,), jnp.float32) * 0.1,
    )


# ----------------------------------------------------------------------------
# public forward (NCHW in / NCHW out, like the PyTorch module)
# ----------------------------------------------------------------------------
def feature_fusion_block_forward(params, x_nchw, skip_nchw=None, align_corners=True,
                                 nchw_output=True, out_dtype=jnp.float32):
    x = jnp.transpose(x_nchw, (0, 2, 3, 1)).astype(jnp.float32)      # NHWC
    N, H, W, C = x.shape
    Wp = ((W + 1) + 7) // 8 * 8
    HWp = H * Wp
    Cout = params["wp"].shape[1]

    def _pad_flat(t):     # (N, H, W, C) -> (N, H*Wp, C) with zero separator cols
        return jnp.pad(t, ((0, 0), (0, 0), (0, Wp - W), (0, 0))).reshape(N, HWp, C)

    has_res = skip_nchw is not None
    res_hw = None
    inputs = [_pad_flat(x)]
    if has_res:
        res = jnp.transpose(skip_nchw, (0, 2, 3, 1)).astype(jnp.float32)
        Hr, Wr = int(res.shape[1]), int(res.shape[2])
        res_hw = (Hr, Wr)
        if (Hr, Wr) == (H, W):
            inputs.append(_pad_flat(res))
        else:
            inputs.append(res)                   # (N, Hr, Wr, C), resized in-kernel

    def _wcat(w):   # (3, 3, C, C) HWIO -> (3, 3C, C) bf16, kw-major input rows
        return jnp.asarray(w, jnp.float32).reshape(3, 3 * C, C).astype(jnp.bfloat16)

    inputs += [
        _wcat(params["w11"]), _wcat(params["w12"]),
        _wcat(params["w21"]), _wcat(params["w22"]),
        params["wp"].astype(jnp.bfloat16),
        params["bp"].reshape(1, Cout).astype(jnp.float32),
        _interp_matrix(2 * W, W, align_corners),          # x2 width interp
    ]
    if has_res and res_hw != (H, W):
        inputs.append(_interp_matrix(W, res_hw[1], False))  # skip width interp

    ffb_fn = _make_ffb_kernel(N, H, W, C, Cout, align_corners, has_res, res_hw,
                              out_dtype=out_dtype)
    out = ffb_fn(*inputs)                                  # (N, 2H, 2W, Cout) NHWC
    if nchw_output:
        out = jnp.transpose(out, (0, 3, 1, 2))             # NCHW (module contract)
    return out


# ----------------------------------------------------------------------------
# pure-JAX reference (for validation only)
# ----------------------------------------------------------------------------
def _ref_rcu(x, w1, w2):
    dn = ("NHWC", "HWIO", "NHWC")
    a = jax.nn.relu(x)
    y = lax.conv_general_dilated(a, w1, (1, 1), ((1, 1), (1, 1)),
                                 dimension_numbers=dn,
                                 precision=lax.Precision.HIGHEST)
    y = jax.nn.relu(y)
    y = lax.conv_general_dilated(y, w2, (1, 1), ((1, 1), (1, 1)),
                                 dimension_numbers=dn,
                                 precision=lax.Precision.HIGHEST)
    return y + x


def _ref_bilinear(x, Ho, Wo, align_corners):
    _, H, W, _ = x.shape
    Mh = _interp_matrix(Ho, H, align_corners)
    Mw = _interp_matrix(Wo, W, align_corners)
    x = jnp.einsum("oh,nhwc->nowc", Mh, x, precision=lax.Precision.HIGHEST)
    x = jnp.einsum("pw,nowc->nopc", Mw, x, precision=lax.Precision.HIGHEST)
    return x


def _ref_forward(params, x_nchw, skip_nchw, align_corners=True):
    x = jnp.transpose(x_nchw, (0, 2, 3, 1)).astype(jnp.float32)
    _, H, W, _ = x.shape
    if skip_nchw is not None:
        y = jnp.transpose(skip_nchw, (0, 2, 3, 1)).astype(jnp.float32)
        if y.shape != x.shape:
            y = _ref_bilinear(y, H, W, align_corners=False)
        x = x + _ref_rcu(y, params["w11"], params["w12"])
    x = _ref_rcu(x, params["w21"], params["w22"])
    x = _ref_bilinear(x, 2 * H, 2 * W, align_corners)
    x = jnp.einsum("nhwc,cd->nhwd", x, params["wp"],
                   precision=lax.Precision.HIGHEST) + params["bp"]
    return jnp.transpose(x, (0, 3, 1, 2))


# ----------------------------------------------------------------------------
if __name__ == "__main__":
    key = jax.random.PRNGKey(0)
    kx, ks, kp = jax.random.split(key, 3)

    N, C, H, W = 2, 32, 8, 8
    x = jax.random.normal(kx, (N, C, H, W), jnp.float32)
    # different spatial size -> exercises the fused bilinear (align_corners=False) branch
    skip = jax.random.normal(ks, (N, C, 6, 6), jnp.float32)
    params = init_params(kp, C, expand=False)

    # case 1: skip connection with in-kernel resize
    out = feature_fusion_block_forward(params, x, skip, align_corners=True)
    out = jax.block_until_ready(out)
    assert out.shape == (N, C, 2 * H, 2 * W)
    assert bool(jnp.all(jnp.isfinite(out)))
    ref = jax.block_until_ready(_ref_forward(params, x, skip, align_corners=True))
    # tolerance reflects the deliberate bf16 MXU operands (f32 accumulation)
    np.testing.assert_allclose(np.asarray(out), np.asarray(ref), rtol=5e-2, atol=5e-2)

    # case 2: single input (no skip connection)
    out2 = feature_fusion_block_forward(params, x, None, align_corners=True)
    out2 = jax.block_until_ready(out2)
    ref2 = jax.block_until_ready(_ref_forward(params, x, None, align_corners=True))
    np.testing.assert_allclose(np.asarray(out2), np.asarray(ref2), rtol=5e-2, atol=5e-2)

    print("KERNEL_OK")
</pallas_src>

<mosaic_0001>
module attributes {stable_mosaic.version = 11 : i64} {
  func.func @kernel(%arg0: i32, %arg1: memref<1x128x32xf32, #tpu.memory_space<vmem>>, %arg2: memref<1x6x6x32xf32, #tpu.memory_space<vmem>>, %arg3: memref<3x96x32xbf16, #tpu.memory_space<vmem>>, %arg4: memref<3x96x32xbf16, #tpu.memory_space<vmem>>, %arg5: memref<3x96x32xbf16, #tpu.memory_space<vmem>>, %arg6: memref<3x96x32xbf16, #tpu.memory_space<vmem>>, %arg7: memref<32x32xbf16, #tpu.memory_space<vmem>>, %arg8: memref<1x32xf32, #tpu.memory_space<vmem>>, %arg9: memref<16x8xf32, #tpu.memory_space<vmem>>, %arg10: memref<8x6xf32, #tpu.memory_space<vmem>>, %arg11: memref<1x16x16x32xf32, #tpu.memory_space<vmem>>, %arg12: memref<160x96xbf16, #tpu.memory_space<vmem>>, %arg13: memref<128x32xf32, #tpu.memory_space<vmem>>, %arg14: memref<8x16x32xf32, #tpu.memory_space<vmem>>, %arg15: memref<128x32xf32, #tpu.memory_space<vmem>>) attributes {dimension_semantics = [#tpu.dimension_semantics<parallel>], iteration_bounds = array<i64: 2>, scalar_prefetch = 0 : i64, scratch_operands = 4 : i64, tpu.core_type = #tpu.core_type<tc>, window_params = [{transform_indices = @transform_0, window_bounds = array<i64: 1, 128, 32>}, {transform_indices = @transform_1, window_bounds = array<i64: 1, 6, 6, 32>}, {pipeline_mode = #tpu.pipeline_mode<synchronous>, transform_indices = @transform_2, window_bounds = array<i64: 3, 96, 32>}, {pipeline_mode = #tpu.pipeline_mode<synchronous>, transform_indices = @transform_3, window_bounds = array<i64: 3, 96, 32>}, {pipeline_mode = #tpu.pipeline_mode<synchronous>, transform_indices = @transform_4, window_bounds = array<i64: 3, 96, 32>}, {pipeline_mode = #tpu.pipeline_mode<synchronous>, transform_indices = @transform_5, window_bounds = array<i64: 3, 96, 32>}, {pipeline_mode = #tpu.pipeline_mode<synchronous>, transform_indices = @transform_6, window_bounds = array<i64: 32, 32>}, {pipeline_mode = #tpu.pipeline_mode<synchronous>, transform_indices = @transform_7, window_bounds = array<i64: 1, 32>}, {pipeline_mode = #tpu.pipeline_mode<synchronous>, transform_indices = @transform_8, window_bounds = array<i64: 16, 8>}, {pipeline_mode = #tpu.pipeline_mode<synchronous>, transform_indices = @transform_9, window_bounds = array<i64: 8, 6>}, {transform_indices = @transform_10, window_bounds = array<i64: 1, 16, 16, 32>}]} {
    %cst = arith.constant 0.000000e+00 : bf16
    %0 = vector.broadcast %cst : bf16 to vector<16x96xbf16>
    %c0 = arith.constant 0 : index
    %c0_0 = arith.constant 0 : index
    %1 = vector.load %arg12[%c0, %c0_0] : memref<160x96xbf16, #tpu.memory_space<vmem>>, vector<16x96xbf16>
    tpu.vector_store %arg12[%c0, %c0_0], %0 {strides = array<i32>} : memref<160x96xbf16, #tpu.memory_space<vmem>>, vector<16x96xbf16>,
    %c144 = arith.constant 144 : index
    %c0_1 = arith.constant 0 : index
    %2 = vector.load %arg12[%c144, %c0_1] : memref<160x96xbf16, #tpu.memory_space<vmem>>, vector<16x96xbf16>
    tpu.vector_store %arg12[%c144, %c0_1], %0 {strides = array<i32>} : memref<160x96xbf16, #tpu.memory_space<vmem>>, vector<16x96xbf16>,
    %3 = tpu.iota {dimensions = array<i32: 1>} : vector<8x16x1xi32>
    %4 = vector.shape_cast %3 : vector<8x16x1xi32> to vector<128x1xi32>
    %c8_i32 = arith.constant 8 : i32
    %5 = vector.broadcast %c8_i32 : i32 to vector<128x1xi32>
    %6 = arith.cmpi slt, %4, %5 : vector<128x1xi32>
    %c0_2 = arith.constant 0 : index
    %c0_3 = arith.constant 0 : index
    %7 = vector.load %arg10[%c0_2, %c0_3] : memref<8x6xf32, #tpu.memory_space<vmem>>, vector<8x6xf32>
    %c0_i32 = arith.constant 0 : i32
    %c8_i32_4 = arith.constant 8 : i32
    %8 = arith.addi %c0_i32, %c8_i32_4 : i32
    %c1_i32 = arith.constant 1 : i32
    scf.for %arg16 = %c0_i32 to %8 step %c1_i32  : i32 {
      %137 = arith.sitofp %arg16 : i32 to f32
      %cst_133 = arith.constant 5.000000e-01 : f32
      %138 = arith.addf %137, %cst_133 : f32
      %cst_134 = arith.constant 7.500000e-01 : f32
      %139 = arith.mulf %138, %cst_134 : f32
      %cst_135 = arith.constant 5.000000e-01 : f32
      %140 = arith.subf %139, %cst_135 : f32
      %cst_136 = arith.constant 0.000000e+00 : f32
      %141 = arith.maximumf %140, %cst_136 : f32
      %cst_137 = arith.constant 5.000000e+00 : f32
      %142 = arith.minimumf %141, %cst_137 : f32
      %143 = arith.fptosi %142 : f32 to i32
      %c1_i32_138 = arith.constant 1 : i32
      %144 = arith.addi %143, %c1_i32_138 : i32
      %c5_i32 = arith.constant 5 : i32
      %145 = arith.minsi %144, %c5_i32 : i32
      %146 = arith.sitofp %143 : i32 to f32
      %147 = arith.subf %142, %146 : f32
      %cst_139 = arith.constant 1.000000e+00 : f32
      %148 = arith.subf %cst_139, %147 : f32
      %c0_140 = arith.constant 0 : index
      %149 = arith.index_cast %143 : i32 to index
      %c0_141 = arith.constant 0 : index
      %c0_142 = arith.constant 0 : index
      %150 = vector.load %arg2[%c0_140, %149, %c0_141, %c0_142] : memref<1x6x6x32xf32, #tpu.memory_space<vmem>>, vector<1x1x6x32xf32>
      %151 = vector.shape_cast %150 : vector<1x1x6x32xf32> to vector<6x32xf32>
      %152 = vector.broadcast %148 : f32 to vector<6x32xf32>
      %153 = arith.mulf %152, %151 : vector<6x32xf32>
      %c0_143 = arith.constant 0 : index
      %154 = arith.index_cast %145 : i32 to index
      %c0_144 = arith.constant 0 : index
      %c0_145 = arith.constant 0 : index
      %155 = vector.load %arg2[%c0_143, %154, %c0_144, %c0_145] : memref<1x6x6x32xf32, #tpu.memory_space<vmem>>, vector<1x1x6x32xf32>
      %156 = vector.shape_cast %155 : vector<1x1x6x32xf32> to vector<6x32xf32>
      %157 = vector.broadcast %147 : f32 to vector<6x32xf32>
      %158 = arith.mulf %157, %156 : vector<6x32xf32>
      %159 = arith.addf %153, %158 : vector<6x32xf32>
      %c16_i32_146 = arith.constant 16 : i32
      %160 = arith.muli %arg16, %c16_i32_146 : i32
      %161 = tpu.assume_multiple %160, 8 : i32
      %cst_147 = arith.constant dense<0.000000e+00> : vector<8x32xf32>
      %162 = tpu.matmul %7, %159, %cst_147 {dimension_numbers = #tpu.dot_dimension_numbers<[1], [0], [0], [1], [0, 0, 1, 1], [], []>} : vector<8x6xf32>, vector<6x32xf32>, vector<8x32xf32> -> vector<8x32xf32>
      %163 = arith.index_cast %161 : i32 to index
      %c0_148 = arith.constant 0 : index
      %164 = vector.load %arg15[%163, %c0_148] : memref<128x32xf32, #tpu.memory_space<vmem>>, vector<8x32xf32>
      tpu.vector_store %arg15[%163, %c0_148], %162 {strides = array<i32>} : memref<128x32xf32, #tpu.memory_space<vmem>>, vector<8x32xf32>,
    }
    %c8_i32_5 = arith.constant 8 : i32
    %c0_6 = arith.constant 0 : index
    %c0_7 = arith.constant 0 : index
    %9 = vector.load %arg15[%c0_6, %c0_7] : memref<128x32xf32, #tpu.memory_space<vmem>>, vector<128x32xf32>
    %c0_8 = arith.constant 0 : index
    %c0_9 = arith.constant 0 : index
    %c0_10 = arith.constant 0 : index
    %10 = vector.load %arg1[%c0_8, %c0_9, %c0_10] : memref<1x128x32xf32, #tpu.memory_space<vmem>>, vector<1x128x32xf32>
    %11 = vector.shape_cast %10 : vector<1x128x32xf32> to vector<128x32xf32>
    %cst_11 = arith.constant 0.000000e+00 : f32
    %12 = vector.broadcast %cst_11 : f32 to vector<128x32xf32>
    %13 = arith.maximumf %9, %12 : vector<128x32xf32>
    %cst_12 = arith.constant 0.000000e+00 : f32
    %14 = vector.shape_cast %6 : vector<128x1xi1> to vector<128x1xi1>
    %15 = vector.broadcast %14 : vector<128x1xi1> to vector<128x32xi1>
    %16 = vector.broadcast %cst_12 : f32 to vector<128x32xf32>
    %17 = arith.select %15, %13, %16 : vector<128x32xi1>, vector<128x32xf32>
    %18 = arith.truncf %17 : vector<128x32xf32> to vector<128x32xbf16>
    %c1_i32_13 = arith.constant 1 : i32
    %19 = tpu.dynamic_rotate %17 by %c1_i32_13 dim 0 : vector<128x32xf32>, i32 -> vector<128x32xf32>
    %20 = arith.truncf %19 : vector<128x32xf32> to vector<128x32xbf16>
    %c127_i32 = arith.constant 127 : i32
    %21 = tpu.dynamic_rotate %17 by %c127_i32 dim 0 : vector<128x32xf32>, i32 -> vector<128x32xf32>
    %22 = arith.truncf %21 : vector<128x32xf32> to vector<128x32xbf16>
    %c16 = arith.constant 16 : index
    %c0_14 = arith.constant 0 : index
    %23 = vector.load %arg12[%c16, %c0_14] : memref<160x96xbf16, #tpu.memory_space<vmem>>, vector<128x32xbf16>
    tpu.vector_store %arg12[%c16, %c0_14], %20 {strides = array<i32>} : memref<160x96xbf16, #tpu.memory_space<vmem>>, vector<128x32xbf16>,
    %c16_15 = arith.constant 16 : index
    %c32 = arith.constant 32 : index
    %24 = vector.load %arg12[%c16_15, %c32] : memref<160x96xbf16, #tpu.memory_space<vmem>>, vector<128x32xbf16>
    tpu.vector_store %arg12[%c16_15, %c32], %18 {strides = array<i32>} : memref<160x96xbf16, #tpu.memory_space<vmem>>, vector<128x32xbf16>,
    %c16_16 = arith.constant 16 : index
    %c64 = arith.constant 64 : index
    %25 = vector.load %arg12[%c16_16, %c64] : memref<160x96xbf16, #tpu.memory_space<vmem>>, vector<128x32xbf16>
    tpu.vector_store %arg12[%c16_16, %c64], %22 {strides = array<i32>} : memref<160x96xbf16, #tpu.memory_space<vmem>>, vector<128x32xbf16>,
    %c0_17 = arith.constant 0 : index
    %c0_18 = arith.constant 0 : index
    %26 = vector.load %arg12[%c0_17, %c0_18] : memref<160x96xbf16, #tpu.memory_space<vmem>>, vector<128x96xbf16>
    %c0_19 = arith.constant 0 : index
    %c0_20 = arith.constant 0 : index
    %c0_21 = arith.constant 0 : index
    %27 = vector.load %arg3[%c0_19, %c0_20, %c0_21] : memref<3x96x32xbf16, #tpu.memory_space<vmem>>, vector<1x96x32xbf16>
    %28 = vector.shape_cast %27 : vector<1x96x32xbf16> to vector<96x32xbf16>
    %cst_22 = arith.constant dense<0.000000e+00> : vector<128x32xf32>
    %29 = tpu.matmul %26, %28, %cst_22 {dimension_numbers = #tpu.dot_dimension_numbers<[1], [0], [0], [1], [0, 0, 1, 1], [], []>} : vector<128x96xbf16>, vector<96x32xbf16>, vector<128x32xf32> -> vector<128x32xf32>
    %c16_23 = arith.constant 16 : index
    %c0_24 = arith.constant 0 : index
    %30 = vector.load %arg12[%c16_23, %c0_24] : memref<160x96xbf16, #tpu.memory_space<vmem>>, vector<128x96xbf16>
    %c1 = arith.constant 1 : index
    %c0_25 = arith.constant 0 : index
    %c0_26 = arith.constant 0 : index
    %31 = vector.load %arg3[%c1, %c0_25, %c0_26] : memref<3x96x32xbf16, #tpu.memory_space<vmem>>, vector<1x96x32xbf16>
    %32 = vector.shape_cast %31 : vector<1x96x32xbf16> to vector<96x32xbf16>
    %cst_27 = arith.constant dense<0.000000e+00> : vector<128x32xf32>
    %33 = tpu.matmul %30, %32, %cst_27 {dimension_numbers = #tpu.dot_dimension_numbers<[1], [0], [0], [1], [0, 0, 1, 1], [], []>} : vector<128x96xbf16>, vector<96x32xbf16>, vector<128x32xf32> -> vector<128x32xf32>
    %34 = arith.addf %29, %33 : vector<128x32xf32>
    %c32_28 = arith.constant 32 : index
    %c0_29 = arith.constant 0 : index
    %35 = vector.load %arg12[%c32_28, %c0_29] : memref<160x96xbf16, #tpu.memory_space<vmem>>, vector<128x96xbf16>
    %c2 = arith.constant 2 : index
    %c0_30 = arith.constant 0 : index
    %c0_31 = arith.constant 0 : index
    %36 = vector.load %arg3[%c2, %c0_30, %c0_31] : memref<3x96x32xbf16, #tpu.memory_space<vmem>>, vector<1x96x32xbf16>
    %37 = vector.shape_cast %36 : vector<1x96x32xbf16> to vector<96x32xbf16>
    %cst_32 = arith.constant dense<0.000000e+00> : vector<128x32xf32>
    %38 = tpu.matmul %35, %37, %cst_32 {dimension_numbers = #tpu.dot_dimension_numbers<[1], [0], [0], [1], [0, 0, 1, 1], [], []>} : vector<128x96xbf16>, vector<96x32xbf16>, vector<128x32xf32> -> vector<128x32xf32>
    %39 = arith.addf %34, %38 : vector<128x32xf32>
    %cst_33 = arith.constant 0.000000e+00 : f32
    %40 = vector.broadcast %cst_33 : f32 to vector<128x32xf32>
    %41 = arith.maximumf %39, %40 : vector<128x32xf32>
    %cst_34 = arith.constant 0.000000e+00 : f32
    %42 = vector.shape_cast %6 : vector<128x1xi1> to vector<128x1xi1>
    %43 = vector.broadcast %42 : vector<128x1xi1> to vector<128x32xi1>
    %44 = vector.broadcast %cst_34 : f32 to vector<128x32xf32>
    %45 = arith.select %43, %41, %44 : vector<128x32xi1>, vector<128x32xf32>
    %46 = arith.truncf %45 : vector<128x32xf32> to vector<128x32xbf16>
    %c1_i32_35 = arith.constant 1 : i32
    %47 = tpu.dynamic_rotate %45 by %c1_i32_35 dim 0 : vector<128x32xf32>, i32 -> vector<128x32xf32>
    %48 = arith.truncf %47 : vector<128x32xf32> to vector<128x32xbf16>
    %c127_i32_36 = arith.constant 127 : i32
    %49 = tpu.dynamic_rotate %45 by %c127_i32_36 dim 0 : vector<128x32xf32>, i32 -> vector<128x32xf32>
    %50 = arith.truncf %49 : vector<128x32xf32> to vector<128x32xbf16>
    %c16_37 = arith.constant 16 : index
    %c0_38 = arith.constant 0 : index
    %51 = vector.load %arg12[%c16_37, %c0_38] : memref<160x96xbf16, #tpu.memory_space<vmem>>, vector<128x32xbf16>
    tpu.vector_store %arg12[%c16_37, %c0_38], %48 {strides = array<i32>} : memref<160x96xbf16, #tpu.memory_space<vmem>>, vector<128x32xbf16>,
    %c16_39 = arith.constant 16 : index
    %c32_40 = arith.constant 32 : index
    %52 = vector.load %arg12[%c16_39, %c32_40] : memref<160x96xbf16, #tpu.memory_space<vmem>>, vector<128x32xbf16>
    tpu.vector_store %arg12[%c16_39, %c32_40], %46 {strides = array<i32>} : memref<160x96xbf16, #tpu.memory_space<vmem>>, vector<128x32xbf16>,
    %c16_41 = arith.constant 16 : index
    %c64_42 = arith.constant 64 : index
    %53 = vector.load %arg12[%c16_41, %c64_42] : memref<160x96xbf16, #tpu.memory_space<vmem>>, vector<128x32xbf16>
    tpu.vector_store %arg12[%c16_41, %c64_42], %50 {strides = array<i32>} : memref<160x96xbf16, #tpu.memory_space<vmem>>, vector<128x32xbf16>,
    %c0_43 = arith.constant 0 : index
    %c0_44 = arith.constant 0 : index
    %54 = vector.load %arg12[%c0_43, %c0_44] : memref<160x96xbf16, #tpu.memory_space<vmem>>, vector<128x96xbf16>
    %c0_45 = arith.constant 0 : index
    %c0_46 = arith.constant 0 : index
    %c0_47 = arith.constant 0 : index
    %55 = vector.load %arg4[%c0_45, %c0_46, %c0_47] : memref<3x96x32xbf16, #tpu.memory_space<vmem>>, vector<1x96x32xbf16>
    %56 = vector.shape_cast %55 : vector<1x96x32xbf16> to vector<96x32xbf16>
    %cst_48 = arith.constant dense<0.000000e+00> : vector<128x32xf32>
    %57 = tpu.matmul %54, %56, %cst_48 {dimension_numbers = #tpu.dot_dimension_numbers<[1], [0], [0], [1], [0, 0, 1, 1], [], []>} : vector<128x96xbf16>, vector<96x32xbf16>, vector<128x32xf32> -> vector<128x32xf32>
    %c16_49 = arith.constant 16 : index
    %c0_50 = arith.constant 0 : index
    %58 = vector.load %arg12[%c16_49, %c0_50] : memref<160x96xbf16, #tpu.memory_space<vmem>>, vector<128x96xbf16>
    %c1_51 = arith.constant 1 : index
    %c0_52 = arith.constant 0 : index
    %c0_53 = arith.constant 0 : index
    %59 = vector.load %arg4[%c1_51, %c0_52, %c0_53] : memref<3x96x32xbf16, #tpu.memory_space<vmem>>, vector<1x96x32xbf16>
    %60 = vector.shape_cast %59 : vector<1x96x32xbf16> to vector<96x32xbf16>
    %cst_54 = arith.constant dense<0.000000e+00> : vector<128x32xf32>
    %61 = tpu.matmul %58, %60, %cst_54 {dimension_numbers = #tpu.dot_dimension_numbers<[1], [0], [0], [1], [0, 0, 1, 1], [], []>} : vector<128x96xbf16>, vector<96x32xbf16>, vector<128x32xf32> -> vector<128x32xf32>
    %62 = arith.addf %57, %61 : vector<128x32xf32>
    %c32_55 = arith.constant 32 : index
    %c0_56 = arith.constant 0 : index
    %63 = vector.load %arg12[%c32_55, %c0_56] : memref<160x96xbf16, #tpu.memory_space<vmem>>, vector<128x96xbf16>
    %c2_57 = arith.constant 2 : index
    %c0_58 = arith.constant 0 : index
    %c0_59 = arith.constant 0 : index
    %64 = vector.load %arg4[%c2_57, %c0_58, %c0_59] : memref<3x96x32xbf16, #tpu.memory_space<vmem>>, vector<1x96x32xbf16>
    %65 = vector.shape_cast %64 : vector<1x96x32xbf16> to vector<96x32xbf16>
    %cst_60 = arith.constant dense<0.000000e+00> : vector<128x32xf32>
    %66 = tpu.matmul %63, %65, %cst_60 {dimension_numbers = #tpu.dot_dimension_numbers<[1], [0], [0], [1], [0, 0, 1, 1], [], []>} : vector<128x96xbf16>, vector<96x32xbf16>, vector<128x32xf32> -> vector<128x32xf32>
    %67 = arith.addf %62, %66 : vector<128x32xf32>
    %68 = arith.addf %67, %9 : vector<128x32xf32>
    %69 = arith.addf %11, %68 : vector<128x32xf32>
    %cst_61 = arith.constant 0.000000e+00 : f32
    %70 = vector.broadcast %cst_61 : f32 to vector<128x32xf32>
    %71 = arith.maximumf %69, %70 : vector<128x32xf32>
    %cst_62 = arith.constant 0.000000e+00 : f32
    %72 = vector.shape_cast %6 : vector<128x1xi1> to vector<128x1xi1>
    %73 = vector.broadcast %72 : vector<128x1xi1> to vector<128x32xi1>
    %74 = vector.broadcast %cst_62 : f32 to vector<128x32xf32>
    %75 = arith.select %73, %71, %74 : vector<128x32xi1>, vector<128x32xf32>
    %76 = arith.truncf %75 : vector<128x32xf32> to vector<128x32xbf16>
    %c1_i32_63 = arith.constant 1 : i32
    %77 = tpu.dynamic_rotate %75 by %c1_i32_63 dim 0 : vector<128x32xf32>, i32 -> vector<128x32xf32>
    %78 = arith.truncf %77 : vector<128x32xf32> to vector<128x32xbf16>
    %c127_i32_64 = arith.constant 127 : i32
    %79 = tpu.dynamic_rotate %75 by %c127_i32_64 dim 0 : vector<128x32xf32>, i32 -> vector<128x32xf32>
    %80 = arith.truncf %79 : vector<128x32xf32> to vector<128x32xbf16>
    %c16_65 = arith.constant 16 : index
    %c0_66 = arith.constant 0 : index
    %81 = vector.load %arg12[%c16_65, %c0_66] : memref<160x96xbf16, #tpu.memory_space<vmem>>, vector<128x32xbf16>
    tpu.vector_store %arg12[%c16_65, %c0_66], %78 {strides = array<i32>} : memref<160x96xbf16, #tpu.memory_space<vmem>>, vector<128x32xbf16>,
    %c16_67 = arith.constant 16 : index
    %c32_68 = arith.constant 32 : index
    %82 = vector.load %arg12[%c16_67, %c32_68] : memref<160x96xbf16, #tpu.memory_space<vmem>>, vector<128x32xbf16>
    tpu.vector_store %arg12[%c16_67, %c32_68], %76 {strides = array<i32>} : memref<160x96xbf16, #tpu.memory_space<vmem>>, vector<128x32xbf16>,
    %c16_69 = arith.constant 16 : index
    %c64_70 = arith.constant 64 : index
    %83 = vector.load %arg12[%c16_69, %c64_70] : memref<160x96xbf16, #tpu.memory_space<vmem>>, vector<128x32xbf16>
    tpu.vector_store %arg12[%c16_69, %c64_70], %80 {strides = array<i32>} : memref<160x96xbf16, #tpu.memory_space<vmem>>, vector<128x32xbf16>,
    %c0_71 = arith.constant 0 : index
    %c0_72 = arith.constant 0 : index
    %84 = vector.load %arg12[%c0_71, %c0_72] : memref<160x96xbf16, #tpu.memory_space<vmem>>, vector<128x96xbf16>
    %c0_73 = arith.constant 0 : index
    %c0_74 = arith.constant 0 : index
    %c0_75 = arith.constant 0 : index
    %85 = vector.load %arg5[%c0_73, %c0_74, %c0_75] : memref<3x96x32xbf16, #tpu.memory_space<vmem>>, vector<1x96x32xbf16>
    %86 = vector.shape_cast %85 : vector<1x96x32xbf16> to vector<96x32xbf16>
    %cst_76 = arith.constant dense<0.000000e+00> : vector<128x32xf32>
    %87 = tpu.matmul %84, %86, %cst_76 {dimension_numbers = #tpu.dot_dimension_numbers<[1], [0], [0], [1], [0, 0, 1, 1], [], []>} : vector<128x96xbf16>, vector<96x32xbf16>, vector<128x32xf32> -> vector<128x32xf32>
    %c16_77 = arith.constant 16 : index
    %c0_78 = arith.constant 0 : index
    %88 = vector.load %arg12[%c16_77, %c0_78] : memref<160x96xbf16, #tpu.memory_space<vmem>>, vector<128x96xbf16>
    %c1_79 = arith.constant 1 : index
    %c0_80 = arith.constant 0 : index
    %c0_81 = arith.constant 0 : index
    %89 = vector.load %arg5[%c1_79, %c0_80, %c0_81] : memref<3x96x32xbf16, #tpu.memory_space<vmem>>, vector<1x96x32xbf16>
    %90 = vector.shape_cast %89 : vector<1x96x32xbf16> to vector<96x32xbf16>
    %cst_82 = arith.constant dense<0.000000e+00> : vector<128x32xf32>
    %91 = tpu.matmul %88, %90, %cst_82 {dimension_numbers = #tpu.dot_dimension_numbers<[1], [0], [0], [1], [0, 0, 1, 1], [], []>} : vector<128x96xbf16>, vector<96x32xbf16>, vector<128x32xf32> -> vector<128x32xf32>
    %92 = arith.addf %87, %91 : vector<128x32xf32>
    %c32_83 = arith.constant 32 : index
    %c0_84 = arith.constant 0 : index
    %93 = vector.load %arg12[%c32_83, %c0_84] : memref<160x96xbf16, #tpu.memory_space<vmem>>, vector<128x96xbf16>
    %c2_85 = arith.constant 2 : index
    %c0_86 = arith.constant 0 : index
    %c0_87 = arith.constant 0 : index
    %94 = vector.load %arg5[%c2_85, %c0_86, %c0_87] : memref<3x96x32xbf16, #tpu.memory_space<vmem>>, vector<1x96x32xbf16>
    %95 = vector.shape_cast %94 : vector<1x96x32xbf16> to vector<96x32xbf16>
    %cst_88 = arith.constant dense<0.000000e+00> : vector<128x32xf32>
    %96 = tpu.matmul %93, %95, %cst_88 {dimension_numbers = #tpu.dot_dimension_numbers<[1], [0], [0], [1], [0, 0, 1, 1], [], []>} : vector<128x96xbf16>, vector<96x32xbf16>, vector<128x32xf32> -> vector<128x32xf32>
    %97 = arith.addf %92, %96 : vector<128x32xf32>
    %cst_89 = arith.constant 0.000000e+00 : f32
    %98 = vector.broadcast %cst_89 : f32 to vector<128x32xf32>
    %99 = arith.maximumf %97, %98 : vector<128x32xf32>
    %cst_90 = arith.constant 0.000000e+00 : f32
    %100 = vector.shape_cast %6 : vector<128x1xi1> to vector<128x1xi1>
    %101 = vector.broadcast %100 : vector<128x1xi1> to vector<128x32xi1>
    %102 = vector.broadcast %cst_90 : f32 to vector<128x32xf32>
    %103 = arith.select %101, %99, %102 : vector<128x32xi1>, vector<128x32xf32>
    %104 = arith.truncf %103 : vector<128x32xf32> to vector<128x32xbf16>
    %c1_i32_91 = arith.constant 1 : i32
    %105 = tpu.dynamic_rotate %103 by %c1_i32_91 dim 0 : vector<128x32xf32>, i32 -> vector<128x32xf32>
    %106 = arith.truncf %105 : vector<128x32xf32> to vector<128x32xbf16>
    %c127_i32_92 = arith.constant 127 : i32
    %107 = tpu.dynamic_rotate %103 by %c127_i32_92 dim 0 : vector<128x32xf32>, i32 -> vector<128x32xf32>
    %108 = arith.truncf %107 : vector<128x32xf32> to vector<128x32xbf16>
    %c16_93 = arith.constant 16 : index
    %c0_94 = arith.constant 0 : index
    %109 = vector.load %arg12[%c16_93, %c0_94] : memref<160x96xbf16, #tpu.memory_space<vmem>>, vector<128x32xbf16>
    tpu.vector_store %arg12[%c16_93, %c0_94], %106 {strides = array<i32>} : memref<160x96xbf16, #tpu.memory_space<vmem>>, vector<128x32xbf16>,
    %c16_95 = arith.constant 16 : index
    %c32_96 = arith.constant 32 : index
    %110 = vector.load %arg12[%c16_95, %c32_96] : memref<160x96xbf16, #tpu.memory_space<vmem>>, vector<128x32xbf16>
    tpu.vector_store %arg12[%c16_95, %c32_96], %104 {strides = array<i32>} : memref<160x96xbf16, #tpu.memory_space<vmem>>, vector<128x32xbf16>,
    %c16_97 = arith.constant 16 : index
    %c64_98 = arith.constant 64 : index
    %111 = vector.load %arg12[%c16_97, %c64_98] : memref<160x96xbf16, #tpu.memory_space<vmem>>, vector<128x32xbf16>
    tpu.vector_store %arg12[%c16_97, %c64_98], %108 {strides = array<i32>} : memref<160x96xbf16, #tpu.memory_space<vmem>>, vector<128x32xbf16>,
    %c0_99 = arith.constant 0 : index
    %c0_100 = arith.constant 0 : index
    %112 = vector.load %arg12[%c0_99, %c0_100] : memref<160x96xbf16, #tpu.memory_space<vmem>>, vector<128x96xbf16>
    %c0_101 = arith.constant 0 : index
    %c0_102 = arith.constant 0 : index
    %c0_103 = arith.constant 0 : index
    %113 = vector.load %arg6[%c0_101, %c0_102, %c0_103] : memref<3x96x32xbf16, #tpu.memory_space<vmem>>, vector<1x96x32xbf16>
    %114 = vector.shape_cast %113 : vector<1x96x32xbf16> to vector<96x32xbf16>
    %cst_104 = arith.constant dense<0.000000e+00> : vector<128x32xf32>
    %115 = tpu.matmul %112, %114, %cst_104 {dimension_numbers = #tpu.dot_dimension_numbers<[1], [0], [0], [1], [0, 0, 1, 1], [], []>} : vector<128x96xbf16>, vector<96x32xbf16>, vector<128x32xf32> -> vector<128x32xf32>
    %c16_105 = arith.constant 16 : index
    %c0_106 = arith.constant 0 : index
    %116 = vector.load %arg12[%c16_105, %c0_106] : memref<160x96xbf16, #tpu.memory_space<vmem>>, vector<128x96xbf16>
    %c1_107 = arith.constant 1 : index
    %c0_108 = arith.constant 0 : index
    %c0_109 = arith.constant 0 : index
    %117 = vector.load %arg6[%c1_107, %c0_108, %c0_109] : memref<3x96x32xbf16, #tpu.memory_space<vmem>>, vector<1x96x32xbf16>
    %118 = vector.shape_cast %117 : vector<1x96x32xbf16> to vector<96x32xbf16>
    %cst_110 = arith.constant dense<0.000000e+00> : vector<128x32xf32>
    %119 = tpu.matmul %116, %118, %cst_110 {dimension_numbers = #tpu.dot_dimension_numbers<[1], [0], [0], [1], [0, 0, 1, 1], [], []>} : vector<128x96xbf16>, vector<96x32xbf16>, vector<128x32xf32> -> vector<128x32xf32>
    %120 = arith.addf %115, %119 : vector<128x32xf32>
    %c32_111 = arith.constant 32 : index
    %c0_112 = arith.constant 0 : index
    %121 = vector.load %arg12[%c32_111, %c0_112] : memref<160x96xbf16, #tpu.memory_space<vmem>>, vector<128x96xbf16>
    %c2_113 = arith.constant 2 : index
    %c0_114 = arith.constant 0 : index
    %c0_115 = arith.constant 0 : index
    %122 = vector.load %arg6[%c2_113, %c0_114, %c0_115] : memref<3x96x32xbf16, #tpu.memory_space<vmem>>, vector<1x96x32xbf16>
    %123 = vector.shape_cast %122 : vector<1x96x32xbf16> to vector<96x32xbf16>
    %cst_116 = arith.constant dense<0.000000e+00> : vector<128x32xf32>
    %124 = tpu.matmul %121, %123, %cst_116 {dimension_numbers = #tpu.dot_dimension_numbers<[1], [0], [0], [1], [0, 0, 1, 1], [], []>} : vector<128x96xbf16>, vector<96x32xbf16>, vector<128x32xf32> -> vector<128x32xf32>
    %125 = arith.addf %120, %124 : vector<128x32xf32>
    %126 = arith.addf %125, %69 : vector<128x32xf32>
    %127 = arith.truncf %126 : vector<128x32xf32> to vector<128x32xbf16>
    %c0_117 = arith.constant 0 : index
    %c0_118 = arith.constant 0 : index
    %128 = vector.load %arg7[%c0_117, %c0_118] : memref<32x32xbf16, #tpu.memory_space<vmem>>, vector<32x32xbf16>
    %cst_119 = arith.constant dense<0.000000e+00> : vector<128x32xf32>
    %129 = tpu.matmul %127, %128, %cst_119 {dimension_numbers = #tpu.dot_dimension_numbers<[1], [0], [0], [1], [0, 0, 1, 1], [], []>} : vector<128x32xbf16>, vector<32x32xbf16>, vector<128x32xf32> -> vector<128x32xf32>
    %c0_120 = arith.constant 0 : index
    %c0_121 = arith.constant 0 : index
    %130 = vector.load %arg8[%c0_120, %c0_121] : memref<1x32xf32, #tpu.memory_space<vmem>>, vector<1x32xf32>
    %131 = vector.broadcast %130 : vector<1x32xf32> to vector<128x32xf32>
    %132 = arith.addf %129, %131 : vector<128x32xf32>
    %c0_122 = arith.constant 0 : index
    %c0_123 = arith.constant 0 : index
    %133 = vector.load %arg13[%c0_122, %c0_123] : memref<128x32xf32, #tpu.memory_space<vmem>>, vector<128x32xf32>
    tpu.vector_store %arg13[%c0_122, %c0_123], %132 {strides = array<i32>} : memref<128x32xf32, #tpu.memory_space<vmem>>, vector<128x32xf32>,
    %c0_124 = arith.constant 0 : index
    %c0_125 = arith.constant 0 : index
    %134 = vector.load %arg9[%c0_124, %c0_125] : memref<16x8xf32, #tpu.memory_space<vmem>>, vector<16x8xf32>
    %c0_i32_126 = arith.constant 0 : i32
    %c8_i32_127 = arith.constant 8 : i32
    %135 = arith.addi %c0_i32_126, %c8_i32_127 : i32
    %c1_i32_128 = arith.constant 1 : i32
    scf.for %arg16 = %c0_i32_126 to %135 step %c1_i32_128  : i32 {
      %c16_i32_133 = arith.constant 16 : i32
      %137 = arith.muli %arg16, %c16_i32_133 : i32
      %138 = tpu.assume_multiple %137, 8 : i32
      %139 = arith.index_cast %138 : i32 to index
      %c0_134 = arith.constant 0 : index
      %140 = vector.load %arg13[%139, %c0_134] : memref<128x32xf32, #tpu.memory_space<vmem>>, vector<8x32xf32>
      %cst_135 = arith.constant dense<0.000000e+00> : vector<16x32xf32>
      %141 = tpu.matmul %134, %140, %cst_135 {dimension_numbers = #tpu.dot_dimension_numbers<[1], [0], [0], [1], [0, 0, 1, 1], [], []>} : vector<16x8xf32>, vector<8x32xf32>, vector<16x32xf32> -> vector<16x32xf32>
      %142 = arith.index_cast %arg16 : i32 to index
      %c0_136 = arith.constant 0 : index
      %c0_137 = arith.constant 0 : index
      %143 = vector.load %arg14[%142, %c0_136, %c0_137] : memref<8x16x32xf32, #tpu.memory_space<vmem>>, vector<1x16x32xf32>
      %144 = vector.shape_cast %143 : vector<1x16x32xf32> to vector<16x32xf32>
      %145 = vector.shape_cast %141 : vector<16x32xf32> to vector<1x16x32xf32>
      tpu.vector_store %arg14[%142, %c0_136, %c0_137], %145 {strides = array<i32>} : memref<8x16x32xf32, #tpu.memory_space<vmem>>, vector<1x16x32xf32>,
    }
    %c8_i32_129 = arith.constant 8 : i32
    %c0_i32_130 = arith.constant 0 : i32
    %c16_i32 = arith.constant 16 : i32
    %136 = arith.addi %c0_i32_130, %c16_i32 : i32
    %c1_i32_131 = arith.constant 1 : i32
    scf.for %arg16 = %c0_i32_130 to %136 step %c1_i32_131  : i32 {
      %137 = arith.sitofp %arg16 : i32 to f32
      %cst_133 = arith.constant 0.466666669 : f32
      %138 = arith.mulf %137, %cst_133 : f32
      %cst_134 = arith.constant 7.000000e+00 : f32
      %139 = arith.minimumf %138, %cst_134 : f32
      %140 = arith.fptosi %139 : f32 to i32
      %c1_i32_135 = arith.constant 1 : i32
      %141 = arith.addi %140, %c1_i32_135 : i32
      %c7_i32 = arith.constant 7 : i32
      %142 = arith.minsi %141, %c7_i32 : i32
      %143 = arith.sitofp %140 : i32 to f32
      %144 = arith.subf %139, %143 : f32
      %cst_136 = arith.constant 1.000000e+00 : f32
      %145 = arith.subf %cst_136, %144 : f32
      %146 = arith.index_cast %140 : i32 to index
      %c0_137 = arith.constant 0 : index
      %c0_138 = arith.constant 0 : index
      %147 = vector.load %arg14[%146, %c0_137, %c0_138] : memref<8x16x32xf32, #tpu.memory_space<vmem>>, vector<1x16x32xf32>
      %148 = vector.shape_cast %147 : vector<1x16x32xf32> to vector<16x32xf32>
      %149 = vector.broadcast %145 : f32 to vector<16x32xf32>
      %150 = arith.mulf %149, %148 : vector<16x32xf32>
      %151 = arith.index_cast %142 : i32 to index
      %c0_139 = arith.constant 0 : index
      %c0_140 = arith.constant 0 : index
      %152 = vector.load %arg14[%151, %c0_139, %c0_140] : memref<8x16x32xf32, #tpu.memory_space<vmem>>, vector<1x16x32xf32>
      %153 = vector.shape_cast %152 : vector<1x16x32xf32> to vector<16x32xf32>
      %154 = vector.broadcast %144 : f32 to vector<16x32xf32>
      %155 = arith.mulf %154, %153 : vector<16x32xf32>
      %156 = arith.addf %150, %155 : vector<16x32xf32>
      %c0_141 = arith.constant 0 : index
      %157 = arith.index_cast %arg16 : i32 to index
      %c0_142 = arith.constant 0 : index
      %c0_143 = arith.constant 0 : index
      %158 = vector.load %arg11[%c0_141, %157, %c0_142, %c0_143] : memref<1x16x16x32xf32, #tpu.memory_space<vmem>>, vector<1x1x16x32xf32>
      %159 = vector.shape_cast %158 : vector<1x1x16x32xf32> to vector<16x32xf32>
      %160 = vector.shape_cast %156 : vector<16x32xf32> to vector<1x1x16x32xf32>
      tpu.vector_store %arg11[%c0_141, %157, %c0_142, %c0_143], %160 {strides = array<i32>} : memref<1x16x16x32xf32, #tpu.memory_space<vmem>>, vector<1x1x16x32xf32>,
    }
    %c16_i32_132 = arith.constant 16 : i32
    return
  }
  func.func @transform_0(%arg0: i32) -> (i32, i32, i32) {
    %c0_i32 = arith.constant 0 : i32
    %c0_i32_0 = arith.constant 0 : i32
    %c0_i32_1 = arith.constant 0 : i32
    return %arg0, %c0_i32, %c0_i32_0 : i32, i32, i32
  }
  func.func @transform_1(%arg0: i32) -> (i32, i32, i32, i32) {
    %c0_i32 = arith.constant 0 : i32
    %c0_i32_0 = arith.constant 0 : i32
    %c0_i32_1 = arith.constant 0 : i32
    %c0_i32_2 = arith.constant 0 : i32
    return %arg0, %c0_i32, %c0_i32_0, %c0_i32_1 : i32, i32, i32, i32
  }
  func.func @transform_2(%arg0: i32) -> (i32, i32, i32) {
    %c0_i32 = arith.constant 0 : i32
    %c0_i32_0 = arith.constant 0 : i32
    %c0_i32_1 = arith.constant 0 : i32
    %c0_i32_2 = arith.constant 0 : i32
    return %c0_i32, %c0_i32_0, %c0_i32_1 : i32, i32, i32
  }
  func.func @transform_3(%arg0: i32) -> (i32, i32, i32) {
    %c0_i32 = arith.constant 0 : i32
    %c0_i32_0 = arith.constant 0 : i32
    %c0_i32_1 = arith.constant 0 : i32
    %c0_i32_2 = arith.constant 0 : i32
    return %c0_i32, %c0_i32_0, %c0_i32_1 : i32, i32, i32
  }
  func.func @transform_4(%arg0: i32) -> (i32, i32, i32) {
    %c0_i32 = arith.constant 0 : i32
    %c0_i32_0 = arith.constant 0 : i32
    %c0_i32_1 = arith.constant 0 : i32
    %c0_i32_2 = arith.constant 0 : i32
    return %c0_i32, %c0_i32_0, %c0_i32_1 : i32, i32, i32
  }
  func.func @transform_5(%arg0: i32) -> (i32, i32, i32) {
    %c0_i32 = arith.constant 0 : i32
    %c0_i32_0 = arith.constant 0 : i32
    %c0_i32_1 = arith.constant 0 : i32
    %c0_i32_2 = arith.constant 0 : i32
    return %c0_i32, %c0_i32_0, %c0_i32_1 : i32, i32, i32
  }
  func.func @transform_6(%arg0: i32) -> (i32, i32) {
    %c0_i32 = arith.constant 0 : i32
    %c0_i32_0 = arith.constant 0 : i32
    %c0_i32_1 = arith.constant 0 : i32
    return %c0_i32, %c0_i32_0 : i32, i32
  }
  func.func @transform_7(%arg0: i32) -> (i32, i32) {
    %c0_i32 = arith.constant 0 : i32
    %c0_i32_0 = arith.constant 0 : i32
    %c0_i32_1 = arith.constant 0 : i32
    return %c0_i32, %c0_i32_0 : i32, i32
  }
  func.func @transform_8(%arg0: i32) -> (i32, i32) {
    %c0_i32 = arith.constant 0 : i32
    %c0_i32_0 = arith.constant 0 : i32
    %c0_i32_1 = arith.constant 0 : i32
    return %c0_i32, %c0_i32_0 : i32, i32
  }
  func.func @transform_9(%arg0: i32) -> (i32, i32) {
    %c0_i32 = arith.constant 0 : i32
    %c0_i32_0 = arith.constant 0 : i32
    %c0_i32_1 = arith.constant 0 : i32
    return %c0_i32, %c0_i32_0 : i32, i32
  }
  func.func @transform_10(%arg0: i32) -> (i32, i32, i32, i32) {
    %c0_i32 = arith.constant 0 : i32
    %c0_i32_0 = arith.constant 0 : i32
    %c0_i32_1 = arith.constant 0 : i32
    %c0_i32_2 = arith.constant 0 : i32
    return %arg0, %c0_i32, %c0_i32_0, %c0_i32_1 : i32, i32, i32, i32
  }
}

</mosaic_0001>

<bundles_post_ra>
// kernel: tpu_custom_call.1
= control target key start
LH: loop header
LB: loop body
LE: loop exit
PB: predicated region body
PF: predicated region fallthrough
CT: control target
= control target key end

     0   :  { %s7249_s0 = inlined_call_operand.hbm [shape: f32[2,128,32], index: 0, kind: input, shape index: {}]   ;;  %s7250_s1 = inlined_call_operand.hbm [shape: f32[2,6,6,32], index: 1, kind: input, shape index: {}]   ;;  %s7251_s2 = inlined_call_operand.hbm [shape: bf16[3,96,32], index: 2, kind: input, shape index: {}]   ;;  %s7252_s3 = inlined_call_operand.hbm [shape: bf16[3,96,32], index: 3, kind: input, shape index: {}]   ;;  %s7253_s4 = inlined_call_operand.hbm [shape: bf16[3,96,32], index: 4, kind: input, shape index: {}]   ;;  %s7254_s5 = inlined_call_operand.hbm [shape: bf16[3,96,32], index: 5, kind: input, shape index: {}]   ;;  %s7255_s6 = inlined_call_operand.hbm [shape: bf16[32,32], index: 6, kind: input, shape index: {}]   ;;  %s7256_s7 = inlined_call_operand.hbm [shape: f32[1,32], index: 7, kind: input, shape index: {}]   ;;  %s7257_s8 = inlined_call_operand.hbm [shape: f32[16,8], index: 8, kind: input, shape index: {}]   ;;  %s7258_s9 = inlined_call_operand.hbm [shape: f32[8,6], index: 9, kind: input, shape index: {}]   ;;  %s7259_s10 = inlined_call_operand.hbm [shape: f32[2,16,16,32], index: 10, kind: output, shape index: {}]  }
   0x1   :  { %7269 = sst [smem:[#allocation33_spill]] %s7249_s0 }
   0x2   :  { %7270 = sst [smem:[#allocation34_spill]] %s7250_s1 }
   0x3   :  { %7271 = sst [smem:[#allocation35_spill]] %s7251_s2 }
   0x4   :  { %7272 = sst [smem:[#allocation36_spill]] %s7252_s3 }
   0x5   :  { %7273 = sst [smem:[#allocation37_spill]] %s7253_s4 }
   0x6   :  { %7274 = sst [smem:[#allocation38_spill]] %s7254_s5 }
   0x7   :  { %7275 = sst [smem:[#allocation39_spill]] %s7255_s6 }
   0x8   :  { %7276 = sst [smem:[#allocation40_spill]] %s7256_s7 }
   0x9   :  { %7277 = sst [smem:[#allocation41_spill]] %s7257_s8 }
   0xa   :  { %7278 = sst [smem:[#allocation42_spill]] %s7259_s10 }
   0xb   :  { %15 = vsyncpa [#allocation7], 0 }
   0xc   :  { %17 = vsyncpa [#allocation7 + $0x1], 0 }
   0xd   :  { %18 = vsyncpa [#allocation10], 0 }
   0xe   :  { %20 = vsyncpa [#allocation10 + $0x1], 0 }
   0xf   :  { %21 = vsyncpa [#allocation13], 0 }
  0x10   :  { %22 = vsyncpa [#allocation16], 0 }
  0x11   :  { %23 = vsyncpa [#allocation19], 0 }
  0x12   :  { %24 = vsyncpa [#allocation22], 0 }
  0x13   :  { %25 = vsyncpa [#allocation8], 0 }
  0x14   :  { %27 = vsyncpa [#allocation8 + $0x1], 0  ;;  %s5826_s13 = smov 0   ;;  %s5828_s14 = smov 0  }
  0x15   :  { %s5830_s15 = smov 0   ;;  %s5832_s16 = smov 0  }
  0x16 LB: > { %s5745_s17 = smov [#allocation11]   ;;  %s5847_s19 = sadd.s32 4294967295, %s5731_s16   ;;  %s5731_s16 = sphi %s5832_s16, %s7320_s16   ;;  %s5727_s15 = sphi %s5830_s15, %s7319_s15   ;;  %s5723_s14 = sphi %s5828_s14, %s7318_s14   ;;  %s5719_s13 = sphi %s5826_s13, %s7317_s13  }
  0x17   : > { %s296_s18 = sshll.u32 %s5745_s17, 4  ;;  %p4175_p0 = scmp.ge.s32.totalorder %s5731_s16, 1  ;;  %s5852_s18 = int_to_ptr.vmem [resolvable:$true] %s296_s18 }
  0x18   : > { %p7262_p1 = scmp.eq.s32.totalorder %s5847_s19, 0  ;;  %p284_p2 = scmp.lt.s32.totalorder %s5731_s16, 3 }
  0x19   : > { %s5746_s21 = smov [#allocation12]   ;;  %s5747_s24 = smov [#allocation15]  }
  0x1a   : > { %p5854_p3 = pnand %p4175_p0, %p284_p2  ;;  %s309_s22 = sshll.u32 %s5746_s21, 4  ;;  %s5867_s22 = int_to_ptr.vmem [resolvable:$true] %s309_s22 }
  0x1b   : > { %s335_s25 = sshll.u32 %s5747_s24, 4  ;;  %s7282_s2 = sld [smem:[#allocation35_spill]]  ;;  %s5869_s25 = int_to_ptr.vmem [resolvable:$true] %s335_s25 }
  0x1c   : > { %s7279_s20 = scalar_select %p5854_p3, 1, 0 }
  0x1d   : > { %p5130_p5 = pneg %p5854_p3 }
  0x1e   : > { %7280 = sst [smem:[#allocation32_spill]] %s7279_s20 }
  0x1f   : > { %p5863_p6 = pnand %p5130_p5, %p7262_p1 }
  0x21   : > { %s5345_s28 = scalar_lea.hbm %s7282_s2, 2304  ;;  %p5879_p8 = pneg %p5863_p6 }
  0x22   : > { %p5346_p7 = scmp.ne.s32.totalorder %s7282_s2, %s5345_s28  ;;  %p5352_p11 = scmp.lt.u32.totalorder %s5345_s28, %s7282_s2 }
  0x24   : > { %p5348_p9 = pnand %p5879_p8, %p5346_p7 }
  0x26   : > { %p5349_p10 = pneg %p5348_p9 }
  0x28   : > { %p5354_p12 = pnand %p5352_p11, %p5349_p10 }
  0x2a   : > { %5357 = shalt.err (!%p5354_p12)
}
  0x2b   : > { %s5358_s21 = scalar_lea.vmem %s5852_s18, 2304  ;;  %p5366_p5 = scmp.lt.s32.totalorder %s5852_s18, %s5852_s18 }
  0x2c   : > { %p5359_p13 = scmp.ne.s32.totalorder %s5852_s18, %s5358_s21  ;;  %p5367_p4 = scmp.lt.s32.totalorder %s5358_s21, %s5358_s21 }
  0x2e   : > { %p5361_p0 = pnand %p5359_p13, %p5879_p8  ;;  %p5368_p7 = por %p5367_p4, %p5366_p5 }
  0x30   : > { %p5362_p2 = pneg %p5361_p0 }
  0x32   : > { %p5369_p9 = pnand %p5368_p7, %p5362_p2 }
  0x34   : > { %5372 = shalt.err (!%p5369_p9)
}
  0x35   : > { %s5748_s24 = smov 64   ;;  %s5749_s26 = smov 4  }
  0x36   : > { %5133 = dma.hbm_to_vmem [thread:$0]  (!%p5863_p6), %s7282_s2, 2304, %s5852_s18, [#allocation10], %s5748_s24, %s5748_s24, %s5749_s26  }
  0x37   : > { %s7284_s3 = sld [smem:[#allocation36_spill]] }
  0x3d   : > { %s5373_s12 = scalar_lea.hbm %s7284_s3, 2304 }
  0x3e   : > { %p5374_p4 = scmp.ne.s32.totalorder %s7284_s3, %s5373_s12  ;;  %p5380_p12 = scmp.lt.u32.totalorder %s5373_s12, %s7284_s3 }
  0x40   : > { %p5376_p10 = pnand %p5374_p4, %p5879_p8 }
  0x42   : > { %p5377_p11 = pneg %p5376_p10 }
  0x44   : > { %p5382_p13 = pnand %p5380_p12, %p5377_p11 }
  0x46   : > { %5385 = shalt.err (!%p5382_p13)
}
  0x47   : > { %s5386_s18 = scalar_lea.vmem %s5867_s22, 2304  ;;  %p5394_p7 = scmp.lt.s32.totalorder %s5867_s22, %s5867_s22 }
  0x48   : > { %p5387_p0 = scmp.ne.s32.totalorder %s5867_s22, %s5386_s18  ;;  %p5395_p9 = scmp.lt.s32.totalorder %s5386_s18, %s5386_s18 }
  0x4a   : > { %p5389_p2 = pnand %p5387_p0, %p5879_p8  ;;  %p5396_p4 = por %p5395_p9, %p5394_p7 }
  0x4c   : > { %p5390_p5 = pneg %p5389_p2 }
  0x4e   : > { %p5397_p10 = pnand %p5396_p4, %p5390_p5 }
  0x50   : > { %5400 = shalt.err (!%p5397_p10)
}
  0x51   : > { %5136 = dma.hbm_to_vmem [thread:$0]  (!%p5863_p6), %s7284_s3, 2304, %s5867_s22, [#allocation13], %s5748_s24, %s5748_s24, %s5749_s26  }
  0x52   : > { %s7285_s5 = sld [smem:[#allocation38_spill]] }
  0x58   : > { %s5401_s29 = scalar_lea.hbm %s7285_s5, 2304 }
  0x59   : > { %p5402_p11 = scmp.ne.s32.totalorder %s7285_s5, %s5401_s29  ;;  %p5408_p0 = scmp.lt.u32.totalorder %s5401_s29, %s7285_s5 }
  0x5b   : > { %p5404_p12 = pnand %p5402_p11, %p5879_p8 }
  0x5d   : > { %p5405_p13 = pneg %p5404_p12 }
  0x5f   : > { %p5410_p2 = pnand %p5408_p0, %p5405_p13 }
  0x61   : > { %5413 = shalt.err (!%p5410_p2)
}
  0x62   : > { %s5414_s22 = scalar_lea.vmem %s5869_s25, 2304  ;;  %p5422_p4 = scmp.lt.s32.totalorder %s5869_s25, %s5869_s25 }
  0x63   : > { %p5415_p5 = scmp.ne.s32.totalorder %s5869_s25, %s5414_s22  ;;  %p5423_p10 = scmp.lt.s32.totalorder %s5414_s22, %s5414_s22 }
  0x65   : > { %p5417_p7 = pnand %p5415_p5, %p5879_p8  ;;  %p5424_p11 = por %p5423_p10, %p5422_p4 }
  0x67   : > { %p5418_p9 = pneg %p5417_p7 }
  0x69   : > { %p5425_p12 = pnand %p5424_p11, %p5418_p9 }
  0x6b   : > { %5428 = shalt.err (!%p5425_p12)
}
  0x6c   : > { %5142 = dma.hbm_to_vmem [thread:$0]  (!%p5863_p6), %s7285_s5, 2304, %s5869_s25, [#allocation16], %s5748_s24, %s5748_s24, %s5749_s26  }
  0x6d   : > { %s5750_s20 = smov [#allocation18]   ;;  %s5751_s28 = smov [#allocation14]  }
  0x6e   : > { %s362_s27 = sshll.u32 %s5750_s20, 4  ;;  %s322_s29 = sshll.u32 %s5751_s28, 4  ;;  %s363_s27 = int_to_ptr.vmem [resolvable:$true] %s362_s27  ;;  %s323_s29 = int_to_ptr.vmem [resolvable:$true] %s322_s29 }
  0x6f   : > { %s7286_s7 = sld [smem:[#allocation40_spill]] }
  0x75   : > { %s5429_s17 = scalar_lea.hbm %s7286_s7, 16 }
  0x76   : > { %p5430_p13 = scmp.ne.s32.totalorder %s7286_s7, %s5429_s17  ;;  %p5436_p5 = scmp.lt.u32.totalorder %s5429_s17, %s7286_s7 }
  0x78   : > { %p5432_p0 = pnand %p5430_p13, %p5879_p8 }
  0x7a   : > { %p5433_p2 = pneg %p5432_p0 }
  0x7c   : > { %p5438_p7 = pnand %p5436_p5, %p5433_p2 }
  0x7e   : > { %5441 = shalt.err (!%p5438_p7)
}
  0x7f   : > { %s5442_s25 = scalar_lea.vmem %s363_s27, 16  ;;  %s5449_s10 = scalar_lea.vmem %s363_s27, 32 }
  0x80   : > { %p5443_p9 = scmp.ne.s32.totalorder %s363_s27, %s5442_s25  ;;  %p5450_p11 = scmp.lt.s32.totalorder %s363_s27, %s363_s27 }
  0x81   : > { %p5451_p12 = scmp.lt.s32.totalorder %s5449_s10, %s5442_s25 }
  0x82   : > { %p5445_p4 = pnand %p5443_p9, %p5879_p8 }
  0x83   : > { %p5452_p1 = por %p5451_p12, %p5450_p11 }
  0x84   : > { %p5446_p10 = pneg %p5445_p4 }
  0x86   : > { %p5453_p3 = pnand %p5452_p1, %p5446_p10 }
  0x88   : > { %5456 = shalt.err (!%p5453_p3)
}
  0x89   : > { %5148 = dma.hbm_to_vmem [thread:$0]  (!%p5863_p6), %s7286_s7, 16, %s363_s27, [#allocation19]  }
  0x8a   : > { %s7287_s4 = sld [smem:[#allocation37_spill]] }
  0x90   : > { %s5457_s12 = scalar_lea.hbm %s7287_s4, 2304 }
  0x91   : > { %p5458_p13 = scmp.ne.s32.totalorder %s7287_s4, %s5457_s12  ;;  %p5464_p3 = scmp.lt.u32.totalorder %s5457_s12, %s7287_s4 }
  0x93   : > { %p5460_p0 = pnand %p5458_p13, %p5879_p8 }
  0x95   : > { %p5461_p1 = pneg %p5460_p0 }
  0x97   : > { %p5466_p2 = pnand %p5464_p3, %p5461_p1 }
  0x99   : > { %5469 = shalt.err (!%p5466_p2)
}
  0x9a   : > { %s5470_s25 = scalar_lea.vmem %s323_s29, 2304  ;;  %p5478_p4 = scmp.lt.s32.totalorder %s323_s29, %s323_s29 }
  0x9b   : > { %p5471_p5 = scmp.ne.s32.totalorder %s323_s29, %s5470_s25  ;;  %p5479_p10 = scmp.lt.s32.totalorder %s5470_s25, %s5470_s25 }
  0x9d   : > { %p5473_p7 = pnand %p5471_p5, %p5879_p8  ;;  %p5480_p11 = por %p5479_p10, %p5478_p4 }
  0x9f   : > { %p5474_p9 = pneg %p5473_p7 }
  0xa1   : > { %p5481_p12 = pnand %p5480_p11, %p5474_p9 }
  0xa3   : > { %5484 = shalt.err (!%p5481_p12)
}
  0xa4   : > { %5139 = dma.hbm_to_vmem [thread:$0]  (!%p5863_p6), %s7287_s4, 2304, %s323_s29, [#allocation13], %s5748_s24, %s5748_s24, %s5749_s26  }
  0xa5   : > { %s5752_s20 = smov [#allocation17]   ;;  %s5753_s2 = smov [#allocation20]  }
  0xa6   : > { %s348_s28 = sshll.u32 %s5752_s20, 4  ;;  %s372_s30 = sshll.u32 %s5753_s2, 4  ;;  %s349_s28 = int_to_ptr.vmem [resolvable:$true] %s348_s28  ;;  %s373_s30 = int_to_ptr.vmem [resolvable:$true] %s372_s30 }
  0xa7   : > { %s7288_s6 = sld [smem:[#allocation39_spill]] }
  0xad   : > { %s5485_s21 = scalar_lea.hbm %s7288_s6, 256 }
  0xae   : > { %p5486_p13 = scmp.ne.s32.totalorder %s7288_s6, %s5485_s21  ;;  %p5492_p3 = scmp.lt.u32.totalorder %s5485_s21, %s7288_s6 }
  0xb0   : > { %p5488_p0 = pnand %p5486_p13, %p5879_p8 }
  0xb2   : > { %p5489_p1 = pneg %p5488_p0 }
  0xb4   : > { %p5494_p2 = pnand %p5492_p3, %p5489_p1 }
  0xb6   : > { %5497 = shalt.err (!%p5494_p2)
}
  0xb7   : > { %s5498_s29 = scalar_lea.vmem %s349_s28, 256  ;;  %p5506_p4 = scmp.lt.s32.totalorder %s349_s28, %s349_s28 }
  0xb8   : > { %p5499_p5 = scmp.ne.s32.totalorder %s349_s28, %s5498_s29  ;;  %p5507_p10 = scmp.lt.s32.totalorder %s5498_s29, %s5498_s29 }
  0xba   : > { %p5501_p7 = pnand %p5499_p5, %p5879_p8  ;;  %p5508_p11 = por %p5507_p10, %p5506_p4 }
  0xbc   : > { %p5502_p9 = pneg %p5501_p7 }
  0xbe   : > { %p5509_p12 = pnand %p5508_p11, %p5502_p9 }
  0xc0   : > { %5512 = shalt.err (!%p5509_p12)
}
  0xc1   : > { %5145 = dma.hbm_to_vmem [thread:$0]  (!%p5863_p6), %s7288_s6, 256, %s349_s28, [#allocation16], %s5748_s24, %s5748_s24, %s5749_s26  }
  0xc2   : > { %s7289_s8 = sld [smem:[#allocation41_spill]] }
  0xc8   : > { %s5513_s17 = scalar_lea.hbm %s7289_s8, 256 }
  0xc9   : > { %p5514_p13 = scmp.ne.s32.totalorder %s7289_s8, %s5513_s17  ;;  %p5520_p3 = scmp.lt.u32.totalorder %s5513_s17, %s7289_s8 }
  0xcb   : > { %p5516_p0 = pnand %p5514_p13, %p5879_p8 }
  0xcd   : > { %p5517_p1 = pneg %p5516_p0 }
  0xcf   : > { %p5522_p2 = pnand %p5520_p3, %p5517_p1 }
  0xd1   : > { %5525 = shalt.err (!%p5522_p2)
}
  0xd2   : > { %s5526_s27 = scalar_lea.vmem %s373_s30, 256  ;;  %p5534_p4 = scmp.lt.s32.totalorder %s373_s30, %s373_s30 }
  0xd3   : > { %p5527_p5 = scmp.ne.s32.totalorder %s373_s30, %s5526_s27  ;;  %p5535_p10 = scmp.lt.s32.totalorder %s5526_s27, %s5526_s27 }
  0xd5   : > { %p5529_p7 = pnand %p5527_p5, %p5879_p8  ;;  %p5536_p11 = por %p5535_p10, %p5534_p4 }
  0xd7   : > { %p5530_p9 = pneg %p5529_p7 }
  0xd9   : > { %p5537_p12 = pnand %p5536_p11, %p5530_p9 }
  0xdb   : > { %5540 = shalt.err (!%p5537_p12)
}
  0xdc   : > { %s7264_s24 = smov 128   ;;  %s7266_s26 = smov 8  }
  0xdd   : > { %5151 = dma.hbm_to_vmem [thread:$0]  (!%p5863_p6), %s7289_s8, 256, %s373_s30, [#allocation19], %s7264_s24, %s7264_s24, %s7266_s26  }
  0xde   : > { %s5756_s10 = smov [#allocation21]   ;;  %s5541_s17 = scalar_lea.hbm %s7258_s9, 128 }
  0xdf   : > { %s386_s20 = sshll.u32 %s5756_s10, 4  ;;  %p5542_p13 = scmp.ne.s32.totalorder %s7258_s9, %s5541_s17  ;;  %s387_s20 = int_to_ptr.vmem [resolvable:$true] %s386_s20 }
  0xe0   : > { %p5548_p3 = scmp.lt.u32.totalorder %s5541_s17, %s7258_s9 }
  0xe1   : > { %p5544_p0 = pnand %p5542_p13, %p5879_p8 }
  0xe3   : > { %p5545_p1 = pneg %p5544_p0 }
  0xe5   : > { %p5550_p2 = pnand %p5548_p3, %p5545_p1 }
  0xe7   : > { %5553 = shalt.err (!%p5550_p2)
}
  0xe8   : > { %s5554_s30 = scalar_lea.vmem %s387_s20, 128  ;;  %p5562_p4 = scmp.lt.s32.totalorder %s387_s20, %s387_s20 }
  0xe9   : > { %p5555_p5 = scmp.ne.s32.totalorder %s387_s20, %s5554_s30  ;;  %p5563_p10 = scmp.lt.s32.totalorder %s5554_s30, %s5554_s30 }
  0xeb   : > { %p5557_p7 = pnand %p5555_p5, %p5879_p8  ;;  %p5564_p11 = por %p5563_p10, %p5562_p4 }
  0xed   : > { %p5558_p9 = pneg %p5557_p7 }
  0xef   : > { %p5565_p12 = pnand %p5564_p11, %p5558_p9 }
  0xf1   : > { %5568 = shalt.err (!%p5565_p12)
}
  0xf2   : > { %5154 = dma.hbm_to_vmem [thread:$0]  (!%p5863_p6), %s7258_s9, 128, %s387_s20, [#allocation22]  }
  0xf3   : > { %s4174_s11 = sadd.s32 4294967294, %s5731_s16   ;;  %s6056_s23 = sadd.s32 1, %s5731_s16  }
  0xf4   : > { %s37_s29 = ssub.s32 %s5731_s16, %s6056_s23  ;;  %s40_s10 = sadd.s32 1, %s5727_s15 }
  0xf5   : > { %p38_p8 = scmp.eq.s32.totalorder %s37_s29, 0  ;;  %p47_p13 = scmp.ne.s32.totalorder %s5727_s15, %s5723_s14 }
  0xf6   : > { %p48_p0 = scmp.eq.s32.totalorder %s5731_s16, 0  ;;  %p53_p1 = scmp.ne.s32.totalorder %s5723_s14, %s5719_s13 }
  0xf7   : > { %s6067_s2 = scalar_select %p38_p8, %s5727_s15, %s40_s10  }
  0xf8   : > { %p6069_p3 = por %p48_p0, %p47_p13  ;;  %p7291_p2 = scmp.eq.s32.totalorder %s5847_s19, 0 }
  0xf9   : > { %p271_p5 = scmp.eq.s32.totalorder %s5847_s19, 1  ;;  %p277_p7 = scmp.eq.s32.totalorder %s4174_s11, 1 }
  0xfa   : > { %p6075_p6 = por %p7291_p2, %p53_p1  ;;  %p5174_p9 = scmp.lt.s32.totalorder %s5731_s16, 2 }
  0xfb   : > { %s6082_s17 = sand.u32 1, %s5727_s15   ;;  %p6084_p4 = por %p271_p5, %p47_p13 }
  0xfc   : > { %p6088_p10 = por %p277_p7, %p53_p1  ;;  %s4185_s18 = sshll.u32 %s6082_s17, 7 }
  0xfd   : > { %s7293_s21 = scalar_select %p6084_p4, 1, 0 }
  0xfe   : > { %s7294_s22 = scalar_select %p6088_p10, 1, 0 }
  0xff   : > { %s4396_s25 = sshll.u32 %s5731_s16, 11  ;;  %s7295_s0 = sld [smem:[#allocation33_spill]] }
 0x100   : > { %s401_s11 = scalar_lea.vmem [#allocation6], %s4185_s18  ;;  %p6103_p11 = pnand %p5174_p9, %p6069_p3 }
 0x101   : > { %s408_s29 = sshll.u32 %s401_s11, 4  ;;  %s5079_s26 = smul.u32 48, %s6082_s17  ;;  %s6099_s29 = int_to_ptr.vmem [resolvable:$true] %s408_s29 }
 0x102   : > { %s398_s30 = scalar_lea.sflag [#allocation7], %s6082_s17  ;;  %p5571_p8 = pneg %p6103_p11 }
 0x105   : > { %s6097_s28 = scalar_lea.hbm %s7295_s0, %s4396_s25  ;;  %s5574_s12 = scalar_lea.hbm %s7295_s0, 4096 }
 0x106   : > { %s5569_s25 = scalar_lea.hbm %s6097_s28, 2048  ;;  %p5575_p1 = scmp.lt.u32.totalorder %s6097_s28, %s7295_s0 }
 0x107   : > { %p5570_p12 = scmp.ne.s32.totalorder %s6097_s28, %s5569_s25  ;;  %p5576_p3 = scmp.lt.u32.totalorder %s5574_s12, %s5569_s25 }
 0x108   : > { %p5578_p5 = scmp.lt.u32.totalorder %s5569_s25, %s6097_s28 }
 0x109   : > { %p5572_p13 = pnand %p5571_p8, %p5570_p12  ;;  %p5577_p2 = por %p5576_p3, %p5575_p1 }
 0x10b   : > { %p5573_p0 = pneg %p5572_p13  ;;  %p5579_p7 = por %p5578_p5, %p5577_p2 }
 0x10d   : > { %p5580_p9 = pnand %p5579_p7, %p5573_p0 }
 0x10f   : > { %5583 = shalt.err (!%p5580_p9)
}
 0x110   : > { %s5584_s24 = scalar_lea.vmem %s6099_s29, 2048  ;;  %s5757_s18 = smov [#allocation6]  }
 0x111   : > { %p5585_p12 = scmp.ne.s32.totalorder %s6099_s29, %s5584_s24  ;;  %s5589_s27 = sshll.u32 %s5757_s18, 4  ;;  %s5590_s27 = int_to_ptr.vmem [resolvable:$false] %s5589_s27 }
 0x112   : > { %s5591_s3 = scalar_lea.vmem %s5590_s27, 4096  ;;  %p5592_p4 = scmp.lt.s32.totalorder %s6099_s29, %s5590_s27 }
 0x113   : > { %p5587_p13 = pnand %p5585_p12, %p5571_p8  ;;  %p5593_p1 = scmp.lt.s32.totalorder %s5591_s3, %s5584_s24 }
 0x115   : > { %p5588_p10 = pneg %p5587_p13  ;;  %p5594_p3 = por %p5593_p1, %p5592_p4 }
 0x117   : > { %p5595_p2 = pnand %p5594_p3, %p5588_p10 }
 0x119   : > { %5598 = shalt.err (!%p5595_p2)
}
 0x11a   : > { %s7297_s25 = smov 8   ;;  %s7298_s12 = smov 128  }
 0x11b   : > { %5158 = dma.hbm_to_vmem [thread:$0]  (!%p6103_p11), %s6097_s28, 2048, %s6099_s29, %s398_s30, %s7298_s12, %s7298_s12, %s7297_s25  }
 0x11c   : > { %s5080_s11 = smul.u32 768, %s5731_s16  ;;  %s422_s24 = scalar_lea.vmem [#allocation9], %s5079_s26 }
 0x11d   : > { %s429_s18 = sshll.u32 %s422_s24, 4  ;;  %s7299_s1 = sld [smem:[#allocation34_spill]]  ;;  %s6148_s18 = int_to_ptr.vmem [resolvable:$true] %s429_s18 }
 0x11e   : > { %s7300_s4 = sand.u32 1, %s5731_s16  }
 0x11f   : > { %s6152_s5 = scalar_lea.sflag [#allocation10], %s7300_s4 }
 0x123   : > { %s6146_s0 = scalar_lea.hbm %s7299_s1, %s5080_s11  ;;  %s5604_s28 = scalar_lea.hbm %s7299_s1, 1536 }
 0x124   : > { %s5599_s6 = scalar_lea.hbm %s6146_s0, 768  ;;  %p5605_p5 = scmp.lt.u32.totalorder %s6146_s0, %s7299_s1 }
 0x125   : > { %p5600_p4 = scmp.ne.s32.totalorder %s6146_s0, %s5599_s6  ;;  %p5606_p7 = scmp.lt.u32.totalorder %s5604_s28, %s5599_s6 }
 0x126   : > { %p5608_p12 = scmp.lt.u32.totalorder %s5599_s6, %s6146_s0 }
 0x127   : > { %p5602_p10 = pnand %p5600_p4, %p5571_p8  ;;  %p5607_p9 = por %p5606_p7, %p5605_p5 }
 0x129   : > { %p5603_p0 = pneg %p5602_p10  ;;  %p5609_p13 = por %p5608_p12, %p5607_p9 }
 0x12b   : > { %p5610_p1 = pnand %p5609_p13, %p5603_p0 }
 0x12d   : > { %5613 = shalt.err (!%p5610_p1)
}
 0x12e   : > { %s5614_s4 = scalar_lea.vmem %s6148_s18, 768  ;;  %s5758_s11 = smov [#allocation9]  }
 0x12f   : > { %p5615_p3 = scmp.ne.s32.totalorder %s6148_s18, %s5614_s4  ;;  %s5619_s24 = sshll.u32 %s5758_s11, 4  ;;  %s5620_s24 = int_to_ptr.vmem [resolvable:$false] %s5619_s24 }
 0x130   : > { %s5621_s27 = scalar_lea.vmem %s5620_s24, 1536  ;;  %p5622_p10 = scmp.lt.s32.totalorder %s6148_s18, %s5620_s24 }
 0x131   : > { %p5617_p2 = pnand %p5615_p3, %p5571_p8  ;;  %p5623_p5 = scmp.lt.s32.totalorder %s5621_s27, %s5614_s4 }
 0x133   : > { %p5618_p4 = pneg %p5617_p2  ;;  %p5624_p7 = por %p5623_p5, %p5622_p10 }
 0x135   : > { %p5625_p9 = pnand %p5624_p7, %p5618_p4 }
 0x137   : > { %5628 = shalt.err (!%p5625_p9)
}
 0x138   : > { %5161 = dma.hbm_to_vmem [thread:$0]  (!%p6103_p11), %s6146_s0, 768, %s6148_s18, %s6152_s5, %s7298_s12, %s7298_s12, %s7297_s25  }
 0x139   : > { %s7301_s6 = sld [smem:[#allocation32_spill]] }
 0x13f   : > { %p7302_p8 = scmp.ne.s32.totalorder %s7301_s6, 0 }
 0x140   : > { %s6184_s3 = sand.u32 (!%p7302_p8), 1, %s5723_s14  }
 0x141   : > { %441 = sbr.rel (%p7302_p8) target bundleno = 2770 (0xad2), region = 60  ;;  %s4190_s26 = sshll.u32 (!%p7302_p8), %s6184_s3, 7 }
 0x142   : > { %s444_s17 = scalar_lea.sflag (!%p7302_p8), [#allocation7], %s6184_s3  ;;  %s6188_s28 = scalar_lea.vmem (!%p7302_p8), [#allocation6], %s4190_s26 }
 0x148   : > { %5686 = dma.done.wait (%p6075_p6), %s444_s17, 2048  }
 0x149   : > { %5688 = vsyncadd (%p6075_p6), %s444_s17, 4294965248  ;;  %s452_s0 = sand.u32 1, %s5847_s19   ;;  %s5081_s5 = smul.u32 48, %s6184_s3 }
 0x14a   : > { %s453_s10 = scalar_lea.sflag [#allocation10], %s452_s0 }
 0x14b   : > { %s6196_s25 = scalar_lea.vmem [#allocation9], %s5081_s5 }
 0x14c   : > { %5690 = dma.done.wait (%p6075_p6), %s453_s10, 768  }
 0x14d   : > { %5692 = vsyncadd (%p6075_p6), %s453_s10, 4294966528  ;;  %p7303_p11 = scmp.eq.s32.totalorder %s5847_s19, 0 }
 0x14f   : > { %5694 = dma.done.wait (%p7303_p11), [#allocation10], 2304   ;;  %p7304_p0 = pmov %p7303_p11 }
 0x151   : > { %5696 = vsyncadd (%p7304_p0), [#allocation10], 4294964992  ;;  %p7305_p12 = pmov %p7304_p0 }
 0x152   : > { %p7306_p13 = pmov %p7304_p0 }
 0x153   : > { %5698 = dma.done.wait (%p7305_p12), [#allocation13], 4608  }
 0x154   : > { %5700 = vsyncadd (%p7306_p13), [#allocation13], 4294962688  ;;  %p7307_p1 = pmov %p7304_p0 }
 0x155   : > { %p7308_p3 = pmov %p7304_p0 }
 0x156   : > { %5702 = dma.done.wait (%p7307_p1), [#allocation16], 2560  }
 0x157   : > { %5704 = vsyncadd (%p7308_p3), [#allocation16], 4294964736  ;;  %p7309_p6 = pmov %p7304_p0 }
 0x158   : > { %p7310_p2 = pmov %p7304_p0 }
 0x159   : > { %5706 = dma.done.wait (%p7309_p6), [#allocation19], 272  }
 0x15a   : > { %5708 = vsyncadd (%p7310_p2), [#allocation19], 4294967024  ;;  %p7311_p4 = pmov %p7304_p0 }
 0x15b   : > { %p7312_p10 = pmov %p7304_p0 }
 0x15c   : > { %5710 = dma.done.wait (%p7311_p4), [#allocation22], 128  }
 0x15d   : > { %5712 = vsyncadd (%p7312_p10), [#allocation22], 4294967168  ;;  %s4199_s20 = sshll.u32 %s6184_s3, 8  ;;  %vm531_vm0 = vcmask 785408   ;;  %v534_v0 = vlaneseq  ;;  %v5759_v1 = vmov 0   ;;  %v539_v3 = vld [vmem:[#allocation21] sm:$0xff] }
 0x15e   : > { %532 = vst.msk [vmem:[#allocation2] sm:$0xff] %vm531_vm0, %v5759_v1  ;;  %533 = vst.msk [vmem:[#allocation2 + $0x48] sm:$0xff] %vm531_vm0, %v5759_v1  ;;  %s6227_s12 = scalar_lea.vmem [#allocation23], %s4199_s20  ;;  %s6229_s18 = smov 0  }
 0x15f   : > { %v6225_v2 = vshrl.u32 %v534_v0, 7 }
 0x160 LB: >> { %v5760_v4 = vmov 0.0   ;;  %vm5761_vm1 = vmmov 0   ;;  %s546_s29 = scvt.s32.f32 %s5735_s18  ;;  %s5762_s24 = smov 0.0   ;;  %vm575_vm2 = vcmask 1045504   ;;  %vm571_vm3 = vcmask 48128   ;;  %s5735_s18 = sphi %s6229_s18, %s545_s18  }
 0x161   : >> { %4581 = vmatprep.subr.mxu0 %v5760_v4  ;;  %4583 = vmatprep.mubr.msk.f32.mxu0 %vm5761_vm1, %v5760_v4  ;;  %s5763_s6 = smov 5.0   ;;  %vm650_vm4 = vcmask 261120  }
 0x162   : >> { %s547_s30 = sadd.f32 0.5, %s546_s29 }
 0x164   : >> { %s548_s4 = smul.f32 0.75, %s547_s30 }
 0x166   : >> { %s4200_s11 = sadd.f32 -0.5, %s548_s4 }
 0x168   : >> { %s550_s27 = smax.f32 %s5762_s24, %s4200_s11  ;;  %s4203_s11 = sshll.u32 %s5735_s18, 4 }
 0x169   : >> { %s551_s26 = smin.f32 %s5763_s6, %s550_s27  ;;  %s545_s18 = sadd.s32 1, %s5735_s18  }
 0x16a   : >> { %p5082_p5 = scmp.lt.s32.totalorder %s551_s26, 0  ;;  %s5083_s17 = sceil.f32 %s551_s26 }
 0x16b   : >> { %s5084_s0 = sfloor.f32 %s551_s26  ;;  %p542_p9 = scmp.ge.s32.totalorder %s545_s18, 8  }
 0x16c   : >> { %s7322_s17 = smov (!%p5082_p5, %s5083_s17), %s5084_s0  ;;  %v5764_v18 = vmov (%p542_p9), 0.0   ;;  %vm785_vm5 = vcmp.lt.s32.totalorder (%p542_p9), %v6225_v2, 7  ;;  %v5263_v34 = vld [vmem:[#allocation11 + $0x30] sm:$0xff] (%p542_p9)   ;;  %v5264_v35 = vld [vmem:[#allocation11 + $0x38] sm:$0xff] (%p542_p9)   ;;  %v5265_v48 = vld [vmem:[#allocation11 + $0x40] sm:$0xff] (%p542_p9)   ;;  %vm744_vm6 = vcmp.lt.s32.totalorder (%p542_p9), %v6225_v2, 1 }
 0x16d   : >> { %s5086_s5 = scvt.f32.s32 %s7322_s17  ;;  %v6247_v19 = vrot.slane (%p542_p9), %v5764_v18, 1  ;;  %v6305_v55 = vrot.slane (%p542_p9), %v5764_v18, 7  ;;  %v5266_v62 = vld [vmem:[#allocation11 + $0x48] sm:$0xff] (%p542_p9)   ;;  %vm851_vm7 = vcmask (%p542_p9), 523520   ;;  %vm892_vm8 = vcmask (%p542_p9), 785920  }
 0x16f   : >> { %s553_s10 = sadd.s32 1, %s5086_s5  ;;  %s556_s20 = scvt.s32.f32 %s5086_s5 }
 0x170   : >> { %p554_p7 = scmp.lt.s32.totalorder %s553_s10, 5  ;;  %s4201_s1 = sshll.u32 %s5086_s5, 3 }
 0x171   : >> { %s557_s7 = ssub.f32 %s551_s26, %s556_s20  ;;  %s560_s8 = scalar_lea.vmem %s6196_s25, %s4201_s1 [#allocation9] }
 0x172   : >> { %s7324_s10 = smov (!%p554_p7, %s553_s10), 5  ;;  %v561_v5 = vld [vmem:[%s560_s8] sm:$0x3f]  ;;  %s649_s1 = scalar_lea.vmem [#allocation5], %s4203_s11 }
 0x173   : >> { %s558_s29 = ssub.f32 1.0, %s557_s7  ;;  %s4202_s30 = sshll.u32 %s7324_s10, 3  ;;  %v567_v6 = vstv %s557_s7 }
 0x174   : >> { %s565_s4 = scalar_lea.vmem %s6196_s25, %s4202_s30 [#allocation9]  ;;  %s5765_s7 = smov (%p542_p9), 32  }
 0x175   : >> { %v562_v7 = vstv %s558_s29  ;;  %v566_v9 = vld [vmem:[%s565_s4] sm:$0x3f]  ;;  %s5766_s8 = smov (%p542_p9), 64  }
 0x176   : >> { %v563_v8 = vmul.f32 %v562_v7, %v561_v5  ;;  %v568_v10 = vmul.f32 %v567_v6, %v566_v9 }
 0x178   : >> { %v569_v11 = vadd.f32 %v568_v10, %v563_v8  ;;  %v5267_v10 = vld [vmem:[#allocation11 + $0x50] sm:$0xff] (%p542_p9)  }
 0x17a   : >> { %4582 = vmatpush3.msk.msra.mxu0 %vm575_vm2, %v569_v11 }
 0x17b   : >> { %4584 = vmatmul.mubr.msk.f32.vlgmr.msra.gmra.mrb[0].mxu0 %vm571_vm3, %v539_v3  ;;  %4586 = vmatprep.subr.bf16.mxu0 (%p542_p9), %v5263_v34 }
 0x17c   : > { %4587 = vmatpush3.bf16.msra.mxu0 (%p542_p9), %v5263_v34 }
 0x17d   : > { %4588 = vmatprep.subr.bf16.mxu0 (%p542_p9), %v5264_v35 }
 0x180   : > { %4589 = vmatpush3.bf16.msra.mxu0 (%p542_p9), %v5264_v35 }
 0x181   : > { %4590 = vmatprep.subr.bf16.mxu0 (%p542_p9), %v5265_v48 }
 0x184   : > { %4591 = vmatpush3.bf16.msra.mxu0 (%p542_p9), %v5265_v48 }
 0x185   : > { %4592 = vmatprep.subr.bf16.mxu0 (%p542_p9), %v5266_v62 }
 0x188   : > { %4593 = vmatpush3.bf16.msra.mxu0 (%p542_p9), %v5266_v62 }
 0x189   : > { %4594 = vmatprep.subr.bf16.mxu0 (%p542_p9), %v5267_v10 }
 0x18c   : > { %4595 = vmatpush3.bf16.msra.mxu0 (%p542_p9), %v5267_v10 }
 0x249   : > { %544 = sbr.rel (!%p542_p9) target bundleno = 352 (0x160), region = 187 }
 0x24e   : >> { %v645_v12 = vpop.f32.mrb[0].mxu0 }
 0x24f   : >> { %651 = vst.msk [vmem:[%s649_s1] sm:$0xff] %vm650_vm4, %v645_v12  ;;  %v4585_v13 = vpop.f32.mrb[1].mxu0 }
 0x256   : > { %v652_v14 = vld [vmem:[#allocation5] sm:$0xff]  ;;  %v654_v15 = vld [vmem:[#allocation5 + $0x10] sm:$0xff] }
 0x257   : > { %v6242_v16 = vmax.f32 %v652_v14, 0.0  ;;  %v6244_v17 = vmax.f32 %v654_v15, 0.0  ;;  %v656_v20 = vld [vmem:[#allocation5 + $0x20] sm:$0xff]  ;;  %v658_v21 = vld [vmem:[#allocation5 + $0x30] sm:$0xff] }
 0x258   : > { %v660_v22 = vld [vmem:[#allocation5 + $0x40] sm:$0xff]  ;;  %v6250_v23 = vmax.f32 %v656_v20, 0.0  ;;  %v6252_v24 = vmax.f32 %v658_v21, 0.0  ;;  %v662_v29 = vld [vmem:[#allocation5 + $0x50] sm:$0xff] }
 0x259   : > { %v6254_v25 = vmax.f32 %v660_v22, 0.0  ;;  %v720_v26 = vpack.c.bf16 %v5764_v18, %v6242_v16  ;;  %v769_v27 = vrot.slane %v6242_v16, 1  ;;  %v771_v28 = vrot.slane %v6244_v17, 1  ;;  %v664_v33 = vld [vmem:[#allocation5 + $0x60] sm:$0xff]  ;;  %v666_v40 = vld [vmem:[#allocation5 + $0x70] sm:$0xff] }
 0x25a   : > { %v721_v30 = vpack.c.bf16 %v5764_v18, %v6244_v17  ;;  %v773_v31 = vrot.slane %v6250_v23, 1  ;;  %v775_v32 = vrot.slane %v6252_v24, 1  ;;  %v722_v43 = vpack.c.bf16 %v5764_v18, %v6250_v23 }
 0x25b   : > { %827 = vrot.lane.b32.xlu0 %v720_v26, %s5765_s7  ;;  %v799_v36 = vsel %vm785_vm5, %v6247_v19, %v771_v28  ;;  %v800_v37 = vsel %vm785_vm5, %v769_v27, %v6247_v19  ;;  %v798_v38 = vsel %vm785_vm5, %v771_v28, %v6247_v19  ;;  %v777_v39 = vrot.slane %v6254_v25, 1 }
 0x25c   : > { %v802_v41 = vpack.c.bf16 %v799_v36, %v800_v37  ;;  %v797_v42 = vsel %vm785_vm5, %v6247_v19, %v773_v31  ;;  %v795_v45 = vsel %vm785_vm5, %v6247_v19, %v775_v32  ;;  %v796_v46 = vsel %vm785_vm5, %v773_v31, %v6247_v19 }
 0x25d   : > { %v803_v44 = vpack.c.bf16 %v797_v42, %v798_v38  ;;  %v6289_v47 = vmax.f32 %v662_v29, 0.0  ;;  %v793_v49 = vsel %vm785_vm5, %v6247_v19, %v777_v39  ;;  %v6295_v50 = vmax.f32 %v664_v33, 0.0  ;;  %v5269_v42 = vld [vmem:[#allocation11] sm:$0xff]  }
 0x25e   : > { %868 = vrot.lane.b32.xlu1 %v802_v41, %s5766_s8  ;;  %v6297_v51 = vmax.f32 %v666_v40, 0.0  ;;  %v728_v52 = vrot.slane %v6242_v16, 7  ;;  %v794_v53 = vsel %vm785_vm5, %v775_v32, %v6247_v19  ;;  %v723_v56 = vpack.c.bf16 %v5764_v18, %v6252_v24 }
 0x25f   : > { %829 = vrot.lane.b32.xlu0 %v721_v30, %s5765_s7  ;;  %v779_v54 = vrot.slane %v6289_v47, 1  ;;  %v781_v57 = vrot.slane %v6295_v50, 1  ;;  %v6320_v59 = vsel %vm785_vm5, %v777_v39, %v6247_v19  ;;  %v804_v63 = vpack.c.bf16 %v795_v45, %v796_v46 }
 0x260   : > { %v783_v60 = vrot.slane %v6297_v51, 1  ;;  %v759_v61 = vsel %vm744_vm6, %v728_v52, %v6305_v55  ;;  %v805_v0 = vpack.c.bf16 %v793_v49, %v794_v53  ;;  %v724_v1 = vpack.c.bf16 %v5764_v18, %v6254_v25 }
 0x261   : > { %v6315_v58 = vsel %vm785_vm5, %v6247_v19, %v779_v54  ;;  %v725_v3 = vpack.c.bf16 %v5764_v18, %v6289_v47  ;;  %v790_v4 = vsel %vm785_vm5, %v779_v54, %v6247_v19  ;;  %v760_v5 = vsel %vm744_vm6, %v6305_v55, %v728_v52 }
 0x262   : > { %870 = vrot.lane.b32.xlu1 %v803_v44, %s5766_s8  ;;  %v806_v6 = vpack.c.bf16 %v6315_v58, %v6320_v59  ;;  %v789_v7 = vsel %vm785_vm5, %v6247_v19, %v781_v57  ;;  %v761_v8 = vpack.c.bf16 %v759_v61, %v760_v5  ;;  %v730_v9 = vrot.slane %v6244_v17, 7  ;;  %v5272_v5 = vld [vmem:[#allocation11 + $0x18] sm:$0xff]  }
 0x263   : > { %831 = vrot.lane.b32.xlu0 %v722_v43, %s5765_s7  ;;  %v732_v11 = vrot.slane %v6250_v23, 7  ;;  %v734_v12 = vrot.slane %v6252_v24, 7  ;;  %v736_v13 = vrot.slane %v6254_v25, 7  ;;  %v738_v14 = vrot.slane %v6289_v47, 7  ;;  %v5268_v25 = vld [vmem:[#allocation11 + $0x58] sm:$0xff]  }
 0x264   : > { %811 = vst.msk [vmem:[#allocation2 + $0x8] sm:$0xff] %vm650_vm4, %v761_v8  ;;  %v757_v15 = vsel %vm744_vm6, %v730_v9, %v6305_v55  ;;  %v758_v17 = vsel %vm744_vm6, %v6305_v55, %v730_v9  ;;  %v740_v20 = vrot.slane %v6295_v50, 7  ;;  %v742_v21 = vrot.slane %v6297_v51, 7  ;;  %4596 = vmatprep.subr.bf16.mxu0 %v5268_v25  ;;  %v5273_v9 = vld [vmem:[#allocation11 + $0x20] sm:$0xff]  }
 0x265   : > { %v762_v22 = vpack.c.bf16 %v757_v15, %v758_v17  ;;  %v755_v23 = vsel %vm744_vm6, %v732_v11, %v6305_v55  ;;  %v756_v24 = vsel %vm744_vm6, %v6305_v55, %v732_v11  ;;  %v753_v26 = vsel %vm744_vm6, %v734_v12, %v6305_v55  ;;  %4597 = vmatpush3.bf16.msra.mxu0 %v5268_v25  ;;  %v5275_v17 = vld [vmem:[#allocation11 + $0x60] sm:$0xff]   ;;  %v5278_v25 = vld [vmem:[#allocation11 + $0x78] sm:$0xff]  }
 0x266   : > { %833 = vrot.lane.b32.xlu1 %v723_v56, %s5765_s7  ;;  %v763_v28 = vpack.c.bf16 %v755_v23, %v756_v24  ;;  %v754_v29 = vsel %vm744_vm6, %v6305_v55, %v734_v12  ;;  %v751_v30 = vsel %vm744_vm6, %v736_v13, %v6305_v55  ;;  %v752_v31 = vsel %vm744_vm6, %v6305_v55, %v736_v13  ;;  %v5274_v13 = vld [vmem:[#allocation11 + $0x28] sm:$0xff]   ;;  %v5277_v24 = vld [vmem:[#allocation11 + $0x70] sm:$0xff]  }
 0x267   : > { %872 = vrot.lane.b32.xlu0 %v804_v63, %s5766_s8  ;;  %812 = vst.msk [vmem:[#allocation2 + $0x10] sm:$0xff] %vm650_vm4, %v762_v22  ;;  %v764_v32 = vpack.c.bf16 %v753_v26, %v754_v29  ;;  %v765_v33 = vpack.c.bf16 %v751_v30, %v752_v31  ;;  %v749_v34 = vsel %vm744_vm6, %v738_v14, %v6305_v55  ;;  %v5276_v23 = vld [vmem:[#allocation11 + $0x68] sm:$0xff]   ;;  %v5279_v26 = vld [vmem:[#allocation11 + $0x80] sm:$0xff]   ;;  %v6488_v29 = vld [vmem:[#allocation2 + $0x48] sm:$0xff] }
 0x268   : > { %813 = vst.msk [vmem:[#allocation2 + $0x18] sm:$0xff] %vm650_vm4, %v763_v28  ;;  %v750_v35 = vsel %vm744_vm6, %v6305_v55, %v738_v14  ;;  %v747_v36 = vsel %vm744_vm6, %v740_v20, %v6305_v55  ;;  %v748_v37 = vsel %vm744_vm6, %v6305_v55, %v740_v20  ;;  %v745_v38 = vsel %vm744_vm6, %v742_v21, %v6305_v55  ;;  %v5280_v28 = vld [vmem:[#allocation11 + $0x88] sm:$0xff]   ;;  %v5281_v30 = vld [vmem:[#allocation12 + $0x30] sm:$0xff]  }
 0x269   : > { %814 = vst.msk [vmem:[#allocation2 + $0x20] sm:$0xff] %vm650_vm4, %v764_v32  ;;  %815 = vst.msk [vmem:[#allocation2 + $0x28] sm:$0xff] %vm650_vm4, %v765_v33  ;;  %v766_v39 = vpack.c.bf16 %v749_v34, %v750_v35  ;;  %v767_v40 = vpack.c.bf16 %v747_v36, %v748_v37  ;;  %v746_v41 = vsel %vm744_vm6, %v6305_v55, %v742_v21  ;;  %4614 = vmatprep.subr.bf16.mxu0 %v5269_v42  ;;  %v6465_v21 = vld [vmem:[#allocation2] sm:$0xff]  ;;  %v5282_v31 = vld [vmem:[#allocation12 + $0x38] sm:$0xff]  }
 0x26a   : > { %874 = vrot.lane.b32.xlu1 %v805_v0, %s5766_s8  ;;  %v768_v43 = vpack.c.bf16 %v745_v38, %v746_v41  ;;  %v807_v44 = vpack.c.bf16 %v789_v7, %v790_v4  ;;  %v726_v45 = vpack.c.bf16 %v5764_v18, %v6295_v50  ;;  %v787_v46 = vsel %vm785_vm5, %v6247_v19, %v783_v60  ;;  %v5271_v0 = vld [vmem:[#allocation11 + $0x10] sm:$0xff]   ;;  %v5284_v33 = vld [vmem:[#allocation12 + $0x48] sm:$0xff]   ;;  %v5285_v37 = vld [vmem:[#allocation12 + $0x50] sm:$0xff]  }
 0x26b   : > { %835 = vrot.lane.b32.xlu0 %v724_v1, %s5765_s7  ;;  %816 = vst.msk [vmem:[#allocation2 + $0x30] sm:$0xff] %vm650_vm4, %v766_v39  ;;  %817 = vst.msk [vmem:[#allocation2 + $0x38] sm:$0xff] %vm650_vm4, %v767_v40  ;;  %v788_v47 = vsel %vm785_vm5, %v781_v57, %v6247_v19  ;;  %v727_v48 = vpack.c.bf16 %v5764_v18, %v6297_v51  ;;  %v786_v52 = vsel %vm785_vm5, %v783_v60, %v6247_v19  ;;  %v5270_v60 = vld [vmem:[#allocation11 + $0x8] sm:$0xff]   ;;  %v5283_v32 = vld [vmem:[#allocation12 + $0x40] sm:$0xff]  }
 0x26c   : > { %818 = vst.msk [vmem:[#allocation2 + $0x40] sm:$0xff] %vm650_vm4, %v768_v43  ;;  %v808_v49 = vpack.c.bf16 %v787_v46, %v788_v47  ;;  %v801_v50 = vsel %vm785_vm5, %v6247_v19, %v769_v27  ;;  %4670 = vmatprep.subr.bf16.mxu1 %v5281_v30 }
 0x26d   : > { %v809_v53 = vpack.c.bf16 %v801_v50, %v786_v52  ;;  %4671 = vmatpush3.bf16.msra.mxu1 %v5281_v30  ;;  %v5286_v52 = vld [vmem:[#allocation12 + $0x58] sm:$0xff]  }
 0x26e   : > { %837 = vrot.lane.b32.xlu1 %v725_v3, %s5765_s7  ;;  %4672 = vmatprep.subr.bf16.mxu1 %v5282_v31 }
 0x26f   : > { %876 = vrot.lane.b32.xlu0 %v806_v6, %s5766_s8 }
 0x271   : > { %4673 = vmatpush3.bf16.msra.mxu1 %v5282_v31 }
 0x272   : > { %878 = vrot.lane.b32.xlu1 %v807_v44, %s5766_s8  ;;  %4674 = vmatprep.subr.bf16.mxu1 %v5283_v32 }
 0x273   : > { %839 = vrot.lane.b32.xlu0 %v726_v45, %s5765_s7 }
 0x275   : > { %4675 = vmatpush3.bf16.msra.mxu1 %v5283_v32 }
 0x276   : > { %841 = vrot.lane.b32.xlu1 %v727_v48, %s5765_s7  ;;  %4676 = vmatprep.subr.bf16.mxu1 %v5284_v33 }
 0x277   : > { %880 = vrot.lane.b32.xlu0 %v808_v49, %s5766_s8 }
 0x279   : > { %4677 = vmatpush3.bf16.msra.mxu1 %v5284_v33 }
 0x27a   : > { %882 = vrot.lane.b32.xlu1 %v809_v53, %s5766_s8  ;;  %4678 = vmatprep.subr.bf16.mxu1 %v5285_v37 }
 0x27d   : > { %4679 = vmatpush3.bf16.msra.mxu1 %v5285_v37 }
 0x27e   : > { %4680 = vmatprep.subr.bf16.mxu1 %v5286_v52 }
 0x281   : > { %4681 = vmatpush3.bf16.msra.mxu1 %v5286_v52 }
 0x2cd   : > { %v828_v54 = vpop.permute.xlu0 %827 }
 0x2ce   : > { %852 = vst.msk [vmem:[#allocation2 + $0x8] sm:$0xff] %vm851_vm7, %v828_v54 }
 0x2d0   : > { %v869_v51 = vpop.permute.xlu1 %868 }
 0x2d1   : > { %893 = vst.msk [vmem:[#allocation2 + $0x8] sm:$0xff] %vm892_vm8, %v869_v51  ;;  %v830_v16 = vpop.permute.xlu0 %829 }
 0x2d2   : > { %853 = vst.msk [vmem:[#allocation2 + $0x10] sm:$0xff] %vm851_vm7, %v830_v16 }
 0x2d4   : > { %v871_v56 = vpop.permute.xlu1 %870 }
 0x2d5   : > { %894 = vst.msk [vmem:[#allocation2 + $0x10] sm:$0xff] %vm892_vm8, %v871_v56  ;;  %v832_v27 = vpop.permute.xlu0 %831 }
 0x2d6   : > { %854 = vst.msk [vmem:[#allocation2 + $0x18] sm:$0xff] %vm851_vm7, %v832_v27 }
 0x2d8   : > { %v834_v57 = vpop.permute.xlu1 %833  ;;  %v902_v58 = vld [vmem:[#allocation2 + $0x8] sm:$0xff] }
 0x2d9   : > { %855 = vst.msk [vmem:[#allocation2 + $0x20] sm:$0xff] %vm851_vm7, %v834_v57  ;;  %4598 = vmatprep.mubr.msk.bf16.mxu0 %vm531_vm0, %v902_v58  ;;  %v873_v59 = vpop.permute.xlu0 %872 }
 0x2da   : > { %895 = vst.msk [vmem:[#allocation2 + $0x18] sm:$0xff] %vm892_vm8, %v873_v59  ;;  %v6522_v59 = vld [vmem:[#allocation12] sm:$0xff]  }
 0x2db   : > { %4698 = vmatprep.subr.bf16.mxu1 %v6522_v59 }
 0x2dc   : > { %v875_v61 = vpop.permute.xlu1 %874  ;;  %v6444_v62 = vld [vmem:[#allocation2 + $0x10] sm:$0xff] }
 0x2dd   : > { %896 = vst.msk [vmem:[#allocation2 + $0x20] sm:$0xff] %vm892_vm8, %v875_v61  ;;  %4599 = vmatmul.mubr.msk.bf16.vlgmr.msra.gmra.mrb[0].mxu0 %vm531_vm0, %v6444_v62  ;;  %v836_v63 = vpop.permute.xlu0 %835 }
 0x2de   : > { %4615 = vmatpush3.bf16.msra.mxu0 %v5269_v42  ;;  %856 = vst.msk [vmem:[#allocation2 + $0x28] sm:$0xff] %vm851_vm7, %v836_v63 }
 0x2df   : > { %4616 = vmatprep.subr.bf16.mxu0 %v5270_v60 }
 0x2e0   : > { %v838_v1 = vpop.permute.xlu1 %837 }
 0x2e1   : > { %857 = vst.msk [vmem:[#allocation2 + $0x30] sm:$0xff] %vm851_vm7, %v838_v1  ;;  %v877_v3 = vpop.permute.xlu0 %876  ;;  %v6451_v4 = vld [vmem:[#allocation2 + $0x18] sm:$0xff] }
 0x2e2   : > { %4617 = vmatpush3.bf16.msra.mxu0 %v5270_v60  ;;  %897 = vst.msk [vmem:[#allocation2 + $0x28] sm:$0xff] %vm892_vm8, %v877_v3  ;;  %4602 = vmatprep.mubr.msk.bf16.mxu0 %vm531_vm0, %v6451_v4 }
 0x2e3   : > { %4618 = vmatprep.subr.bf16.mxu0 %v5271_v0 }
 0x2e4   : > { %v879_v6 = vpop.permute.xlu1 %878  ;;  %v905_v7 = vld [vmem:[#allocation2 + $0x20] sm:$0xff] }
 0x2e5   : > { %898 = vst.msk [vmem:[#allocation2 + $0x30] sm:$0xff] %vm892_vm8, %v879_v6  ;;  %4603 = vmatmul.mubr.msk.bf16.gmra.mrb[4].mxu0 %vm531_vm0, %v905_v7  ;;  %v840_v8 = vpop.permute.xlu0 %839 }
 0x2e6   : > { %858 = vst.msk [vmem:[#allocation2 + $0x38] sm:$0xff] %vm851_vm7, %v840_v8  ;;  %4619 = vmatpush3.bf16.msra.mxu0 %v5271_v0 }
 0x2e7   : > { %4620 = vmatprep.subr.bf16.mxu0 %v5272_v5 }
 0x2e8   : > { %v842_v10 = vpop.permute.xlu1 %841 }
 0x2e9   : > { %859 = vst.msk [vmem:[#allocation2 + $0x40] sm:$0xff] %vm851_vm7, %v842_v10  ;;  %v881_v11 = vpop.permute.xlu0 %880  ;;  %v906_v12 = vld [vmem:[#allocation2 + $0x28] sm:$0xff] }
 0x2ea   : > { %899 = vst.msk [vmem:[#allocation2 + $0x38] sm:$0xff] %vm892_vm8, %v881_v11  ;;  %4606 = vmatprep.mubr.msk.bf16.mxu0 %vm531_vm0, %v906_v12  ;;  %4621 = vmatpush3.bf16.msra.mxu0 %v5272_v5 }
 0x2eb   : > { %4622 = vmatprep.subr.bf16.mxu0 %v5273_v9 }
 0x2ec   : > { %v883_v14 = vpop.permute.xlu1 %882  ;;  %v907_v15 = vld [vmem:[#allocation2 + $0x30] sm:$0xff] }
 0x2ed   : > { %900 = vst.msk [vmem:[#allocation2 + $0x40] sm:$0xff] %vm892_vm8, %v883_v14  ;;  %4607 = vmatmul.mubr.msk.bf16.gmra.mrb[8].mxu0 %vm531_vm0, %v907_v15 }
 0x2ee   : > { %4623 = vmatpush3.bf16.msra.mxu0 %v5273_v9 }
 0x2ef   : > { %4624 = vmatprep.subr.bf16.mxu0 %v5274_v13 }
 0x2f1   : > { %v908_v20 = vld [vmem:[#allocation2 + $0x38] sm:$0xff] }
 0x2f2   : > { %4610 = vmatprep.mubr.msk.bf16.mxu0 %vm531_vm0, %v908_v20  ;;  %4625 = vmatpush3.bf16.msra.mxu0 %v5274_v13 }
 0x2f3   : > { %4642 = vmatprep.subr.bf16.mxu0 %v5275_v17 }
 0x2f4   : > { %v921_v22 = vld [vmem:[#allocation2 + $0x40] sm:$0xff] }
 0x2f5   : > { %4611 = vmatmul.mubr.msk.bf16.gmra.mrb[12].mxu0 %vm531_vm0, %v921_v22 }
 0x2f6   : > { %4626 = vmatprep.mubr.msk.bf16.mxu0 %vm531_vm0, %v6465_v21 }
 0x2fd   : > { %4627 = vmatmul.mubr.msk.bf16.vlgmr.msra.gmra.mrb[0].mxu0 %vm531_vm0, %v902_v58 }
 0x2fe   : > { %4643 = vmatpush3.bf16.msra.mxu0 %v5275_v17  ;;  %4630 = vmatprep.mubr.msk.bf16.mxu0 %vm531_vm0, %v6444_v62 }
 0x2ff   : > { %4644 = vmatprep.subr.bf16.mxu0 %v5276_v23 }
 0x302   : > { %4645 = vmatpush3.bf16.msra.mxu0 %v5276_v23 }
 0x303   : > { %4646 = vmatprep.subr.bf16.mxu0 %v5277_v24 }
 0x305   : > { %4631 = vmatmul.mubr.msk.bf16.gmra.mrb[4].mxu0 %vm531_vm0, %v6451_v4 }
 0x306   : > { %4634 = vmatprep.mubr.msk.bf16.mxu0 %vm531_vm0, %v905_v7  ;;  %4647 = vmatpush3.bf16.msra.mxu0 %v5277_v24 }
 0x307   : > { %4648 = vmatprep.subr.bf16.mxu0 %v5278_v25 }
 0x30a   : > { %4649 = vmatpush3.bf16.msra.mxu0 %v5278_v25 }
 0x30b   : > { %4650 = vmatprep.subr.bf16.mxu0 %v5279_v26 }
 0x30d   : > { %4635 = vmatmul.mubr.msk.bf16.gmra.mrb[8].mxu0 %vm531_vm0, %v906_v12 }
 0x30e   : > { %4638 = vmatprep.mubr.msk.bf16.mxu0 %vm531_vm0, %v907_v15  ;;  %4651 = vmatpush3.bf16.msra.mxu0 %v5279_v26 }
 0x30f   : > { %4652 = vmatprep.subr.bf16.mxu0 %v5280_v28 }
 0x312   : > { %4653 = vmatpush3.bf16.msra.mxu0 %v5280_v28 }
 0x315   : > { %4639 = vmatmul.mubr.msk.bf16.gmra.mrb[12].mxu0 %vm531_vm0, %v908_v20 }
 0x316   : > { %4654 = vmatprep.mubr.msk.bf16.mxu0 %vm531_vm0, %v6444_v62 }
 0x31d   : > { %4655 = vmatmul.mubr.msk.bf16.vlgmr.msra.gmra.mrb[0].mxu0 %vm531_vm0, %v6451_v4 }
 0x31e   : > { %4658 = vmatprep.mubr.msk.bf16.mxu0 %vm531_vm0, %v905_v7 }
 0x325   : > { %4659 = vmatmul.mubr.msk.bf16.gmra.mrb[4].mxu0 %vm531_vm0, %v906_v12 }
 0x326   : > { %4662 = vmatprep.mubr.msk.bf16.mxu0 %vm531_vm0, %v907_v15 }
 0x32d   : > { %4663 = vmatmul.mubr.msk.bf16.gmra.mrb[8].mxu0 %vm531_vm0, %v908_v20 }
 0x32e   : > { %4666 = vmatprep.mubr.msk.bf16.mxu0 %vm531_vm0, %v921_v22 }
 0x335   : > { %4667 = vmatmul.mubr.msk.bf16.gmra.mrb[12].mxu0 %vm531_vm0, %v6488_v29 }
 0x3f0   : > { %v4656_v34 = vpop.f32.mrb[0].mxu0 }
 0x3f1   : > { %v1424_v35 = vmax.f32 %v4656_v34, 0.0  ;;  %v1343_v36 = vpop.f32.mrb[1].mxu0 }
 0x3f2   : > { %v6492_v38 = vmax.f32 %v1343_v36, 0.0  ;;  %v4657_v39 = vpop.f32.mrb[2].mxu0 }
 0x3f3   : > { %v1464_v40 = vrot.slane %v1424_v35, 7  ;;  %v1504_v41 = vrot.slane %v1424_v35, 1  ;;  %v1346_v42 = vpop.f32.mrb[3].mxu0  ;;  %v1455_v43 = vpack.c.bf16 %v5764_v18, %v1424_v35 }
 0x3f4   : > { %v1462_v44 = vrot.slane %v6492_v38, 7  ;;  %v1502_v45 = vrot.slane %v6492_v38, 1  ;;  %v1454_v46 = vpack.c.bf16 %v5764_v18, %v6492_v38 }
 0x3f5   : > { %v1490_v47 = vsel %vm744_vm6, %v1464_v40, %v6305_v55  ;;  %v1491_v48 = vsel %vm744_vm6, %v6305_v55, %v1464_v40  ;;  %1560 = vrot.lane.b32.xlu1 %v1455_v43, %s5765_s7  ;;  %v1531_v49 = vsel %vm785_vm5, %v6247_v19, %v1504_v41  ;;  %v1530_v7 = vsel %vm785_vm5, %v1504_v41, %v6247_v19 }
 0x3f6   : > { %v1495_v50 = vpack.c.bf16 %v1490_v47, %v1491_v48  ;;  %1558 = vrot.lane.b32.xlu0 %v1454_v46, %s5765_s7  ;;  %v1532_v53 = vsel %vm785_vm5, %v1502_v45, %v6247_v19  ;;  %v1492_v54 = vsel %vm744_vm6, %v1462_v44, %v6305_v55  ;;  %v1493_v16 = vsel %vm744_vm6, %v6305_v55, %v1462_v44 }
 0x3f7   : > { %v1534_v51 = vpack.c.bf16 %v1531_v49, %v1532_v53  ;;  %v1494_v27 = vpack.c.bf16 %v1492_v54, %v1493_v16 }
 0x3f8   : > { %1543 = vst.msk [vmem:[#allocation2 + $0x10] sm:$0xff] %vm650_vm4, %v1495_v50  ;;  %v4660_v56 = vpop.f32.mrb[4].mxu0 }
 0x3f9   : > { %v1428_v57 = vmax.f32 %v4660_v56, 0.0  ;;  %v1359_v58 = vpop.f32.mrb[5].mxu0  ;;  %1542 = vst.msk [vmem:[#allocation2 + $0x8] sm:$0xff] %vm650_vm4, %v1494_v27 }
 0x3fa   : > { %v1426_v60 = vmax.f32 %v1359_v58, 0.0  ;;  %1598 = vrot.lane.b32.xlu0 %v1534_v51, %s5766_s8  ;;  %v4661_v61 = vpop.f32.mrb[6].mxu0 }
 0x3fb   : > { %v1468_v62 = vrot.slane %v1428_v57, 7  ;;  %v1508_v63 = vrot.slane %v1428_v57, 1  ;;  %v1362_v0 = vpop.f32.mrb[7].mxu0  ;;  %v1457_v31 = vpack.c.bf16 %v5764_v18, %v1428_v57  ;;  %v1533_v57 = vsel %vm785_vm5, %v6247_v19, %v1502_v45 }
 0x3fc   : > { %v1466_v1 = vrot.slane %v1426_v60, 7  ;;  %v1506_v3 = vrot.slane %v1426_v60, 1  ;;  %v1456_v4 = vpack.c.bf16 %v5764_v18, %v1426_v60 }
 0x3fd   : > { %v1486_v5 = vsel %vm744_vm6, %v1468_v62, %v6305_v55  ;;  %v1487_v6 = vsel %vm744_vm6, %v6305_v55, %v1468_v62  ;;  %v1527_v8 = vsel %vm785_vm5, %v6247_v19, %v1508_v63  ;;  %v1526_v37 = vsel %vm785_vm5, %v1508_v63, %v6247_v19 }
 0x3fe   : > { %v1497_v9 = vpack.c.bf16 %v1486_v5, %v1487_v6  ;;  %v1488_v10 = vsel %vm744_vm6, %v1466_v1, %v6305_v55  ;;  %v1489_v11 = vsel %vm744_vm6, %v6305_v55, %v1466_v1  ;;  %1562 = vrot.lane.b32.xlu0 %v1456_v4, %s5765_s7  ;;  %v1529_v12 = vsel %vm785_vm5, %v6247_v19, %v1506_v3 }
 0x3ff   : > { %v1496_v13 = vpack.c.bf16 %v1488_v10, %v1489_v11  ;;  %v1535_v14 = vpack.c.bf16 %v1529_v12, %v1530_v7  ;;  %v1528_v15 = vsel %vm785_vm5, %v1506_v3, %v6247_v19 }
 0x400   : > { %1545 = vst.msk [vmem:[#allocation2 + $0x20] sm:$0xff] %vm650_vm4, %v1497_v9  ;;  %v4664_v17 = vpop.f32.mrb[8].mxu0  ;;  %v1536_v20 = vpack.c.bf16 %v1527_v8, %v1528_v15 }
 0x401   : > { %1544 = vst.msk [vmem:[#allocation2 + $0x18] sm:$0xff] %vm650_vm4, %v1496_v13  ;;  %v1432_v22 = vmax.f32 %v4664_v17, 0.0  ;;  %1600 = vrot.lane.b32.xlu1 %v1535_v14, %s5766_s8  ;;  %v1375_v23 = vpop.f32.mrb[9].mxu0 }
 0x402   : > { %v1430_v24 = vmax.f32 %v1375_v23, 0.0  ;;  %1602 = vrot.lane.b32.xlu0 %v1536_v20, %s5766_s8  ;;  %v4665_v25 = vpop.f32.mrb[10].mxu0 }
 0x403   : > { %v1472_v26 = vrot.slane %v1432_v22, 7  ;;  %v1512_v28 = vrot.slane %v1432_v22, 1  ;;  %v1378_v30 = vpop.f32.mrb[11].mxu0  ;;  %v1459_v27 = vpack.c.bf16 %v5764_v18, %v1432_v22  ;;  %v5288_v25 = vld [vmem:[#allocation12 + $0x8] sm:$0xff]  }
 0x404   : > { %v1470_v32 = vrot.slane %v1430_v24, 7  ;;  %v1510_v33 = vrot.slane %v1430_v24, 1  ;;  %v1458_v34 = vpack.c.bf16 %v5764_v18, %v1430_v24 }
 0x405   : > { %v1482_v35 = vsel %vm744_vm6, %v1472_v26, %v6305_v55  ;;  %v1483_v36 = vsel %vm744_vm6, %v6305_v55, %v1472_v26  ;;  %1564 = vrot.lane.b32.xlu1 %v1457_v31, %s5765_s7  ;;  %v1523_v39 = vsel %vm785_vm5, %v6247_v19, %v1512_v28  ;;  %v1522_v62 = vsel %vm785_vm5, %v1512_v28, %v6247_v19 }
 0x406   : > { %v1499_v40 = vpack.c.bf16 %v1482_v35, %v1483_v36  ;;  %v1484_v41 = vsel %vm744_vm6, %v1470_v32, %v6305_v55  ;;  %v1485_v42 = vsel %vm744_vm6, %v6305_v55, %v1470_v32  ;;  %1566 = vrot.lane.b32.xlu0 %v1458_v34, %s5765_s7  ;;  %v1525_v43 = vsel %vm785_vm5, %v6247_v19, %v1510_v33  ;;  %v5289_v32 = vld [vmem:[#allocation12 + $0x10] sm:$0xff]   ;;  %v5290_v35 = vld [vmem:[#allocation12 + $0x18] sm:$0xff]  }
 0x407   : > { %v1498_v44 = vpack.c.bf16 %v1484_v41, %v1485_v42  ;;  %v1537_v46 = vpack.c.bf16 %v1525_v43, %v1526_v37  ;;  %v1524_v47 = vsel %vm785_vm5, %v1510_v33, %v6247_v19  ;;  %v5292_v42 = vld [vmem:[#allocation12 + $0x28] sm:$0xff]  }
 0x408   : > { %1547 = vst.msk [vmem:[#allocation2 + $0x30] sm:$0xff] %vm650_vm4, %v1499_v40  ;;  %v4668_v48 = vpop.f32.mrb[12].mxu0  ;;  %v1538_v49 = vpack.c.bf16 %v1523_v39, %v1524_v47  ;;  %v5291_v40 = vld [vmem:[#allocation12 + $0x20] sm:$0xff]  }
 0x409   : > { %1546 = vst.msk [vmem:[#allocation2 + $0x28] sm:$0xff] %vm650_vm4, %v1498_v44  ;;  %v1436_v52 = vmax.f32 %v4668_v48, 0.0  ;;  %1604 = vrot.lane.b32.xlu1 %v1537_v46, %s5766_s8  ;;  %v1391_v50 = vpop.f32.mrb[13].mxu0  ;;  %v5293_v47 = vld [vmem:[#allocation12 + $0x60] sm:$0xff]  }
 0x40a   : > { %v1434_v53 = vmax.f32 %v1391_v50, 0.0  ;;  %1606 = vrot.lane.b32.xlu0 %v1538_v49, %s5766_s8  ;;  %v4669_v54 = vpop.f32.mrb[14].mxu0  ;;  %v5294_v49 = vld [vmem:[#allocation12 + $0x68] sm:$0xff]   ;;  %v5296_v50 = vld [vmem:[#allocation12 + $0x78] sm:$0xff]  }
 0x40b   : > { %v1476_v51 = vrot.slane %v1436_v52, 7  ;;  %v1516_v16 = vrot.slane %v1436_v52, 1  ;;  %v1394_v56 = vpop.f32.mrb[15].mxu0  ;;  %v1461_v11 = vpack.c.bf16 %v5764_v18, %v1436_v52  ;;  %v5295_v52 = vld [vmem:[#allocation12 + $0x70] sm:$0xff]   ;;  %v5299_v54 = vld [vmem:[#allocation14 + $0x30] sm:$0xff]  }
 0x40c   : > { %v1474_v58 = vrot.slane %v1434_v53, 7  ;;  %v1514_v60 = vrot.slane %v1434_v53, 1  ;;  %v1460_v61 = vpack.c.bf16 %v5764_v18, %v1434_v53  ;;  %v5298_v53 = vld [vmem:[#allocation12 + $0x88] sm:$0xff]   ;;  %4754 = vmatprep.subr.bf16.mxu0 %v5299_v54  ;;  %v5302_v56 = vld [vmem:[#allocation14 + $0x48] sm:$0xff]  }
 0x40d   : > { %v1478_v63 = vsel %vm744_vm6, %v1476_v51, %v6305_v55  ;;  %v1479_v38 = vsel %vm744_vm6, %v6305_v55, %v1476_v51  ;;  %1568 = vrot.lane.b32.xlu1 %v1459_v27, %s5765_s7  ;;  %v1519_v45 = vsel %vm785_vm5, %v6247_v19, %v1516_v16  ;;  %v1518_v0 = vsel %vm785_vm5, %v1516_v16, %v6247_v19  ;;  %v5300_v51 = vld [vmem:[#allocation14 + $0x38] sm:$0xff]   ;;  %v5301_v16 = vld [vmem:[#allocation14 + $0x40] sm:$0xff]   ;;  %v670_v27 = vld [vmem:[%s6188_s28 + $0x10] sm:$0xff] }
 0x40e   : > { %v1501_v1 = vpack.c.bf16 %v1478_v63, %v1479_v38  ;;  %v1480_v3 = vsel %vm744_vm6, %v1474_v58, %v6305_v55  ;;  %v1481_v4 = vsel %vm744_vm6, %v6305_v55, %v1474_v58  ;;  %1570 = vrot.lane.b32.xlu0 %v1460_v61, %s5765_s7  ;;  %v1521_v5 = vsel %vm785_vm5, %v6247_v19, %v1514_v60  ;;  %v5337_v58 = vld [vmem:[#allocation5 + $0x10] sm:$0xff]  ;;  %v668_v61 = vld [vmem:[%s6188_s28] sm:$0xff] }
 0x40f   : > { %v1500_v6 = vpack.c.bf16 %v1480_v3, %v1481_v4  ;;  %v1539_v7 = vpack.c.bf16 %v1521_v5, %v1522_v62  ;;  %v1520_v8 = vsel %vm785_vm5, %v1514_v60, %v6247_v19  ;;  %v1541_v9 = vpack.c.bf16 %v1533_v57, %v1518_v0  ;;  %4755 = vmatpush3.bf16.msra.mxu0 %v5299_v54  ;;  %v5303_v4 = vld [vmem:[#allocation14 + $0x50] sm:$0xff]  }
 0x410   : > { %1549 = vst.msk [vmem:[#allocation2 + $0x40] sm:$0xff] %vm650_vm4, %v1501_v1  ;;  %v1540_v10 = vpack.c.bf16 %v1519_v45, %v1520_v8  ;;  %4756 = vmatprep.subr.bf16.mxu0 %v5300_v51 }
 0x411   : > { %1548 = vst.msk [vmem:[#allocation2 + $0x38] sm:$0xff] %vm650_vm4, %v1500_v6  ;;  %1608 = vrot.lane.b32.xlu1 %v1539_v7, %s5766_s8 }
 0x412   : > { %1610 = vrot.lane.b32.xlu0 %v1540_v10, %s5766_s8 }
 0x413   : > { %4757 = vmatpush3.bf16.msra.mxu0 %v5300_v51 }
 0x414   : > { %4758 = vmatprep.subr.bf16.mxu0 %v5301_v16 }
 0x415   : > { %1572 = vrot.lane.b32.xlu1 %v1461_v11, %s5765_s7  ;;  %v674_v11 = vld [vmem:[%s6188_s28 + $0x30] sm:$0xff] }
 0x417   : > { %4759 = vmatpush3.bf16.msra.mxu0 %v5301_v16 }
 0x418   : > { %4760 = vmatprep.subr.bf16.mxu0 %v5302_v56 }
 0x419   : > { %1612 = vrot.lane.b32.xlu1 %v1541_v9, %s5766_s8 }
 0x41b   : > { %4761 = vmatpush3.bf16.msra.mxu0 %v5302_v56 }
 0x41c   : > { %4762 = vmatprep.subr.bf16.mxu0 %v5303_v4 }
 0x41f   : > { %4763 = vmatpush3.bf16.msra.mxu0 %v5303_v4 }
 0x467   : > { %v1561_v12 = vpop.permute.xlu1 %1560 }
 0x468   : > { %1583 = vst.msk [vmem:[#allocation2 + $0x10] sm:$0xff] %vm851_vm7, %v1561_v12  ;;  %v1559_v13 = vpop.permute.xlu0 %1558 }
 0x469   : > { %1582 = vst.msk [vmem:[#allocation2 + $0x8] sm:$0xff] %vm851_vm7, %v1559_v13 }
 0x46c   : > { %v1599_v14 = vpop.permute.xlu0 %1598 }
 0x46d   : > { %1622 = vst.msk [vmem:[#allocation2 + $0x8] sm:$0xff] %vm892_vm8, %v1599_v14  ;;  %v5339_v14 = vld [vmem:[#allocation5 + $0x30] sm:$0xff] }
 0x470   : > { %v1563_v15 = vpop.permute.xlu0 %1562 }
 0x471   : > { %1584 = vst.msk [vmem:[#allocation2 + $0x18] sm:$0xff] %vm851_vm7, %v1563_v15 }
 0x473   : > { %v1601_v17 = vpop.permute.xlu1 %1600 }
 0x474   : > { %1623 = vst.msk [vmem:[#allocation2 + $0x10] sm:$0xff] %vm892_vm8, %v1601_v17  ;;  %v1603_v20 = vpop.permute.xlu0 %1602  ;;  %v1631_v22 = vld [vmem:[#allocation2 + $0x8] sm:$0xff]  ;;  %v672_v17 = vld [vmem:[%s6188_s28 + $0x20] sm:$0xff] }
 0x475   : > { %1624 = vst.msk [vmem:[#allocation2 + $0x18] sm:$0xff] %vm892_vm8, %v1603_v20  ;;  %4682 = vmatprep.mubr.msk.bf16.mxu1 %vm531_vm0, %v1631_v22 }
 0x477   : > { %v1565_v23 = vpop.permute.xlu1 %1564 }
 0x478   : > { %1585 = vst.msk [vmem:[#allocation2 + $0x20] sm:$0xff] %vm851_vm7, %v1565_v23  ;;  %v1567_v24 = vpop.permute.xlu0 %1566 }
 0x479   : > { %1586 = vst.msk [vmem:[#allocation2 + $0x28] sm:$0xff] %vm851_vm7, %v1567_v24  ;;  %v5304_v24 = vld [vmem:[#allocation14 + $0x58] sm:$0xff]  }
 0x47a   : > { %4764 = vmatprep.subr.bf16.mxu0 %v5304_v24 }
 0x47b   : > { %v1605_v26 = vpop.permute.xlu1 %1604  ;;  %v6641_v28 = vld [vmem:[#allocation2 + $0x10] sm:$0xff]  ;;  %4765 = vmatpush3.bf16.msra.mxu0 %v5304_v24 }
 0x47c   : > { %1625 = vst.msk [vmem:[#allocation2 + $0x20] sm:$0xff] %vm892_vm8, %v1605_v26  ;;  %4683 = vmatmul.mubr.msk.bf16.vlgmr.msra.gmra.mrb[0].mxu1 %vm531_vm0, %v6641_v28  ;;  %v1607_v30 = vpop.permute.xlu0 %1606  ;;  %v6646_v31 = vld [vmem:[#allocation2 + $0x18] sm:$0xff] }
 0x47d   : > { %4699 = vmatpush3.bf16.msra.mxu1 %v6522_v59  ;;  %1626 = vst.msk [vmem:[#allocation2 + $0x28] sm:$0xff] %vm892_vm8, %v1607_v30  ;;  %4686 = vmatprep.mubr.msk.bf16.mxu1 %vm531_vm0, %v6646_v31 }
 0x47e   : > { %4700 = vmatprep.subr.bf16.mxu1 %v5288_v25 }
 0x47f   : > { %v1569_v33 = vpop.permute.xlu1 %1568 }
 0x480   : > { %1587 = vst.msk [vmem:[#allocation2 + $0x30] sm:$0xff] %vm851_vm7, %v1569_v33  ;;  %v1571_v34 = vpop.permute.xlu0 %1570 }
 0x481   : > { %1588 = vst.msk [vmem:[#allocation2 + $0x38] sm:$0xff] %vm851_vm7, %v1571_v34  ;;  %4701 = vmatpush3.bf16.msra.mxu1 %v5288_v25  ;;  %v5340_v25 = vld [vmem:[#allocation5 + $0x20] sm:$0xff] }
 0x482   : > { %4702 = vmatprep.subr.bf16.mxu1 %v5289_v32 }
 0x483   : > { %v1609_v36 = vpop.permute.xlu1 %1608  ;;  %v1634_v37 = vld [vmem:[#allocation2 + $0x20] sm:$0xff] }
 0x484   : > { %1627 = vst.msk [vmem:[#allocation2 + $0x30] sm:$0xff] %vm892_vm8, %v1609_v36  ;;  %4687 = vmatmul.mubr.msk.bf16.gmra.mrb[4].mxu1 %vm531_vm0, %v1634_v37  ;;  %v1611_v59 = vpop.permute.xlu0 %1610  ;;  %v1635_v39 = vld [vmem:[#allocation2 + $0x28] sm:$0xff] }
 0x485   : > { %1628 = vst.msk [vmem:[#allocation2 + $0x38] sm:$0xff] %vm892_vm8, %v1611_v59  ;;  %4690 = vmatprep.mubr.msk.bf16.mxu1 %vm531_vm0, %v1635_v39  ;;  %4703 = vmatpush3.bf16.msra.mxu1 %v5289_v32 }
 0x486   : > { %4704 = vmatprep.subr.bf16.mxu1 %v5290_v35 }
 0x487   : > { %v1573_v41 = vpop.permute.xlu1 %1572 }
 0x488   : > { %1589 = vst.msk [vmem:[#allocation2 + $0x40] sm:$0xff] %vm851_vm7, %v1573_v41  ;;  %v6738_v41 = vld [vmem:[#allocation14] sm:$0xff]  }
 0x489   : > { %4705 = vmatpush3.bf16.msra.mxu1 %v5290_v35  ;;  %4782 = vmatprep.subr.bf16.mxu0 %v6738_v41 }
 0x48a   : > { %4706 = vmatprep.subr.bf16.mxu1 %v5291_v40 }
 0x48b   : > { %v1613_v43 = vpop.permute.xlu1 %1612  ;;  %v1636_v44 = vld [vmem:[#allocation2 + $0x30] sm:$0xff] }
 0x48c   : > { %1629 = vst.msk [vmem:[#allocation2 + $0x40] sm:$0xff] %vm892_vm8, %v1613_v43  ;;  %4691 = vmatmul.mubr.msk.bf16.gmra.mrb[8].mxu1 %vm531_vm0, %v1636_v44  ;;  %v1637_v46 = vld [vmem:[#allocation2 + $0x38] sm:$0xff] }
 0x48d   : > { %4694 = vmatprep.mubr.msk.bf16.mxu1 %vm531_vm0, %v1637_v46  ;;  %4707 = vmatpush3.bf16.msra.mxu1 %v5291_v40 }
 0x48e   : > { %4708 = vmatprep.subr.bf16.mxu1 %v5292_v42 }
 0x491   : > { %4709 = vmatpush3.bf16.msra.mxu1 %v5292_v42 }
 0x492   : > { %4726 = vmatprep.subr.bf16.mxu1 %v5293_v47 }
 0x493   : > { %v1650_v48 = vld [vmem:[#allocation2 + $0x40] sm:$0xff] }
 0x494   : > { %4695 = vmatmul.mubr.msk.bf16.gmra.mrb[12].mxu1 %vm531_vm0, %v1650_v48 }
 0x495   : > { %4710 = vmatprep.mubr.msk.bf16.mxu1 %vm531_vm0, %v6465_v21  ;;  %v5297_v21 = vld [vmem:[#allocation12 + $0x80] sm:$0xff]  }
 0x49c   : > { %4711 = vmatmul.mubr.msk.bf16.vlgmr.msra.gmra.mrb[0].mxu1 %vm531_vm0, %v1631_v22 }
 0x49d   : > { %4727 = vmatpush3.bf16.msra.mxu1 %v5293_v47  ;;  %4714 = vmatprep.mubr.msk.bf16.mxu1 %vm531_vm0, %v6641_v28 }
 0x49e   : > { %4728 = vmatprep.subr.bf16.mxu1 %v5294_v49 }
 0x4a1   : > { %4729 = vmatpush3.bf16.msra.mxu1 %v5294_v49 }
 0x4a2   : > { %4730 = vmatprep.subr.bf16.mxu1 %v5295_v52 }
 0x4a4   : > { %4715 = vmatmul.mubr.msk.bf16.gmra.mrb[4].mxu1 %vm531_vm0, %v6646_v31 }
 0x4a5   : > { %4718 = vmatprep.mubr.msk.bf16.mxu1 %vm531_vm0, %v1634_v37  ;;  %4731 = vmatpush3.bf16.msra.mxu1 %v5295_v52 }
 0x4a6   : > { %4732 = vmatprep.subr.bf16.mxu1 %v5296_v50 }
 0x4a9   : > { %4733 = vmatpush3.bf16.msra.mxu1 %v5296_v50  ;;  %v5341_v50 = vld [vmem:[#allocation5 + $0x50] sm:$0xff] }
 0x4aa   : > { %4734 = vmatprep.subr.bf16.mxu1 %v5297_v21 }
 0x4ac   : > { %4719 = vmatmul.mubr.msk.bf16.gmra.mrb[8].mxu1 %vm531_vm0, %v1635_v39 }
 0x4ad   : > { %4722 = vmatprep.mubr.msk.bf16.mxu1 %vm531_vm0, %v1636_v44  ;;  %4735 = vmatpush3.bf16.msra.mxu1 %v5297_v21 }
 0x4ae   : > { %4736 = vmatprep.subr.bf16.mxu1 %v5298_v53 }
 0x4b1   : > { %4737 = vmatpush3.bf16.msra.mxu1 %v5298_v53  ;;  %v676_v53 = vld [vmem:[%s6188_s28 + $0x40] sm:$0xff] }
 0x4b4   : > { %4723 = vmatmul.mubr.msk.bf16.gmra.mrb[12].mxu1 %vm531_vm0, %v1637_v46 }
 0x4b5   : > { %4738 = vmatprep.mubr.msk.bf16.mxu1 %vm531_vm0, %v6641_v28 }
 0x4bc   : > { %4739 = vmatmul.mubr.msk.bf16.vlgmr.msra.gmra.mrb[0].mxu1 %vm531_vm0, %v6646_v31 }
 0x4bd   : > { %4742 = vmatprep.mubr.msk.bf16.mxu1 %vm531_vm0, %v1634_v37 }
 0x4c4   : > { %4743 = vmatmul.mubr.msk.bf16.gmra.mrb[4].mxu1 %vm531_vm0, %v1635_v39 }
 0x4c5   : > { %4746 = vmatprep.mubr.msk.bf16.mxu1 %vm531_vm0, %v1636_v44 }
 0x4cc   : > { %4747 = vmatmul.mubr.msk.bf16.gmra.mrb[8].mxu1 %vm531_vm0, %v1637_v46 }
 0x4cd   : > { %4750 = vmatprep.mubr.msk.bf16.mxu1 %vm531_vm0, %v1650_v48  ;;  %v678_v48 = vld [vmem:[%s6188_s28 + $0x50] sm:$0xff] }
 0x4d4   : > { %4751 = vmatmul.mubr.msk.bf16.gmra.mrb[12].mxu1 %vm531_vm0, %v6488_v29  ;;  %v5338_v29 = vld [vmem:[#allocation5] sm:$0xff] }
 0x58f   : > { %v4740_v57 = vpop.f32.mrb[0].mxu1 }
 0x590   : > { %v2153_v60 = vadd.f32 %v5337_v58, %v4740_v57  ;;  %v2072_v62 = vpop.f32.mrb[1].mxu1 }
 0x591   : > { %v2151_v63 = vadd.f32 %v5338_v29, %v2072_v62  ;;  %v6687_v38 = vpop.f32.mrb[2].mxu1 }
 0x592   : > { %v6689_v45 = vadd.f32 %v2153_v60, %v670_v27  ;;  %v6691_v0 = vpop.f32.mrb[3].mxu1  ;;  %v5342_v27 = vld [vmem:[#allocation5 + $0x40] sm:$0xff] }
 0x593   : > { %v6693_v1 = vadd.f32 %v2151_v63, %v668_v61 }
 0x594   : > { %v2185_v3 = vmax.f32 %v6689_v45, 0.0 }
 0x595   : > { %v6697_v5 = vmax.f32 %v6693_v1, 0.0 }
 0x596   : > { %v2225_v6 = vrot.slane %v2185_v3, 7  ;;  %v2265_v7 = vrot.slane %v2185_v3, 1  ;;  %v2216_v8 = vpack.c.bf16 %v5764_v18, %v2185_v3 }
 0x597   : > { %v2223_v9 = vrot.slane %v6697_v5, 7  ;;  %v2263_v10 = vrot.slane %v6697_v5, 1  ;;  %v4744_v12 = vpop.f32.mrb[4].mxu1  ;;  %v2215_v13 = vpack.c.bf16 %v5764_v18, %v6697_v5 }
 0x598   : > { %v2157_v15 = vadd.f32 %v5339_v14, %v4744_v12  ;;  %2321 = vrot.lane.b32.xlu1 %v2216_v8, %s5765_s7  ;;  %v2088_v20 = vpop.f32.mrb[5].mxu1  ;;  %v2292_v22 = vsel %vm785_vm5, %v6247_v19, %v2265_v7  ;;  %v2251_v23 = vsel %vm744_vm6, %v2225_v6, %v6305_v55  ;;  %v2252_v31 = vsel %vm744_vm6, %v6305_v55, %v2225_v6 }
 0x599   : > { %v2155_v26 = vadd.f32 %v5340_v25, %v2088_v20  ;;  %2319 = vrot.lane.b32.xlu0 %v2215_v13, %s5765_s7  ;;  %v6714_v28 = vpop.f32.mrb[6].mxu1  ;;  %v2293_v30 = vsel %vm785_vm5, %v2263_v10, %v6247_v19  ;;  %v2256_v35 = vpack.c.bf16 %v2251_v23, %v2252_v31  ;;  %v2253_v37 = vsel %vm744_vm6, %v2223_v9, %v6305_v55  ;;  %v682_v23 = vld [vmem:[%s6188_s28 + $0x70] sm:$0xff]  ;;  %v680_v31 = vld [vmem:[%s6188_s28 + $0x60] sm:$0xff] }
 0x59a   : > { %v6724_v32 = vadd.f32 %v2157_v15, %v674_v11  ;;  %v6726_v33 = vpop.f32.mrb[7].mxu1  ;;  %v2295_v34 = vpack.c.bf16 %v2292_v22, %v2293_v30  ;;  %v2254_v59 = vsel %vm744_vm6, %v6305_v55, %v2223_v9  ;;  %v2291_v51 = vsel %vm785_vm5, %v2265_v7, %v6247_v19 }
 0x59b   : > { %v6728_v36 = vadd.f32 %v2155_v26, %v672_v17  ;;  %2304 = vst.msk [vmem:[#allocation2 + $0x10] sm:$0xff] %vm650_vm4, %v2256_v35  ;;  %v2255_v40 = vpack.c.bf16 %v2253_v37, %v2254_v59  ;;  %v5343_v26 = vld [vmem:[#allocation5 + $0x70] sm:$0xff] }
 0x59c   : > { %v2189_v39 = vmax.f32 %v6724_v32, 0.0 }
 0x59d   : > { %v2187_v42 = vmax.f32 %v6728_v36, 0.0  ;;  %2359 = vrot.lane.b32.xlu0 %v2295_v34, %s5766_s8  ;;  %2303 = vst.msk [vmem:[#allocation2 + $0x8] sm:$0xff] %vm650_vm4, %v2255_v40 }
 0x59e   : > { %v2229_v43 = vrot.slane %v2189_v39, 7  ;;  %v2269_v44 = vrot.slane %v2189_v39, 1  ;;  %v2218_v17 = vpack.c.bf16 %v5764_v18, %v2189_v39  ;;  %v5344_v39 = vld [vmem:[#allocation5 + $0x60] sm:$0xff] }
 0x59f   : > { %v2227_v46 = vrot.slane %v2187_v42, 7  ;;  %v2267_v47 = vrot.slane %v2187_v42, 1  ;;  %v4748_v49 = vpop.f32.mrb[8].mxu1  ;;  %v2217_v52 = vpack.c.bf16 %v5764_v18, %v2187_v42 }
 0x5a0   : > { %v2161_v21 = vadd.f32 %v5341_v50, %v4748_v49  ;;  %v2104_v54 = vpop.f32.mrb[9].mxu1  ;;  %v2288_v16 = vsel %vm785_vm5, %v6247_v19, %v2269_v44  ;;  %v2247_v56 = vsel %vm744_vm6, %v2229_v43, %v6305_v55  ;;  %v2248_v8 = vsel %vm744_vm6, %v6305_v55, %v2229_v43 }
 0x5a1   : > { %v2159_v57 = vadd.f32 %v5342_v27, %v2104_v54  ;;  %2323 = vrot.lane.b32.xlu0 %v2217_v52, %s5765_s7  ;;  %v6757_v58 = vpop.f32.mrb[10].mxu1  ;;  %v2290_v60 = vsel %vm785_vm5, %v6247_v19, %v2267_v47  ;;  %v2289_v61 = vsel %vm785_vm5, %v2267_v47, %v6247_v19  ;;  %v2249_v62 = vsel %vm744_vm6, %v2227_v46, %v6305_v55 }
 0x5a2   : > { %v6768_v29 = vadd.f32 %v2161_v21, %v678_v48  ;;  %v6770_v63 = vpop.f32.mrb[11].mxu1  ;;  %v2296_v3 = vpack.c.bf16 %v2290_v60, %v2291_v51  ;;  %v2297_v4 = vpack.c.bf16 %v2288_v16, %v2289_v61  ;;  %v2250_v7 = vsel %vm744_vm6, %v6305_v55, %v2227_v46 }
 0x5a3   : > { %v6772_v6 = vadd.f32 %v2159_v57, %v676_v53  ;;  %v2257_v11 = vpack.c.bf16 %v2249_v62, %v2250_v7  ;;  %v2258_v12 = vpack.c.bf16 %v2247_v56, %v2248_v8  ;;  %v2287_v35 = vsel %vm785_vm5, %v2269_v44, %v6247_v19 }
 0x5a4   : > { %v2193_v9 = vmax.f32 %v6768_v29, 0.0  ;;  %2361 = vrot.lane.b32.xlu1 %v2296_v3, %s5766_s8 }
 0x5a5   : > { %v2191_v13 = vmax.f32 %v6772_v6, 0.0  ;;  %2363 = vrot.lane.b32.xlu0 %v2297_v4, %s5766_s8  ;;  %2305 = vst.msk [vmem:[#allocation2 + $0x18] sm:$0xff] %vm650_vm4, %v2257_v11  ;;  %2306 = vst.msk [vmem:[#allocation2 + $0x20] sm:$0xff] %vm650_vm4, %v2258_v12 }
 0x5a6   : > { %v2233_v14 = vrot.slane %v2193_v9, 7  ;;  %v2273_v15 = vrot.slane %v2193_v9, 1  ;;  %v2220_v60 = vpack.c.bf16 %v5764_v18, %v2193_v9 }
 0x5a7   : > { %v2231_v20 = vrot.slane %v2191_v13, 7  ;;  %v2271_v22 = vrot.slane %v2191_v13, 1  ;;  %v4752_v24 = vpop.f32.mrb[12].mxu1  ;;  %v2219_v25 = vpack.c.bf16 %v5764_v18, %v2191_v13 }
 0x5a8   : > { %v2165_v30 = vadd.f32 %v5343_v26, %v4752_v24  ;;  %2325 = vrot.lane.b32.xlu1 %v2218_v17, %s5765_s7  ;;  %v2120_v34 = vpop.f32.mrb[13].mxu1  ;;  %v2284_v37 = vsel %vm785_vm5, %v6247_v19, %v2273_v15  ;;  %v2243_v59 = vsel %vm744_vm6, %v2233_v14, %v6305_v55  ;;  %v2244_v53 = vsel %vm744_vm6, %v6305_v55, %v2233_v14 }
 0x5a9   : > { %v2163_v40 = vadd.f32 %v5344_v39, %v2120_v34  ;;  %2327 = vrot.lane.b32.xlu0 %v2219_v25, %s5765_s7  ;;  %v6801_v42 = vpop.f32.mrb[14].mxu1  ;;  %v2286_v43 = vsel %vm785_vm5, %v6247_v19, %v2271_v22  ;;  %v2285_v44 = vsel %vm785_vm5, %v2271_v22, %v6247_v19  ;;  %v2245_v46 = vsel %vm744_vm6, %v2231_v20, %v6305_v55 }
 0x5aa   : > { %v6812_v47 = vadd.f32 %v2165_v30, %v682_v23  ;;  %v6814_v48 = vpop.f32.mrb[15].mxu1  ;;  %v2298_v49 = vpack.c.bf16 %v2286_v43, %v2287_v35  ;;  %v2299_v52 = vpack.c.bf16 %v2284_v37, %v2285_v44  ;;  %v2246_v21 = vsel %vm744_vm6, %v6305_v55, %v2231_v20 }
 0x5ab   : > { %v6816_v50 = vadd.f32 %v2163_v40, %v680_v31  ;;  %v2259_v51 = vpack.c.bf16 %v2245_v46, %v2246_v21  ;;  %v2260_v16 = vpack.c.bf16 %v2243_v59, %v2244_v53  ;;  %v2283_v11 = vsel %vm785_vm5, %v2273_v15, %v6247_v19  ;;  %v5306_v40 = vld [vmem:[#allocation14 + $0x8] sm:$0xff]  }
 0x5ac   : > { %v2197_v54 = vmax.f32 %v6812_v47, 0.0  ;;  %2365 = vrot.lane.b32.xlu1 %v2298_v49, %s5766_s8  ;;  %v2294_v25 = vsel %vm785_vm5, %v6247_v19, %v2263_v10 }
 0x5ad   : > { %v2195_v56 = vmax.f32 %v6816_v50, 0.0  ;;  %2367 = vrot.lane.b32.xlu0 %v2299_v52, %s5766_s8  ;;  %2307 = vst.msk [vmem:[#allocation2 + $0x28] sm:$0xff] %vm650_vm4, %v2259_v51  ;;  %2308 = vst.msk [vmem:[#allocation2 + $0x30] sm:$0xff] %vm650_vm4, %v2260_v16  ;;  %v5307_v52 = vld [vmem:[#allocation14 + $0x10] sm:$0xff]  }
 0x5ae   : > { %v2237_v27 = vrot.slane %v2197_v54, 7  ;;  %v2277_v57 = vrot.slane %v2197_v54, 1  ;;  %v2222_v15 = vpack.c.bf16 %v5764_v18, %v2197_v54  ;;  %v5308_v54 = vld [vmem:[#allocation14 + $0x18] sm:$0xff]  }
 0x5af   : > { %v2235_v61 = vrot.slane %v2195_v56, 7  ;;  %v2275_v62 = vrot.slane %v2195_v56, 1  ;;  %v2221_v3 = vpack.c.bf16 %v5764_v18, %v2195_v56 }
 0x5b0   : > { %2329 = vrot.lane.b32.xlu1 %v2220_v60, %s5765_s7  ;;  %v2280_v4 = vsel %vm785_vm5, %v6247_v19, %v2277_v57  ;;  %v2239_v7 = vsel %vm744_vm6, %v2237_v27, %v6305_v55  ;;  %v2240_v8 = vsel %vm744_vm6, %v6305_v55, %v2237_v27  ;;  %v2279_v24 = vsel %vm785_vm5, %v2277_v57, %v6247_v19  ;;  %v5309_v27 = vld [vmem:[#allocation14 + $0x20] sm:$0xff]   ;;  %v5310_v60 = vld [vmem:[#allocation14 + $0x28] sm:$0xff]  }
 0x5b1   : > { %2331 = vrot.lane.b32.xlu0 %v2221_v3, %s5765_s7  ;;  %v2282_v9 = vsel %vm785_vm5, %v6247_v19, %v2275_v62  ;;  %v2281_v12 = vsel %vm785_vm5, %v2275_v62, %v6247_v19  ;;  %v2241_v13 = vsel %vm744_vm6, %v2235_v61, %v6305_v55  ;;  %v2242_v20 = vsel %vm744_vm6, %v6305_v55, %v2235_v61 }
 0x5b2   : > { %v2300_v14 = vpack.c.bf16 %v2282_v9, %v2283_v11  ;;  %v2301_v17 = vpack.c.bf16 %v2280_v4, %v2281_v12  ;;  %v2262_v22 = vpack.c.bf16 %v2239_v7, %v2240_v8  ;;  %v2261_v23 = vpack.c.bf16 %v2241_v13, %v2242_v20  ;;  %v5311_v4 = vld [vmem:[#allocation14 + $0x60] sm:$0xff]   ;;  %v6903_v7 = vld [vmem:[#allocation2] sm:$0xff]  ;;  %v5312_v9 = vld [vmem:[#allocation14 + $0x68] sm:$0xff]  }
 0x5b3   : > { %v2302_v26 = vpack.c.bf16 %v2294_v25, %v2279_v24  ;;  %v5313_v11 = vld [vmem:[#allocation14 + $0x70] sm:$0xff]   ;;  %v5314_v12 = vld [vmem:[#allocation14 + $0x78] sm:$0xff]   ;;  %v5315_v13 = vld [vmem:[#allocation14 + $0x80] sm:$0xff]  }
 0x5b4   : > { %2369 = vrot.lane.b32.xlu1 %v2300_v14, %s5766_s8  ;;  %2310 = vst.msk [vmem:[#allocation2 + $0x40] sm:$0xff] %vm650_vm4, %v2262_v22  ;;  %2309 = vst.msk [vmem:[#allocation2 + $0x38] sm:$0xff] %vm650_vm4, %v2261_v23  ;;  %v5316_v14 = vld [vmem:[#allocation14 + $0x88] sm:$0xff]   ;;  %v5317_v20 = vld [vmem:[#allocation15 + $0x30] sm:$0xff]  }
 0x5b5   : > { %2371 = vrot.lane.b32.xlu0 %v2301_v17, %s5766_s8  ;;  %v6926_v17 = vld [vmem:[#allocation2 + $0x48] sm:$0xff]  ;;  %v5318_v22 = vld [vmem:[#allocation15 + $0x38] sm:$0xff]   ;;  %4838 = vmatprep.subr.bf16.mxu1 %v5317_v20  ;;  %v5319_v23 = vld [vmem:[#allocation15 + $0x40] sm:$0xff]  }
 0x5b6   : > { %4839 = vmatpush3.bf16.msra.mxu1 %v5317_v20 }
 0x5b7   : > { %4840 = vmatprep.subr.bf16.mxu1 %v5318_v22 }
 0x5b8   : > { %2333 = vrot.lane.b32.xlu1 %v2222_v15, %s5765_s7  ;;  %v5320_v15 = vld [vmem:[#allocation15 + $0x48] sm:$0xff]  }
 0x5ba   : > { %4841 = vmatpush3.bf16.msra.mxu1 %v5318_v22 }
 0x5bb   : > { %4842 = vmatprep.subr.bf16.mxu1 %v5319_v23 }
 0x5bc   : > { %2373 = vrot.lane.b32.xlu1 %v2302_v26, %s5766_s8 }
 0x5be   : > { %4843 = vmatpush3.bf16.msra.mxu1 %v5319_v23 }
 0x5bf   : > { %4844 = vmatprep.subr.bf16.mxu1 %v5320_v15 }
 0x5c2   : > { %4845 = vmatpush3.bf16.msra.mxu1 %v5320_v15 }
 0x60a   : > { %v2322_v30 = vpop.permute.xlu1 %2321 }
 0x60b   : > { %2344 = vst.msk [vmem:[#allocation2 + $0x10] sm:$0xff] %vm851_vm7, %v2322_v30  ;;  %v2320_v31 = vpop.permute.xlu0 %2319  ;;  %v5321_v30 = vld [vmem:[#allocation15 + $0x50] sm:$0xff]  }
 0x60c   : > { %2343 = vst.msk [vmem:[#allocation2 + $0x8] sm:$0xff] %vm851_vm7, %v2320_v31  ;;  %4846 = vmatprep.subr.bf16.mxu1 %v5321_v30 }
 0x60d   : > { %4847 = vmatpush3.bf16.msra.mxu1 %v5321_v30 }
 0x60f   : > { %v2360_v34 = vpop.permute.xlu0 %2359 }
 0x610   : > { %2383 = vst.msk [vmem:[#allocation2 + $0x8] sm:$0xff] %vm892_vm8, %v2360_v34 }
 0x613   : > { %v2324_v35 = vpop.permute.xlu0 %2323 }
 0x614   : > { %2345 = vst.msk [vmem:[#allocation2 + $0x18] sm:$0xff] %vm851_vm7, %v2324_v35 }
 0x616   : > { %v2362_v5 = vpop.permute.xlu1 %2361 }
 0x617   : > { %2384 = vst.msk [vmem:[#allocation2 + $0x10] sm:$0xff] %vm892_vm8, %v2362_v5  ;;  %v2364_v37 = vpop.permute.xlu0 %2363  ;;  %v2392_v10 = vld [vmem:[#allocation2 + $0x8] sm:$0xff] }
 0x618   : > { %2385 = vst.msk [vmem:[#allocation2 + $0x18] sm:$0xff] %vm892_vm8, %v2364_v37  ;;  %4766 = vmatprep.mubr.msk.bf16.mxu0 %vm531_vm0, %v2392_v10 }
 0x61a   : > { %v2326_v59 = vpop.permute.xlu1 %2325 }
 0x61b   : > { %2346 = vst.msk [vmem:[#allocation2 + $0x20] sm:$0xff] %vm851_vm7, %v2326_v59  ;;  %v2328_v39 = vpop.permute.xlu0 %2327 }
 0x61c   : > { %2347 = vst.msk [vmem:[#allocation2 + $0x28] sm:$0xff] %vm851_vm7, %v2328_v39 }
 0x61e   : > { %v2366_v43 = vpop.permute.xlu1 %2365  ;;  %v6882_v44 = vld [vmem:[#allocation2 + $0x10] sm:$0xff] }
 0x61f   : > { %2386 = vst.msk [vmem:[#allocation2 + $0x20] sm:$0xff] %vm892_vm8, %v2366_v43  ;;  %4767 = vmatmul.mubr.msk.bf16.vlgmr.msra.gmra.mrb[16].mxu0 %vm531_vm0, %v6882_v44  ;;  %v2368_v46 = vpop.permute.xlu0 %2367  ;;  %v6887_v49 = vld [vmem:[#allocation2 + $0x18] sm:$0xff] }
 0x620   : > { %4783 = vmatpush3.bf16.msra.mxu0 %v6738_v41  ;;  %2387 = vst.msk [vmem:[#allocation2 + $0x28] sm:$0xff] %vm892_vm8, %v2368_v46  ;;  %4770 = vmatprep.mubr.msk.bf16.mxu0 %vm531_vm0, %v6887_v49 }
 0x621   : > { %4784 = vmatprep.subr.bf16.mxu0 %v5306_v40 }
 0x622   : > { %v2330_v21 = vpop.permute.xlu1 %2329 }
 0x623   : > { %2348 = vst.msk [vmem:[#allocation2 + $0x30] sm:$0xff] %vm851_vm7, %v2330_v21  ;;  %v2332_v53 = vpop.permute.xlu0 %2331 }
 0x624   : > { %2349 = vst.msk [vmem:[#allocation2 + $0x38] sm:$0xff] %vm851_vm7, %v2332_v53  ;;  %4785 = vmatpush3.bf16.msra.mxu0 %v5306_v40 }
 0x625   : > { %4786 = vmatprep.subr.bf16.mxu0 %v5307_v52 }
 0x626   : > { %v2370_v51 = vpop.permute.xlu1 %2369  ;;  %v2395_v16 = vld [vmem:[#allocation2 + $0x20] sm:$0xff] }
 0x627   : > { %2388 = vst.msk [vmem:[#allocation2 + $0x30] sm:$0xff] %vm892_vm8, %v2370_v51  ;;  %4771 = vmatmul.mubr.msk.bf16.gmra.mrb[20].mxu0 %vm531_vm0, %v2395_v16  ;;  %v2372_v41 = vpop.permute.xlu0 %2371  ;;  %v2396_v56 = vld [vmem:[#allocation2 + $0x28] sm:$0xff] }
 0x628   : > { %2389 = vst.msk [vmem:[#allocation2 + $0x38] sm:$0xff] %vm892_vm8, %v2372_v41  ;;  %4774 = vmatprep.mubr.msk.bf16.mxu0 %vm531_vm0, %v2396_v56  ;;  %4787 = vmatpush3.bf16.msra.mxu0 %v5307_v52 }
 0x629   : > { %4788 = vmatprep.subr.bf16.mxu0 %v5308_v54 }
 0x62a   : > { %v2334_v57 = vpop.permute.xlu1 %2333 }
 0x62b   : > { %2350 = vst.msk [vmem:[#allocation2 + $0x40] sm:$0xff] %vm851_vm7, %v2334_v57  ;;  %v6960_v57 = vld [vmem:[#allocation15] sm:$0xff]  }
 0x62c   : > { %4789 = vmatpush3.bf16.msra.mxu0 %v5308_v54 }
 0x62d   : > { %4790 = vmatprep.subr.bf16.mxu0 %v5309_v27 }
 0x62e   : > { %v2374_v61 = vpop.permute.xlu1 %2373  ;;  %v2397_v62 = vld [vmem:[#allocation2 + $0x30] sm:$0xff] }
 0x62f   : > { %2390 = vst.msk [vmem:[#allocation2 + $0x40] sm:$0xff] %vm892_vm8, %v2374_v61  ;;  %4775 = vmatmul.mubr.msk.bf16.gmra.mrb[24].mxu0 %vm531_vm0, %v2397_v62  ;;  %v2398_v3 = vld [vmem:[#allocation2 + $0x38] sm:$0xff] }
 0x630   : > { %4778 = vmatprep.mubr.msk.bf16.mxu0 %vm531_vm0, %v2398_v3  ;;  %4791 = vmatpush3.bf16.msra.mxu0 %v5309_v27 }
 0x631   : > { %4792 = vmatprep.subr.bf16.mxu0 %v5310_v60 }
 0x634   : > { %4793 = vmatpush3.bf16.msra.mxu0 %v5310_v60 }
 0x635   : > { %4810 = vmatprep.subr.bf16.mxu0 %v5311_v4 }
 0x636   : > { %v2411_v8 = vld [vmem:[#allocation2 + $0x40] sm:$0xff] }
 0x637   : > { %4779 = vmatmul.mubr.msk.bf16.gmra.mrb[28].mxu0 %vm531_vm0, %v2411_v8 }
 0x638   : > { %4794 = vmatprep.mubr.msk.bf16.mxu0 %vm531_vm0, %v6903_v7 }
 0x63f   : > { %4795 = vmatmul.mubr.msk.bf16.vlgmr.msra.gmra.mrb[16].mxu0 %vm531_vm0, %v2392_v10 }
 0x640   : > { %4811 = vmatpush3.bf16.msra.mxu0 %v5311_v4  ;;  %4798 = vmatprep.mubr.msk.bf16.mxu0 %vm531_vm0, %v6882_v44 }
 0x641   : > { %4812 = vmatprep.subr.bf16.mxu0 %v5312_v9 }
 0x644   : > { %4813 = vmatpush3.bf16.msra.mxu0 %v5312_v9 }
 0x645   : > { %4814 = vmatprep.subr.bf16.mxu0 %v5313_v11 }
 0x647   : > { %4799 = vmatmul.mubr.msk.bf16.gmra.mrb[20].mxu0 %vm531_vm0, %v6887_v49 }
 0x648   : > { %4802 = vmatprep.mubr.msk.bf16.mxu0 %vm531_vm0, %v2395_v16  ;;  %4815 = vmatpush3.bf16.msra.mxu0 %v5313_v11 }
 0x649   : > { %4816 = vmatprep.subr.bf16.mxu0 %v5314_v12 }
 0x64c   : > { %4817 = vmatpush3.bf16.msra.mxu0 %v5314_v12 }
 0x64d   : > { %4818 = vmatprep.subr.bf16.mxu0 %v5315_v13 }
 0x64f   : > { %4803 = vmatmul.mubr.msk.bf16.gmra.mrb[24].mxu0 %vm531_vm0, %v2396_v56 }
 0x650   : > { %4806 = vmatprep.mubr.msk.bf16.mxu0 %vm531_vm0, %v2397_v62  ;;  %4819 = vmatpush3.bf16.msra.mxu0 %v5315_v13 }
 0x651   : > { %4820 = vmatprep.subr.bf16.mxu0 %v5316_v14 }
 0x654   : > { %4821 = vmatpush3.bf16.msra.mxu0 %v5316_v14 }
 0x657   : > { %4807 = vmatmul.mubr.msk.bf16.gmra.mrb[28].mxu0 %vm531_vm0, %v2398_v3 }
 0x658   : > { %4822 = vmatprep.mubr.msk.bf16.mxu0 %vm531_vm0, %v6882_v44 }
 0x65f   : > { %4823 = vmatmul.mubr.msk.bf16.vlgmr.msra.gmra.mrb[16].mxu0 %vm531_vm0, %v6887_v49  ;;  %v5322_v49 = vld [vmem:[#allocation15 + $0x58] sm:$0xff]  }
 0x660   : > { %4826 = vmatprep.mubr.msk.bf16.mxu0 %vm531_vm0, %v2395_v16  ;;  %4848 = vmatprep.subr.bf16.mxu1 %v5322_v49 }
 0x661   : > { %4849 = vmatpush3.bf16.msra.mxu1 %v5322_v49 }
 0x662   : > { %4866 = vmatprep.subr.bf16.mxu1 %v6960_v57 }
 0x667   : > { %4827 = vmatmul.mubr.msk.bf16.gmra.mrb[20].mxu0 %vm531_vm0, %v2396_v56 }
 0x668   : > { %4830 = vmatprep.mubr.msk.bf16.mxu0 %vm531_vm0, %v2397_v62 }
 0x66f   : > { %4831 = vmatmul.mubr.msk.bf16.gmra.mrb[24].mxu0 %vm531_vm0, %v2398_v3 }
 0x670   : > { %4834 = vmatprep.mubr.msk.bf16.mxu0 %vm531_vm0, %v2411_v8 }
 0x677   : > { %4835 = vmatmul.mubr.msk.bf16.gmra.mrb[28].mxu0 %vm531_vm0, %v6926_v17 }
 0x732   : > { %v4824_v24 = vpop.f32.mrb[16].mxu0 }
 0x733   : > { %v2914_v25 = vmax.f32 %v4824_v24, 0.0  ;;  %v2833_v26 = vpop.f32.mrb[17].mxu0 }
 0x734   : > { %v6930_v31 = vmax.f32 %v2833_v26, 0.0  ;;  %v4825_v34 = vpop.f32.mrb[18].mxu0 }
 0x735   : > { %v2954_v35 = vrot.slane %v2914_v25, 7  ;;  %v2994_v5 = vrot.slane %v2914_v25, 1  ;;  %v2836_v37 = vpop.f32.mrb[19].mxu0  ;;  %v2945_v10 = vpack.c.bf16 %v5764_v18, %v2914_v25 }
 0x736   : > { %v2952_v59 = vrot.slane %v6930_v31, 7  ;;  %v2992_v39 = vrot.slane %v6930_v31, 1  ;;  %v2944_v40 = vpack.c.bf16 %v5764_v18, %v6930_v31 }
 0x737   : > { %v2980_v43 = vsel %vm744_vm6, %v2954_v35, %v6305_v55  ;;  %v2981_v44 = vsel %vm744_vm6, %v6305_v55, %v2954_v35  ;;  %3050 = vrot.lane.b32.xlu1 %v2945_v10, %s5765_s7  ;;  %v3021_v46 = vsel %vm785_vm5, %v6247_v19, %v2994_v5  ;;  %v3020_v14 = vsel %vm785_vm5, %v2994_v5, %v6247_v19 }
 0x738   : > { %v2985_v52 = vpack.c.bf16 %v2980_v43, %v2981_v44  ;;  %3048 = vrot.lane.b32.xlu0 %v2944_v40, %s5765_s7  ;;  %v3022_v21 = vsel %vm785_vm5, %v2992_v39, %v6247_v19  ;;  %v2982_v53 = vsel %vm744_vm6, %v2952_v59, %v6305_v55  ;;  %v2983_v51 = vsel %vm744_vm6, %v6305_v55, %v2952_v59 }
 0x739   : > { %v3024_v54 = vpack.c.bf16 %v3021_v46, %v3022_v21  ;;  %v2984_v41 = vpack.c.bf16 %v2982_v53, %v2983_v51 }
 0x73a   : > { %3033 = vst.msk [vmem:[#allocation2 + $0x10] sm:$0xff] %vm650_vm4, %v2985_v52  ;;  %v4828_v16 = vpop.f32.mrb[20].mxu0 }
 0x73b   : > { %v2918_v56 = vmax.f32 %v4828_v16, 0.0  ;;  %v2849_v27 = vpop.f32.mrb[21].mxu0  ;;  %3032 = vst.msk [vmem:[#allocation2 + $0x8] sm:$0xff] %vm650_vm4, %v2984_v41 }
 0x73c   : > { %v2916_v60 = vmax.f32 %v2849_v27, 0.0  ;;  %3088 = vrot.lane.b32.xlu0 %v3024_v54, %s5766_s8  ;;  %v4829_v61 = vpop.f32.mrb[22].mxu0 }
 0x73d   : > { %v2958_v62 = vrot.slane %v2918_v56, 7  ;;  %v2998_v3 = vrot.slane %v2918_v56, 1  ;;  %v2852_v4 = vpop.f32.mrb[23].mxu0  ;;  %v2947_v46 = vpack.c.bf16 %v5764_v18, %v2918_v56 }
 0x73e   : > { %v2956_v8 = vrot.slane %v2916_v60, 7  ;;  %v2996_v9 = vrot.slane %v2916_v60, 1  ;;  %v2946_v11 = vpack.c.bf16 %v5764_v18, %v2916_v60 }
 0x73f   : > { %v2976_v12 = vsel %vm744_vm6, %v2958_v62, %v6305_v55  ;;  %v2977_v13 = vsel %vm744_vm6, %v6305_v55, %v2958_v62  ;;  %v3017_v20 = vsel %vm785_vm5, %v6247_v19, %v2998_v3  ;;  %v3016_v51 = vsel %vm785_vm5, %v2998_v3, %v6247_v19 }
 0x740   : > { %v2987_v22 = vpack.c.bf16 %v2976_v12, %v2977_v13  ;;  %v2978_v23 = vsel %vm744_vm6, %v2956_v8, %v6305_v55  ;;  %v2979_v15 = vsel %vm744_vm6, %v6305_v55, %v2956_v8  ;;  %3052 = vrot.lane.b32.xlu0 %v2946_v11, %s5765_s7  ;;  %v3019_v24 = vsel %vm785_vm5, %v6247_v19, %v2996_v9 }
 0x741   : > { %v2986_v25 = vpack.c.bf16 %v2978_v23, %v2979_v15  ;;  %v3025_v26 = vpack.c.bf16 %v3019_v24, %v3020_v14  ;;  %v3018_v30 = vsel %vm785_vm5, %v2996_v9, %v6247_v19  ;;  %v3023_v15 = vsel %vm785_vm5, %v6247_v19, %v2992_v39 }
 0x742   : > { %3035 = vst.msk [vmem:[#allocation2 + $0x20] sm:$0xff] %vm650_vm4, %v2987_v22  ;;  %v4832_v34 = vpop.f32.mrb[24].mxu0  ;;  %v3026_v35 = vpack.c.bf16 %v3017_v20, %v3018_v30 }
 0x743   : > { %3034 = vst.msk [vmem:[#allocation2 + $0x18] sm:$0xff] %vm650_vm4, %v2986_v25  ;;  %v2922_v5 = vmax.f32 %v4832_v34, 0.0  ;;  %3090 = vrot.lane.b32.xlu1 %v3025_v26, %s5766_s8  ;;  %v2865_v37 = vpop.f32.mrb[25].mxu0 }
 0x744   : > { %v2920_v10 = vmax.f32 %v2865_v37, 0.0  ;;  %3092 = vrot.lane.b32.xlu0 %v3026_v35, %s5766_s8  ;;  %v4833_v59 = vpop.f32.mrb[26].mxu0 }
 0x745   : > { %v2962_v40 = vrot.slane %v2922_v5, 7  ;;  %v3002_v43 = vrot.slane %v2922_v5, 1  ;;  %v2868_v44 = vpop.f32.mrb[27].mxu0  ;;  %v2949_v23 = vpack.c.bf16 %v5764_v18, %v2922_v5 }
 0x746   : > { %v2960_v49 = vrot.slane %v2920_v10, 7  ;;  %v3000_v52 = vrot.slane %v2920_v10, 1  ;;  %v2948_v21 = vpack.c.bf16 %v5764_v18, %v2920_v10 }
 0x747   : > { %v2972_v53 = vsel %vm744_vm6, %v2962_v40, %v6305_v55  ;;  %v2973_v54 = vsel %vm744_vm6, %v6305_v55, %v2962_v40  ;;  %3054 = vrot.lane.b32.xlu1 %v2947_v46, %s5765_s7  ;;  %v3013_v16 = vsel %vm785_vm5, %v6247_v19, %v3002_v43  ;;  %v3012_v30 = vsel %vm785_vm5, %v3002_v43, %v6247_v19 }
 0x748   : > { %v2989_v41 = vpack.c.bf16 %v2972_v53, %v2973_v54  ;;  %v2974_v56 = vsel %vm744_vm6, %v2960_v49, %v6305_v55  ;;  %v2975_v27 = vsel %vm744_vm6, %v6305_v55, %v2960_v49  ;;  %3056 = vrot.lane.b32.xlu0 %v2948_v21, %s5765_s7  ;;  %v3015_v60 = vsel %vm785_vm5, %v6247_v19, %v3000_v52 }
 0x749   : > { %v2988_v61 = vpack.c.bf16 %v2974_v56, %v2975_v27  ;;  %v3027_v62 = vpack.c.bf16 %v3015_v60, %v3016_v51  ;;  %v3014_v3 = vsel %vm785_vm5, %v3000_v52, %v6247_v19  ;;  %v7070_v52 = vld [vmem:[#allocation17] sm:$0xff]   ;;  %v5324_v56 = vld [vmem:[#allocation15 + $0x8] sm:$0xff]  }
 0x74a   : > { %3037 = vst.msk [vmem:[#allocation2 + $0x30] sm:$0xff] %vm650_vm4, %v2989_v41  ;;  %v4836_v4 = vpop.f32.mrb[28].mxu0  ;;  %v3028_v8 = vpack.c.bf16 %v3013_v16, %v3014_v3  ;;  %4922 = vmatprep.subr.bf16.mxu0 %v7070_v52  ;;  %v5325_v3 = vld [vmem:[#allocation15 + $0x10] sm:$0xff]  }
 0x74b   : > { %3036 = vst.msk [vmem:[#allocation2 + $0x28] sm:$0xff] %vm650_vm4, %v2988_v61  ;;  %v2926_v9 = vmax.f32 %v4836_v4, 0.0  ;;  %3094 = vrot.lane.b32.xlu1 %v3027_v62, %s5766_s8  ;;  %v2881_v11 = vpop.f32.mrb[29].mxu0  ;;  %4923 = vmatpush3.bf16.msra.mxu0 %v7070_v52 }
 0x74c   : > { %v2924_v12 = vmax.f32 %v2881_v11, 0.0  ;;  %3096 = vrot.lane.b32.xlu0 %v3028_v8, %s5766_s8  ;;  %v4837_v13 = vpop.f32.mrb[30].mxu0 }
 0x74d   : > { %v2966_v14 = vrot.slane %v2926_v9, 7  ;;  %v3006_v20 = vrot.slane %v2926_v9, 1  ;;  %v2884_v22 = vpop.f32.mrb[31].mxu0 }
 0x74e   : > { %v2964_v24 = vrot.slane %v2924_v12, 7  ;;  %v3004_v25 = vrot.slane %v2924_v12, 1  ;;  %v2950_v26 = vpack.c.bf16 %v5764_v18, %v2924_v12  ;;  %v5328_v22 = vld [vmem:[#allocation15 + $0x28] sm:$0xff]  }
 0x74f   : > { %v2968_v34 = vsel %vm744_vm6, %v2966_v14, %v6305_v55  ;;  %v2969_v31 = vsel %vm744_vm6, %v6305_v55, %v2966_v14  ;;  %3058 = vrot.lane.b32.xlu1 %v2949_v23, %s5765_s7  ;;  %v3009_v39 = vsel %vm785_vm5, %v6247_v19, %v3006_v20  ;;  %v3008_v35 = vsel %vm785_vm5, %v3006_v20, %v6247_v19  ;;  %v5327_v14 = vld [vmem:[#allocation15 + $0x20] sm:$0xff]  }
 0x750   : > { %v2991_v5 = vpack.c.bf16 %v2968_v34, %v2969_v31  ;;  %v2970_v37 = vsel %vm744_vm6, %v2964_v24, %v6305_v55  ;;  %v2971_v10 = vsel %vm744_vm6, %v6305_v55, %v2964_v24  ;;  %3060 = vrot.lane.b32.xlu0 %v2950_v26, %s5765_s7  ;;  %v3011_v59 = vsel %vm785_vm5, %v6247_v19, %v3004_v25  ;;  %v5331_v34 = vld [vmem:[#allocation15 + $0x70] sm:$0xff]   ;;  %v5332_v31 = vld [vmem:[#allocation15 + $0x78] sm:$0xff]  }
 0x751   : > { %v2990_v40 = vpack.c.bf16 %v2970_v37, %v2971_v10  ;;  %v3029_v43 = vpack.c.bf16 %v3011_v59, %v3012_v30  ;;  %v3010_v44 = vsel %vm785_vm5, %v3004_v25, %v6247_v19  ;;  %v3031_v46 = vpack.c.bf16 %v3023_v15, %v3008_v35  ;;  %v5329_v25 = vld [vmem:[#allocation15 + $0x60] sm:$0xff]   ;;  %v5330_v30 = vld [vmem:[#allocation15 + $0x68] sm:$0xff]   ;;  %v5336_v35 = vld [vmem:[#allocation17 + $0x8] sm:$0xff]  }
 0x752   : > { %3039 = vst.msk [vmem:[#allocation2 + $0x40] sm:$0xff] %vm650_vm4, %v2991_v5  ;;  %v3030_v49 = vpack.c.bf16 %v3009_v39, %v3010_v44  ;;  %v2951_v55 = vpack.c.bf16 %v5764_v18, %v2926_v9  ;;  %v5326_v9 = vld [vmem:[#allocation15 + $0x18] sm:$0xff]   ;;  %v5334_v39 = vld [vmem:[#allocation15 + $0x88] sm:$0xff]   ;;  %4924 = vmatprep.subr.bf16.mxu0 %v5336_v35 }
 0x753   : > { %3038 = vst.msk [vmem:[#allocation2 + $0x38] sm:$0xff] %vm650_vm4, %v2990_v40  ;;  %3098 = vrot.lane.b32.xlu1 %v3029_v43, %s5766_s8  ;;  %4925 = vmatpush3.bf16.msra.mxu0 %v5336_v35  ;;  %v655_v5 = vld [vmem:[#allocation5 + $0x18] sm:$0xff]  ;;  %v653_v37 = vld [vmem:[#allocation5 + $0x8] sm:$0xff] }
 0x754   : > { %3100 = vrot.lane.b32.xlu0 %v3030_v49, %s5766_s8  ;;  %v2154_v10 = vadd.f32 %v6687_v38, %v655_v5  ;;  %v2152_v59 = vadd.f32 %v6691_v0, %v653_v37  ;;  %v671_v40 = vld [vmem:[%s6188_s28 + $0x18] sm:$0xff]  ;;  %v669_v43 = vld [vmem:[%s6188_s28 + $0x8] sm:$0xff] }
 0x755   : > { %v683_v5 = vld [vmem:[%s6188_s28 + $0x78] sm:$0xff]  ;;  %v681_v37 = vld [vmem:[%s6188_s28 + $0x68] sm:$0xff] }
 0x756   : > { %v2170_v49 = vadd.f32 %v2154_v10, %v671_v40 }
 0x757   : > { %3062 = vrot.lane.b32.xlu1 %v2951_v55, %s5765_s7  ;;  %v659_v55 = vld [vmem:[#allocation5 + $0x38] sm:$0xff] }
 0x758   : > { %v2158_v0 = vadd.f32 %v6714_v28, %v659_v55 }
 0x75b   : > { %3102 = vrot.lane.b32.xlu1 %v3031_v46, %s5766_s8 }
 0x7a9   : > { %v3051_v2 = vpop.permute.xlu1 %3050 }
 0x7aa   : > { %3073 = vst.msk [vmem:[#allocation2 + $0x10] sm:$0xff] %vm851_vm7, %v3051_v2  ;;  %v3049_v19 = vpop.permute.xlu0 %3048  ;;  %v657_v2 = vld [vmem:[#allocation5 + $0x28] sm:$0xff] }
 0x7ab   : > { %3072 = vst.msk [vmem:[#allocation2 + $0x8] sm:$0xff] %vm851_vm7, %v3049_v19 }
 0x7ae   : > { %v3089_v21 = vpop.permute.xlu0 %3088 }
 0x7af   : > { %3112 = vst.msk [vmem:[#allocation2 + $0x8] sm:$0xff] %vm892_vm8, %v3089_v21 }
 0x7b2   : > { %v3053_v18 = vpop.permute.xlu0 %3052 }
 0x7b3   : > { %3074 = vst.msk [vmem:[#allocation2 + $0x18] sm:$0xff] %vm851_vm7, %v3053_v18 }
 0x7b5   : > { %v3091_v53 = vpop.permute.xlu1 %3090 }
 0x7b6   : > { %3113 = vst.msk [vmem:[#allocation2 + $0x10] sm:$0xff] %vm892_vm8, %v3091_v53  ;;  %v3093_v54 = vpop.permute.xlu0 %3092  ;;  %v3121_v51 = vld [vmem:[#allocation2 + $0x8] sm:$0xff] }
 0x7b7   : > { %3114 = vst.msk [vmem:[#allocation2 + $0x18] sm:$0xff] %vm892_vm8, %v3093_v54  ;;  %4850 = vmatprep.mubr.msk.bf16.mxu1 %vm531_vm0, %v3121_v51 }
 0x7b9   : > { %v3055_v16 = vpop.permute.xlu1 %3054 }
 0x7ba   : > { %3075 = vst.msk [vmem:[#allocation2 + $0x20] sm:$0xff] %vm851_vm7, %v3055_v16  ;;  %v3057_v41 = vpop.permute.xlu0 %3056 }
 0x7bb   : > { %3076 = vst.msk [vmem:[#allocation2 + $0x28] sm:$0xff] %vm851_vm7, %v3057_v41  ;;  %v675_v41 = vld [vmem:[%s6188_s28 + $0x38] sm:$0xff] }
 0x7bd   : > { %v3095_v27 = vpop.permute.xlu1 %3094  ;;  %v7083_v60 = vld [vmem:[#allocation2 + $0x10] sm:$0xff] }
 0x7be   : > { %3115 = vst.msk [vmem:[#allocation2 + $0x20] sm:$0xff] %vm892_vm8, %v3095_v27  ;;  %4851 = vmatmul.mubr.msk.bf16.vlgmr.msra.gmra.mrb[16].mxu1 %vm531_vm0, %v7083_v60  ;;  %v3097_v61 = vpop.permute.xlu0 %3096  ;;  %v7088_v62 = vld [vmem:[#allocation2 + $0x18] sm:$0xff] }
 0x7bf   : > { %4867 = vmatpush3.bf16.msra.mxu1 %v6960_v57  ;;  %3116 = vst.msk [vmem:[#allocation2 + $0x28] sm:$0xff] %vm892_vm8, %v3097_v61  ;;  %4854 = vmatprep.mubr.msk.bf16.mxu1 %vm531_vm0, %v7088_v62  ;;  %v663_v61 = vld [vmem:[#allocation5 + $0x58] sm:$0xff] }
 0x7c0   : > { %4868 = vmatprep.subr.bf16.mxu1 %v5324_v56 }
 0x7c1   : > { %v3059_v4 = vpop.permute.xlu1 %3058 }
 0x7c2   : > { %3077 = vst.msk [vmem:[#allocation2 + $0x30] sm:$0xff] %vm851_vm7, %v3059_v4  ;;  %v3061_v8 = vpop.permute.xlu0 %3060 }
 0x7c3   : > { %3078 = vst.msk [vmem:[#allocation2 + $0x38] sm:$0xff] %vm851_vm7, %v3061_v8  ;;  %4869 = vmatpush3.bf16.msra.mxu1 %v5324_v56  ;;  %v673_v56 = vld [vmem:[%s6188_s28 + $0x28] sm:$0xff] }
 0x7c4   : > { %4870 = vmatprep.subr.bf16.mxu1 %v5325_v3 }
 0x7c5   : > { %v3099_v11 = vpop.permute.xlu1 %3098  ;;  %v3124_v12 = vld [vmem:[#allocation2 + $0x20] sm:$0xff] }
 0x7c6   : > { %3117 = vst.msk [vmem:[#allocation2 + $0x30] sm:$0xff] %vm892_vm8, %v3099_v11  ;;  %4855 = vmatmul.mubr.msk.bf16.gmra.mrb[20].mxu1 %vm531_vm0, %v3124_v12  ;;  %v3101_v57 = vpop.permute.xlu0 %3100  ;;  %v3125_v13 = vld [vmem:[#allocation2 + $0x28] sm:$0xff]  ;;  %v2162_v11 = vadd.f32 %v6757_v58, %v663_v61 }
 0x7c7   : > { %3118 = vst.msk [vmem:[#allocation2 + $0x38] sm:$0xff] %vm892_vm8, %v3101_v57  ;;  %4858 = vmatprep.mubr.msk.bf16.mxu1 %vm531_vm0, %v3125_v13  ;;  %4871 = vmatpush3.bf16.msra.mxu1 %v5325_v3  ;;  %v661_v3 = vld [vmem:[#allocation5 + $0x48] sm:$0xff] }
 0x7c8   : > { %4872 = vmatprep.subr.bf16.mxu1 %v5326_v9  ;;  %v2160_v57 = vadd.f32 %v6770_v63, %v661_v3 }
 0x7c9   : > { %v3063_v20 = vpop.permute.xlu1 %3062 }
 0x7ca   : > { %3079 = vst.msk [vmem:[#allocation2 + $0x40] sm:$0xff] %vm851_vm7, %v3063_v20  ;;  %v677_v20 = vld [vmem:[%s6188_s28 + $0x48] sm:$0xff] }
 0x7cb   : > { %4873 = vmatpush3.bf16.msra.mxu1 %v5326_v9 }
 0x7cc   : > { %4874 = vmatprep.subr.bf16.mxu1 %v5327_v14 }
 0x7cd   : > { %v3103_v23 = vpop.permute.xlu1 %3102  ;;  %v3126_v15 = vld [vmem:[#allocation2 + $0x30] sm:$0xff] }
 0x7ce   : > { %3119 = vst.msk [vmem:[#allocation2 + $0x40] sm:$0xff] %vm892_vm8, %v3103_v23  ;;  %4859 = vmatmul.mubr.msk.bf16.gmra.mrb[24].mxu1 %vm531_vm0, %v3126_v15  ;;  %v3127_v24 = vld [vmem:[#allocation2 + $0x38] sm:$0xff] }
 0x7cf   : > { %4862 = vmatprep.mubr.msk.bf16.mxu1 %vm531_vm0, %v3127_v24  ;;  %4875 = vmatpush3.bf16.msra.mxu1 %v5327_v14  ;;  %v679_v14 = vld [vmem:[%s6188_s28 + $0x58] sm:$0xff]  ;;  %s5737_s28 = smov 0  }
 0x7d0   : > { %4876 = vmatprep.subr.bf16.mxu1 %v5328_v22 }
 0x7d3   : > { %4877 = vmatpush3.bf16.msra.mxu1 %v5328_v22 }
 0x7d4   : > { %4894 = vmatprep.subr.bf16.mxu1 %v5329_v25 }
 0x7d5   : > { %v3140_v26 = vld [vmem:[#allocation2 + $0x40] sm:$0xff] }
 0x7d6   : > { %4863 = vmatmul.mubr.msk.bf16.gmra.mrb[28].mxu1 %vm531_vm0, %v3140_v26 }
 0x7d7   : > { %4878 = vmatprep.mubr.msk.bf16.mxu1 %vm531_vm0, %v6903_v7  ;;  %v5333_v7 = vld [vmem:[#allocation15 + $0x80] sm:$0xff]  }
 0x7de   : > { %4879 = vmatmul.mubr.msk.bf16.vlgmr.msra.gmra.mrb[16].mxu1 %vm531_vm0, %v3121_v51  ;;  %v2156_v51 = vadd.f32 %v6726_v33, %v657_v2  ;;  %v4374_v2 = vld [vmem:[#allocation18] ss:$0 sm:$0xff] }
 0x7df   : > { %4895 = vmatpush3.bf16.msra.mxu1 %v5329_v25  ;;  %4882 = vmatprep.mubr.msk.bf16.mxu1 %vm531_vm0, %v7083_v60  ;;  %v665_v25 = vld [vmem:[#allocation5 + $0x68] sm:$0xff] }
 0x7e0   : > { %4896 = vmatprep.subr.bf16.mxu1 %v5330_v30 }
 0x7e3   : > { %4897 = vmatpush3.bf16.msra.mxu1 %v5330_v30 }
 0x7e4   : > { %4898 = vmatprep.subr.bf16.mxu1 %v5331_v34 }
 0x7e6   : > { %4883 = vmatmul.mubr.msk.bf16.gmra.mrb[20].mxu1 %vm531_vm0, %v7088_v62 }
 0x7e7   : > { %4886 = vmatprep.mubr.msk.bf16.mxu1 %vm531_vm0, %v3124_v12  ;;  %4899 = vmatpush3.bf16.msra.mxu1 %v5331_v34 }
 0x7e8   : > { %4900 = vmatprep.subr.bf16.mxu1 %v5332_v31 }
 0x7eb   : > { %4901 = vmatpush3.bf16.msra.mxu1 %v5332_v31 }
 0x7ec   : > { %4902 = vmatprep.subr.bf16.mxu1 %v5333_v7 }
 0x7ee   : > { %4887 = vmatmul.mubr.msk.bf16.gmra.mrb[24].mxu1 %vm531_vm0, %v3125_v13 }
 0x7ef   : > { %4890 = vmatprep.mubr.msk.bf16.mxu1 %vm531_vm0, %v3126_v15  ;;  %4903 = vmatpush3.bf16.msra.mxu1 %v5333_v7 }
 0x7f0   : > { %4904 = vmatprep.subr.bf16.mxu1 %v5334_v39 }
 0x7f3   : > { %4905 = vmatpush3.bf16.msra.mxu1 %v5334_v39  ;;  %v2164_v39 = vadd.f32 %v6814_v48, %v665_v25 }
 0x7f4   : > { %4947 = vmatprep.subr.bf16.mxu1 %v7070_v52 }
 0x7f6   : > { %4891 = vmatmul.mubr.msk.bf16.gmra.mrb[28].mxu1 %vm531_vm0, %v3127_v24 }
 0x7f7   : > { %4906 = vmatprep.mubr.msk.bf16.mxu1 %vm531_vm0, %v7083_v60 }
 0x7fe   : > { %4907 = vmatmul.mubr.msk.bf16.vlgmr.msra.gmra.mrb[16].mxu1 %vm531_vm0, %v7088_v62  ;;  %v2172_v62 = vadd.f32 %v2156_v51, %v673_v56 }
 0x7ff   : > { %4910 = vmatprep.mubr.msk.bf16.mxu1 %vm531_vm0, %v3124_v12  ;;  %4949 = vmatpush3.bf16.msra.mxu1 %v7070_v52  ;;  %v2168_v52 = vadd.f32 %v2152_v59, %v669_v43  ;;  %v2180_v43 = vadd.f32 %v2164_v39, %v681_v37 }
 0x800   : > { %4948 = vmatprep.subr.bf16.mxu1 %v5336_v35 }
 0x803   : > { %4950 = vmatpush3.bf16.msra.mxu1 %v5336_v35 }
 0x806   : > { %4911 = vmatmul.mubr.msk.bf16.gmra.mrb[20].mxu1 %vm531_vm0, %v3125_v13 }
 0x807   : > { %4914 = vmatprep.mubr.msk.bf16.mxu1 %vm531_vm0, %v3126_v15  ;;  %v667_v15 = vld [vmem:[#allocation5 + $0x78] sm:$0xff] }
 0x808   : > { %v2166_v31 = vadd.f32 %v6801_v42, %v667_v15 }
 0x80e   : > { %4915 = vmatmul.mubr.msk.bf16.gmra.mrb[24].mxu1 %vm531_vm0, %v3127_v24  ;;  %v2176_v24 = vadd.f32 %v2160_v57, %v677_v20 }
 0x80f   : > { %4918 = vmatprep.mubr.msk.bf16.mxu1 %vm531_vm0, %v3140_v26 }
 0x816   : > { %4919 = vmatmul.mubr.msk.bf16.gmra.mrb[28].mxu1 %vm531_vm0, %v6926_v17 }
 0x8d1   : > { %v4908_v44 = vpop.f32.mrb[16].mxu1 }
 0x8d2   : > { %v3562_v46 = vpop.f32.mrb[17].mxu1  ;;  %v3643_v19 = vadd.f32 %v4908_v44, %v6689_v45  ;;  %v2174_v45 = vadd.f32 %v2158_v0, %v675_v41 }
 0x8d3   : > { %v4909_v17 = vpop.f32.mrb[18].mxu1  ;;  %v3641_v53 = vadd.f32 %v3562_v46, %v6693_v1 }
 0x8d4   : > { %v3644_v21 = vadd.f32 %v4909_v17, %v2170_v49  ;;  %v3565_v18 = vpop.f32.mrb[19].mxu1  ;;  %v7161_v17 = vld [vmem:[#allocation20] sm:$0xff] }
 0x8d5   : > { %v3642_v38 = vadd.f32 %v3565_v18, %v2168_v52  ;;  %v7163_v52 = vld [vmem:[#allocation20 + $0x8] sm:$0xff] }
 0x8d6   : > { %v3658_v54 = vpack.c.bf16 %v3644_v21, %v3643_v19 }
 0x8d7   : > { %v3657_v16 = vpack.c.bf16 %v3642_v38, %v3641_v53 }
 0x8d9   : > { %v4912_v27 = vpop.f32.mrb[20].mxu1  ;;  %4926 = vmatprep.mubr.msk.bf16.mxu0 %vm650_vm4, %v3657_v16 }
 0x8da   : > { %v3578_v60 = vpop.f32.mrb[21].mxu1  ;;  %4927 = vmatmul.mubr.msk.bf16.vlgmr.msra.gmra.mrb[32].mxu0 %vm650_vm4, %v3658_v54  ;;  %v3647_v28 = vadd.f32 %v4912_v27, %v6724_v32  ;;  %v2178_v32 = vadd.f32 %v2162_v11, %v679_v14 }
 0x8db   : > { %v4913_v1 = vpop.f32.mrb[22].mxu1  ;;  %v3645_v8 = vadd.f32 %v3578_v60, %v6728_v36 }
 0x8dc   : > { %v3648_v4 = vadd.f32 %v4913_v1, %v2174_v45  ;;  %v3581_v33 = vpop.f32.mrb[23].mxu1 }
 0x8dd   : > { %v3646_v9 = vadd.f32 %v3581_v33, %v2172_v62 }
 0x8de   : > { %v3660_v12 = vpack.c.bf16 %v3648_v4, %v3647_v28 }
 0x8df   : > { %v3659_v13 = vpack.c.bf16 %v3646_v9, %v3645_v8 }
 0x8e1   : > { %v4916_v22 = vpop.f32.mrb[24].mxu1  ;;  %4930 = vmatprep.mubr.msk.bf16.mxu0 %vm650_vm4, %v3659_v13 }
 0x8e2   : > { %v3594_v23 = vpop.f32.mrb[25].mxu1  ;;  %4931 = vmatmul.mubr.msk.bf16.gmra.mrb[36].mxu0 %vm650_vm4, %v3660_v12  ;;  %v3651_v58 = vadd.f32 %v4916_v22, %v6768_v29  ;;  %v2182_v29 = vadd.f32 %v2166_v31, %v683_v5 }
 0x8e3   : > { %v4917_v36 = vpop.f32.mrb[26].mxu1  ;;  %v3649_v30 = vadd.f32 %v3594_v23, %v6772_v6 }
 0x8e4   : > { %v3652_v26 = vadd.f32 %v4917_v36, %v2178_v32  ;;  %v3597_v63 = vpop.f32.mrb[27].mxu1 }
 0x8e5   : > { %v3650_v34 = vadd.f32 %v3597_v63, %v2176_v24 }
 0x8e6   : > { %v3662_v7 = vpack.c.bf16 %v3652_v26, %v3651_v58 }
 0x8e7   : > { %v3661_v35 = vpack.c.bf16 %v3650_v34, %v3649_v30 }
 0x8e9   : > { %v4920_v10 = vpop.f32.mrb[28].mxu1  ;;  %4934 = vmatprep.mubr.msk.bf16.mxu1 %vm650_vm4, %v3661_v35 }
 0x8ea   : > { %v3610_v59 = vpop.f32.mrb[29].mxu1  ;;  %4935 = vmatmul.mubr.msk.bf16.vlgmr.msra.gmra.mrb[32].mxu1 %vm650_vm4, %v3662_v7  ;;  %v3655_v6 = vadd.f32 %v4920_v10, %v6812_v47 }
 0x8eb   : > { %v4921_v40 = vpop.f32.mrb[30].mxu1  ;;  %v3653_v42 = vadd.f32 %v3610_v59, %v6816_v50 }
 0x8ec   : > { %v3656_v44 = vadd.f32 %v4921_v40, %v2182_v29  ;;  %v3613_v46 = vpop.f32.mrb[31].mxu1 }
 0x8ed   : > { %v3654_v49 = vadd.f32 %v3613_v46, %v2180_v43 }
 0x8ee   : > { %v3664_v48 = vpack.c.bf16 %v3656_v44, %v3655_v6 }
 0x8ef   : > { %v3663_v55 = vpack.c.bf16 %v3654_v49, %v3653_v42 }
 0x8f1   : > { %4938 = vmatprep.mubr.msk.bf16.mxu1 %vm650_vm4, %v3663_v55 }
 0x8f2   : > { %4939 = vmatmul.mubr.msk.bf16.gmra.mrb[36].mxu1 %vm650_vm4, %v3664_v48 }
 0x9ad   : > { %v4928_v19 = vpop.f32.mrb[32].mxu0 }
 0x9ae   : > { %v3755_v21 = vadd.f32 %v4928_v19, %v4374_v2  ;;  %v3746_v18 = vpop.f32.mrb[33].mxu0 }
 0x9af   : > { %v3747_v47 = vadd.f32 %v4374_v2, %v3746_v18  ;;  %v4929_v53 = vpop.f32.mrb[34].mxu0 }
 0x9b0   : > { %3811 = vst.msk [vmem:[#allocation3 + $0x10] sm:$0xff] %vm650_vm4, %v3755_v21  ;;  %v3758_v50 = vadd.f32 %v4929_v53, %v4374_v2  ;;  %v3749_v38 = vpop.f32.mrb[35].mxu0 }
 0x9b1   : > { %3809 = vst.msk [vmem:[#allocation3] sm:$0xff] %vm650_vm4, %v3747_v47  ;;  %v3750_v0 = vadd.f32 %v4374_v2, %v3749_v38 }
 0x9b2   : > { %3812 = vst.msk [vmem:[#allocation3 + $0x18] sm:$0xff] %vm650_vm4, %v3758_v50 }
 0x9b3   : > { %3810 = vst.msk [vmem:[#allocation3 + $0x8] sm:$0xff] %vm650_vm4, %v3750_v0 }
 0x9b5   : > { %v4932_v54 = vpop.f32.mrb[36].mxu0 }
 0x9b6   : > { %v3771_v51 = vadd.f32 %v4932_v54, %v4374_v2  ;;  %v3762_v16 = vpop.f32.mrb[37].mxu0 }
 0x9b7   : > { %v3763_v41 = vadd.f32 %v4374_v2, %v3762_v16  ;;  %v4933_v56 = vpop.f32.mrb[38].mxu0 }
 0x9b8   : > { %3815 = vst.msk [vmem:[#allocation3 + $0x30] sm:$0xff] %vm650_vm4, %v3771_v51  ;;  %v3774_v27 = vadd.f32 %v4933_v56, %v4374_v2  ;;  %v3765_v60 = vpop.f32.mrb[39].mxu0 }
 0x9b9   : > { %3813 = vst.msk [vmem:[#allocation3 + $0x20] sm:$0xff] %vm650_vm4, %v3763_v41  ;;  %v3766_v45 = vadd.f32 %v4374_v2, %v3765_v60 }
 0x9ba   : > { %3816 = vst.msk [vmem:[#allocation3 + $0x38] sm:$0xff] %vm650_vm4, %v3774_v27 }
 0x9bb   : > { %3814 = vst.msk [vmem:[#allocation3 + $0x28] sm:$0xff] %vm650_vm4, %v3766_v45 }
 0x9bd   : > { %v4936_v61 = vpop.f32.mrb[32].mxu1 }
 0x9be   : > { %v3787_v1 = vadd.f32 %v4936_v61, %v4374_v2  ;;  %v3778_v62 = vpop.f32.mrb[33].mxu1 }
 0x9bf   : > { %v3779_v3 = vadd.f32 %v4374_v2, %v3778_v62  ;;  %v4937_v28 = vpop.f32.mrb[34].mxu1 }
 0x9c0   : > { %3819 = vst.msk [vmem:[#allocation3 + $0x50] sm:$0xff] %vm650_vm4, %v3787_v1  ;;  %v3790_v4 = vadd.f32 %v4937_v28, %v4374_v2  ;;  %v3781_v33 = vpop.f32.mrb[35].mxu1 }
 0x9c1   : > { %3817 = vst.msk [vmem:[#allocation3 + $0x40] sm:$0xff] %vm650_vm4, %v3779_v3  ;;  %v3782_v8 = vadd.f32 %v4374_v2, %v3781_v33 }
 0x9c2   : > { %3820 = vst.msk [vmem:[#allocation3 + $0x58] sm:$0xff] %vm650_vm4, %v3790_v4 }
 0x9c3   : > { %3818 = vst.msk [vmem:[#allocation3 + $0x48] sm:$0xff] %vm650_vm4, %v3782_v8 }
 0x9c5   : > { %v4940_v9 = vpop.f32.mrb[36].mxu1 }
 0x9c6   : > { %v3803_v11 = vadd.f32 %v4940_v9, %v4374_v2  ;;  %v3794_v12 = vpop.f32.mrb[37].mxu1 }
 0x9c7   : > { %v3795_v57 = vadd.f32 %v4374_v2, %v3794_v12  ;;  %v4941_v13 = vpop.f32.mrb[38].mxu1 }
 0x9c8   : > { %3823 = vst.msk [vmem:[#allocation3 + $0x70] sm:$0xff] %vm650_vm4, %v3803_v11  ;;  %v3806_v14 = vadd.f32 %v4941_v13, %v4374_v2  ;;  %v3797_v20 = vpop.f32.mrb[39].mxu1 }
 0x9c9   : > { %3821 = vst.msk [vmem:[#allocation3 + $0x60] sm:$0xff] %vm650_vm4, %v3795_v57  ;;  %v3798_v22 = vadd.f32 %v4374_v2, %v3797_v20 }
 0x9ca   : > { %3824 = vst.msk [vmem:[#allocation3 + $0x78] sm:$0xff] %vm650_vm4, %v3806_v14 }
 0x9cb   : > { %3822 = vst.msk [vmem:[#allocation3 + $0x68] sm:$0xff] %vm650_vm4, %v3798_v22 }
 0x9cc LB: >> { %vm3836_vm9 = vcmask 64512   ;;  %s4385_s25 = sshll.u32 %s5739_s28, 4  ;;  %s3832_s28 = sadd.s32 1, %s5739_s28   ;;  %s5739_s28 = sphi %s5737_s28, %s3832_s28  }
 0x9cd   : >> { %4944 = vmatprep.mubr.msk.f32.mxu0 %vm3836_vm9, %v7161_v17  ;;  %s3834_s18 = scalar_lea.vmem [#allocation3], %s4385_s25  ;;  %s3918_s24 = scalar_lea.vmem [#allocation4], %s4385_s25 }
 0x9ce   : >> { %p3829_p8 = scmp.ge.s32.totalorder %s3832_s28, 8  }
 0x9cf   : > { %s7185_s27 = smov (%p3829_p8), 0  }
 0x9d2   : >> { %v3835_v23 = vld [vmem:[%s3834_s18] sm:$0xff] }
 0x9d3   : >> { %4942 = vmatprep.subr.mxu0 %v3835_v23 }
 0x9d4   : >> { %4943 = vmatpush3.msra.mxu0 %v3835_v23 }
 0x9d5   : >> { %4945 = vmatmul.mubr.msk.f32.vlgmr.msra.gmra.mrb[0].mxu0 %vm3836_vm9, %v7163_v52 }
 0xaa4   : > { %3831 = sbr.rel (!%p3829_p8) target bundleno = 2508 (0x9cc), region = 198 }
 0xaa8   : >> { %v4946_v32 = vpop.f32.mrb[0].mxu0 }
 0xaa9   : >> { %3920 = vst.msk [vmem:[%s3918_s24 + $0x8] sm:$0xff] %vm650_vm4, %v4946_v32  ;;  %v3909_v15 = vpop.f32.mrb[1].mxu0 }
 0xaaa   : >> { %3919 = vst.msk [vmem:[%s3918_s24] sm:$0xff] %vm650_vm4, %v3909_v15 }
 0xaab LB: >> { %s3927_s6 = scvt.s32.f32 %s5743_s27  ;;  %s5767_s17 = smov 7.0   ;;  %s5743_s27 = sphi %s7185_s27, %s3926_s27  }
 0xaac   : >> { %s4390_s28 = sshll.u32 %s5743_s27, 4  ;;  %s3926_s27 = sadd.s32 1, %s5743_s27  }
 0xaad   : >> { %s3928_s26 = smul.f32 0.46666667, %s3927_s6  ;;  %s3954_s18 = scalar_lea.vmem %s6227_s12, %s4390_s28 [#allocation23] }
 0xaae   : >> { %p3923_p12 = scmp.ge.s32.totalorder %s3926_s27, 16  }
 0xaaf   : >> { %s3929_s0 = smin.f32 %s5767_s17, %s3928_s26  ;;  %s4397_s24 = sshll.u32 (%p3923_p12), %s5847_s19, 12 }
 0xab0   : >> { %p5087_p11 = scmp.lt.s32.totalorder %s3929_s0, 0  ;;  %s5088_s5 = sceil.f32 %s3929_s0 }
 0xab1   : >> { %s5089_s10 = sfloor.f32 %s3929_s0  ;;  %s7313_s17 = sld [smem:[#allocation42_spill]] (%p3923_p12) }
 0xab2   : >> { %s7326_s5 = smov (!%p5087_p11, %s5088_s5), %s5089_s10  ;;  %s3958_s10 = scalar_lea.sflag (%p3923_p12), [#allocation8], %s6184_s3 }
 0xab3   : >> { %s5091_s20 = scvt.f32.s32 %s7326_s5  ;;  %s3971_s5 = sshll.u32 (%p3923_p12), %s6227_s12, 4  ;;  %s7205_s5 = int_to_ptr.vmem [resolvable:$true] %s3971_s5 }
 0xab4   : > { %p7314_p1 = scmp.ne.s32.totalorder (%p3923_p12), %s7293_s21, 0  ;;  %s5768_s27 = smov (%p3923_p12), [#allocation23]  }
 0xab5   : >> { %s3931_s29 = sadd.s32 1, %s5091_s20  ;;  %s3934_s30 = scvt.s32.f32 %s5091_s20 }
 0xab6   : >> { %p3932_p0 = scmp.lt.s32.totalorder %s3931_s29, 7  ;;  %s4388_s4 = sshll.u32 %s5091_s20, 4 }
 0xab7   : >> { %s3935_s11 = ssub.f32 %s3929_s0, %s3934_s30  ;;  %s3938_s7 = scalar_lea.vmem [#allocation4], %s4388_s4 }
 0xab8   : >> { %s7328_s29 = smov (!%p3932_p0, %s3931_s29), 7  ;;  %v3939_v36 = vld [vmem:[%s3938_s7] sm:$0xff]  ;;  %v3940_v24 = vld [vmem:[%s3938_s7 + $0x8] sm:$0xff]  ;;  %s7202_s0 = scalar_lea.hbm (%p3923_p12), %s7313_s17, %s4397_s24 }
 0xab9   : >> { %s3936_s1 = ssub.f32 1.0, %s3935_s11  ;;  %s4389_s8 = sshll.u32 %s7328_s29, 4  ;;  %v3948_v25 = vstv %s3935_s11 }
 0xaba   : >> { %s3945_s25 = scalar_lea.vmem [#allocation4], %s4389_s8  ;;  %3925 = sbr.rel (!%p3923_p12) target bundleno = 2731 (0xaab), region = 209 }
 0xabb   : >> { %v3941_v58 = vstv %s3936_s1  ;;  %v3946_v63 = vld [vmem:[%s3945_s25] sm:$0xff]  ;;  %v3947_v34 = vld [vmem:[%s3945_s25 + $0x8] sm:$0xff]  ;;  %s5629_s20 = scalar_lea.vmem (%p3923_p12), %s7205_s5, 4096  ;;  %s5633_s29 = sshll.u32 (%p3923_p12), %s5768_s27, 4  ;;  %s5634_s29 = int_to_ptr.vmem [resolvable:$false] %s5633_s29 }
 0xabc   : >> { %v3942_v26 = vmul.f32 %v3941_v58, %v3939_v36  ;;  %v3943_v30 = vmul.f32 %v3941_v58, %v3940_v24  ;;  %v3949_v31 = vmul.f32 %v3948_v25, %v3946_v63  ;;  %v3950_v7 = vmul.f32 %v3948_v25, %v3947_v34  ;;  %p5630_p13 = scmp.ne.s32.totalorder (%p3923_p12), %s7205_s5, %s5629_s20  ;;  %s5635_s19 = scalar_lea.vmem (%p3923_p12), %s5634_s29, 8192 }
 0xabd   : > { %p5636_p2 = scmp.lt.s32.totalorder (%p3923_p12), %s7205_s5, %s5634_s29  ;;  %p5637_p4 = scmp.lt.s32.totalorder (%p3923_p12), %s5635_s19, %s5629_s20 }
 0xabe   : >> { %v3951_v39 = vadd.f32 %v3949_v31, %v3942_v26  ;;  %v3952_v35 = vadd.f32 %v3950_v7, %v3943_v30  ;;  %p5631_p3 = pnand (%p3923_p12), %p5630_p13, %p7314_p1 }
 0xabf   : > { %p5638_p10 = por (%p3923_p12), %p5637_p4, %p5636_p2 }
 0xac0   : >> { %3955 = vst.msk [vmem:[%s3954_s18] sm:$0xff] %vm650_vm4, %v3951_v39  ;;  %3956 = vst.msk [vmem:[%s3954_s18 + $0x8] sm:$0xff] %vm650_vm4, %v3952_v35  ;;  %p5632_p6 = pneg (%p3923_p12), %p5631_p3 }
 0xac2   : > { %p5639_p5 = pnand %p5638_p10, %p5632_p6 }
 0xac4   : > { %5642 = shalt.err (!%p5639_p5)
}
 0xac5   : > { %s5643_s12 = scalar_lea.hbm %s7202_s0, 4096  ;;  %s5647_s11 = scalar_lea.hbm %s7313_s17, 8192 }
 0xac6   : > { %p5644_p7 = scmp.ne.s32.totalorder %s7202_s0, %s5643_s12  ;;  %p5648_p11 = scmp.lt.u32.totalorder %s7202_s0, %s7313_s17 }
 0xac7   : > { %p5649_p0 = scmp.lt.u32.totalorder %s5647_s11, %s5643_s12  ;;  %p5651_p13 = scmp.lt.u32.totalorder %s5643_s12, %s7202_s0 }
 0xac8   : > { %p5645_p9 = pnand %p5644_p7, %p7314_p1 }
 0xac9   : > { %p5650_p12 = por %p5649_p0, %p5648_p11 }
 0xaca   : > { %p5646_p8 = pneg %p5645_p9 }
 0xacb   : > { %p5652_p3 = por %p5651_p13, %p5650_p12 }
 0xacd   : > { %p5653_p6 = pnand %p5652_p3, %p5646_p8 }
 0xacf   : > { %5656 = shalt.err (!%p5653_p6)
}
 0xad0   : > { %s5769_s8 = smov 128   ;;  %s5770_s28 = smov 8  }
 0xad1   : > { %5128 = dma.vmem_to_hbm [thread:$0]  (%p7314_p1), %s7205_s5, 4096, %s7202_s0, %s3958_s10, %s5769_s8, %s5769_s8, %s5770_s28  }
 0xad2 PF: > { %s3986_s25 = sand.u32 1, %s5719_s13   ;;  %p7315_p2 = scmp.ne.s32.totalorder %s7294_s22, 0 }
 0xad3   : > { %p7316_p4 = scmp.ge.s32.totalorder %s5731_s16, 2  ;;  %s3987_s18 = scalar_lea.sflag [#allocation8], %s3986_s25 }
 0xad5   : > { %p5163_p10 = pnand %p7316_p4, %p7315_p2 }
 0xad7   : > { %5714 = dma.done.wait (!%p5163_p10), %s3987_s18, 4096  }
 0xad8   : > { %5716 = vsyncadd (!%p5163_p10), %s3987_s18, 4294963200  ;;  %p30_p5 = scmp.ge.s32.totalorder %s6056_s23, 4   ;;  %s7317_s13 = smov %s5723_s14 }
 0xad9   : > { %s7318_s14 = smov %s5727_s15  ;;  %s7319_s15 = smov %s6067_s2 }
 0xada   : > { %s7320_s16 = smov %s6056_s23  ;;  %32 = sbr.rel (!%p30_p5) target bundleno = 22 (0x16), region = 220 }
 0xae1   :  { %3992 = vsyncpa [#allocation7], 1 }
 0xae2   :  { %3994 = vsyncpa [#allocation7 + $0x1], 1 }
 0xae3   :  { %3995 = vsyncpa [#allocation10], 1 }
 0xae4   :  { %3997 = vsyncpa [#allocation10 + $0x1], 1 }
 0xae5   :  { %3998 = vsyncpa [#allocation13], 1 }
 0xae6   :  { %3999 = vsyncpa [#allocation16], 1 }
 0xae7   :  { %4000 = vsyncpa [#allocation19], 1 }
 0xae8   :  { %4001 = vsyncpa [#allocation22], 1 }
 0xae9   :  { %4002 = vsyncpa [#allocation8], 1 }
 0xaea   :  { %4004 = vsyncpa [#allocation8 + $0x1], 1 }

</bundles_post_ra>
